<compile_context>
chip_gen: v6e
topology: v6e:2x2x1
jax: 0.10.0
libtpu: 0.0.40
codegen_flags: <defaults>
</compile_context>

<pallas_src>
import functools

import jax
import jax.numpy as jnp
from jax.experimental import pallas as pl
from jax.experimental.pallas import tpu as pltpu


_VMEM = pl.BlockSpec(memory_space=pltpu.MemorySpace.VMEM)


def _round_up(x, m):
    return ((x + m - 1) // m) * m


# --------------------------------------------------------------------------
# In-kernel helpers
# --------------------------------------------------------------------------

def _lstm_cell(gates, c_prev, H):
    """Stacked (fwd;bwd) LSTM cell update. Gate columns are pre-permuted to [i,f,o|g]."""
    sig = jax.nn.sigmoid(gates[:, :3 * H])        # one EUP slab for i, f, o
    g = jnp.tanh(gates[:, 3 * H:])
    i = sig[:, 0 * H:1 * H]
    f = sig[:, 1 * H:2 * H]
    o = sig[:, 2 * H:3 * H]
    c = f * c_prev + i * g
    h = o * jnp.tanh(c)
    return h, c


# --------------------------------------------------------------------------
# The fused Pallas kernel (embedding + all BiLSTM layers + classifier head)
# --------------------------------------------------------------------------

def fused_classifier_kernel(ids_ref, emb_ref, *rest, T, B, Bp, H, n_layers):
    """Whole forward pass in one kernel.

    ids_ref : SMEM (T*Bp,) int32   time-major, batch-padded token ids (scalar prefetch)
    emb_ref : VMEM (V, DPAD) f32   lane-padded embedding table (row 0 == 0, padding_idx)
    per layer l (VMEM):
      w_ih_l : (DPAD, 8H) bf16     [fwd|bwd] input weights, gates [i,f,o,g], zero-padded rows
      w_hh_l : (2H, 4H)  bf16      row-stacked [W_hh_fwd ; W_hh_bwd] for the block-diag matmul
      b_l    : (1, 8H)   f32       fused b_ih + b_hh, both directions
    cls_w   : (1, 2H) f32, cls_b : (1, 1) f32
    o_ref   : (B, 1)  f32 logits
    scratch : x_scr (T*Bp, DPAD) f32 activation slab; xp_scr (T*Bp, 8H) f32 input proj
    """
    lw = rest[:3 * n_layers]
    cls_w_ref = rest[3 * n_layers]
    cls_b_ref = rest[3 * n_layers + 1]
    o_ref = rest[3 * n_layers + 2]
    x_scr = rest[3 * n_layers + 3]
    xp_scr = rest[3 * n_layers + 4]

    TB = T * Bp

    # ---- embedding gather: scalar ids from SMEM index dynamic rows of the VMEM table.
    for r in range(TB):
        tok = ids_ref[r]
        x_scr[pl.ds(r, 1), :] = emb_ref[pl.ds(tok, 1), :]

    # Block-diagonal mask used to build the recurrent matmul LHS [h_f | 0 ; 0 | h_b].
    row = jax.lax.broadcasted_iota(jnp.int32, (2 * Bp, 2 * H), 0)
    col = jax.lax.broadcasted_iota(jnp.int32, (2 * Bp, 2 * H), 1)
    diag = jnp.logical_or(jnp.logical_and(row < Bp, col < H),
                          jnp.logical_and(row >= Bp, col >= H))

    for layer in range(n_layers):
        w_ih_ref = lw[3 * layer]
        w_hh_ref = lw[3 * layer + 1]
        b_ref = lw[3 * layer + 2]
        is_last = layer == n_layers - 1

        # Hoisted input projection for BOTH directions + bias: one MXU matmul, staged
        # through VMEM scratch so vreg pressure stays flat in T.
        # TODO(synk): for long sequences the bwd half of the LAST layer's projection is
        #             only needed for the final time block (negligible at T=8).
        x = x_scr[...].astype(jnp.bfloat16)
        xp_scr[...] = jnp.dot(x, w_ih_ref[...],
                              preferred_element_type=jnp.float32) + b_ref[...]
        w_hh = w_hh_ref[...]                                    # (2H, 4H) bf16

        hs = jnp.zeros((2 * Bp, H), jnp.float32)                # stacked [h_fwd ; h_bwd]
        cs = jnp.zeros((2 * Bp, H), jnp.float32)
        hb_last_step = hs[Bp:]
        for t in range(T):                                      # fully unrolled, T static
            rf = t * Bp                                         # fwd reads time t
            rb = (T - 1 - t) * Bp                               # bwd reads time T-1-t
            gx = jnp.concatenate(
                [xp_scr[pl.ds(rf, Bp), pl.ds(0, 4 * H)],
                 xp_scr[pl.ds(rb, Bp), pl.ds(4 * H, 4 * H)]], axis=0)   # (2Bp, 4H)
            if t == 0:
                g = gx                                          # h == c == 0 at step 0
            else:
                wide = jnp.concatenate([hs, hs], axis=1)        # (2Bp, 2H)
                lhs = jnp.where(diag, wide, 0.0).astype(jnp.bfloat16)
                g = gx + jnp.dot(lhs, w_hh, preferred_element_type=jnp.float32)
            hs, cs = _lstm_cell(g, cs, H)
            if not is_last:
                # Scatter this step's outputs straight into the activation slab
                # (time-major, [fwd | bwd] feature halves; padded cols stay zero).
                x_scr[pl.ds(rf, Bp), pl.ds(0, H)] = hs[:Bp]
                x_scr[pl.ds(rb, Bp), pl.ds(H, H)] = hs[Bp:]
                # TODO(synk): inter-layer nn.Dropout(p=0.5) is identity at inference.
            elif t == 0:
                hb_last_step = hs[Bp:]        # bwd output at time T-1 (= its first step)

        if is_last:
            # output[:, -1, :] = [fwd h_{T-1} || bwd h at time T-1]; the classifier is a
            # VPU multiply + lane reduce (no N=1 MXU matmul).
            # TODO(synk): nn.Dropout(p=0.5) before the classifier is identity at inference.
            last = jnp.concatenate([hs[:Bp], hb_last_step], axis=1)     # (Bp, 2H)
            logits = (jnp.sum(last * cls_w_ref[...], axis=-1, keepdims=True)
                      + cls_b_ref[...])
            o_ref[...] = logits[:B, :]


# --------------------------------------------------------------------------
# Parameter construction (PyTorch layout) and one-time prepacking
# --------------------------------------------------------------------------

def init_params(key, n_vocab, hidden_dim, embedding_dim, n_layers):
    """Deterministic PyTorch-default-style init, PyTorch weight layout."""
    params = {}
    k_emb, key = jax.random.split(key)
    emb = jax.random.normal(k_emb, (n_vocab, embedding_dim), jnp.float32)
    emb = emb.at[0].set(0.0)                       # padding_idx=0
    params["embedding"] = emb

    num_dirs = 2                                    # bidirectional=True
    std = 1.0 / jnp.sqrt(hidden_dim)
    for layer in range(n_layers):
        in_dim = embedding_dim if layer == 0 else hidden_dim * num_dirs
        for d in range(num_dirs):
            keys = jax.random.split(key, 5)
            key = keys[0]
            params[f"l{layer}_d{d}"] = {
                "w_ih": jax.random.uniform(keys[1], (4 * hidden_dim, in_dim),
                                           jnp.float32, -std, std),
                "w_hh": jax.random.uniform(keys[2], (4 * hidden_dim, hidden_dim),
                                           jnp.float32, -std, std),
                "b_ih": jax.random.uniform(keys[3], (4 * hidden_dim,),
                                           jnp.float32, -std, std),
                "b_hh": jax.random.uniform(keys[4], (4 * hidden_dim,),
                                           jnp.float32, -std, std),
            }

    keys = jax.random.split(key, 3)
    feat = hidden_dim * num_dirs
    cstd = 1.0 / jnp.sqrt(feat)
    params["cls_w"] = jax.random.uniform(keys[1], (1, feat), jnp.float32, -cstd, cstd)
    params["cls_b"] = jax.random.uniform(keys[2], (1,), jnp.float32, -cstd, cstd)
    return params


def prepack_params(params, n_layers, hidden_dim, embedding_dim):
    """One-time repack (at init, not per forward): transpose to (In,4H)/(H,4H), fuse
    b_ih+b_hh, reorder gates PyTorch (i,f,g,o) -> (i,f,o,g), concatenate directions'
    input weights to (DPAD,8H) with zero rows for lane padding, stack the two W_hh as a
    (2H,4H) block for the block-diagonal recurrent matmul, pad the embedding table to
    DPAD lanes, and cast MXU operands to bf16."""
    H = hidden_dim
    feat = 2 * H
    dpad = _round_up(max(embedding_dim, feat, 128), 128)
    perm = jnp.concatenate([jnp.arange(0, 2 * H),        # i, f
                            jnp.arange(3 * H, 4 * H),    # o
                            jnp.arange(2 * H, 3 * H)])   # g

    emb = params["embedding"]
    emb_p = jnp.zeros((emb.shape[0], dpad), jnp.float32).at[:, :embedding_dim].set(emb)
    packed = {"embedding": emb_p}

    for layer in range(n_layers):
        in_dim = embedding_dim if layer == 0 else feat
        w_ih = jnp.zeros((dpad, 8 * H), jnp.float32)
        w_hh = jnp.zeros((2 * H, 4 * H), jnp.float32)
        b = jnp.zeros((1, 8 * H), jnp.float32)
        for d in range(2):
            p = params[f"l{layer}_d{d}"]
            w_ih = w_ih.at[:in_dim, d * 4 * H:(d + 1) * 4 * H].set(
                jnp.transpose(p["w_ih"][perm]))
            w_hh = w_hh.at[d * H:(d + 1) * H, :].set(jnp.transpose(p["w_hh"][perm]))
            b = b.at[0, d * 4 * H:(d + 1) * 4 * H].set((p["b_ih"] + p["b_hh"])[perm])
        packed[f"l{layer}"] = {"w_ih": w_ih.astype(jnp.bfloat16),
                               "w_hh": w_hh.astype(jnp.bfloat16),
                               "b": b}

    packed["cls_w"] = params["cls_w"].astype(jnp.float32)            # (1, 2H)
    packed["cls_b"] = params["cls_b"].reshape(1, 1).astype(jnp.float32)
    return packed


# --------------------------------------------------------------------------
# Forward pass (inference semantics: dropout == identity)
# --------------------------------------------------------------------------

@functools.partial(jax.jit, static_argnames=("n_layers",))
def sentence_classifier_forward(packed, token_ids, *, n_layers):
    B, T = token_ids.shape
    H = packed["cls_w"].shape[1] // 2
    DPAD = packed["embedding"].shape[1]
    Bp = _round_up(max(B, 1), 4)          # stacked fwd/bwd state fills 8 sublanes

    # Time-major, batch-padded token ids (pad token 0 == padding_idx), flattened so row
    # t*Bp + b is (time t, batch b); padded rows never mix with real ones.
    ids_tm = jnp.transpose(token_ids).astype(jnp.int32)        # (T, B)
    ids_tm = jnp.pad(ids_tm, ((0, 0), (0, Bp - B)))
    ids_flat = ids_tm.reshape(T * Bp)

    weight_args = []
    for layer in range(n_layers):
        lwp = packed[f"l{layer}"]
        weight_args += [lwp["w_ih"], lwp["w_hh"], lwp["b"]]

    kernel = functools.partial(fused_classifier_kernel,
                               T=T, B=B, Bp=Bp, H=H, n_layers=n_layers)
    return pl.pallas_call(
        kernel,
        out_shape=jax.ShapeDtypeStruct((B, 1), jnp.float32),
        grid_spec=pltpu.PrefetchScalarGridSpec(
            num_scalar_prefetch=1,
            grid=(1,),
            in_specs=[_VMEM] * (3 + 3 * n_layers),
            out_specs=_VMEM,
            scratch_shapes=[
                pltpu.VMEM((T * Bp, DPAD), jnp.float32),     # activation slab
                pltpu.VMEM((T * Bp, 8 * H), jnp.float32),    # hoisted input projection
            ]),
        compiler_params=pltpu.CompilerParams(
            dimension_semantics=("arbitrary",)),
    )(ids_flat, packed["embedding"], *weight_args, packed["cls_w"], packed["cls_b"])


# TODO(synk): model_type='rnn' and unidirectional variants of the module are not
#             implemented (defaults used: lstm, bidirectional=True).
# TODO(synk): on v7x the two directions (or batch halves) could be split across the two
#             TensorCores via a parallel grid axis; single-core path used here.


# --------------------------------------------------------------------------
# Pure-JAX f32 reference (PyTorch semantics) for tolerance validation
# --------------------------------------------------------------------------

def reference_forward(params, token_ids, n_layers, hidden_dim):
    H = hidden_dim
    x = params["embedding"][token_ids]                     # (B, T, E)
    B, T, _ = x.shape
    for layer in range(n_layers):
        outs = []
        for d in range(2):
            p = params[f"l{layer}_d{d}"]
            w_ih, w_hh = p["w_ih"], p["w_hh"]              # (4H, In), (4H, H)
            b = p["b_ih"] + p["b_hh"]
            h = jnp.zeros((B, H), jnp.float32)
            c = jnp.zeros((B, H), jnp.float32)
            seq = range(T) if d == 0 else range(T - 1, -1, -1)
            hs = [None] * T
            for t in seq:
                g = x[:, t, :] @ w_ih.T + h @ w_hh.T + b
                i = jax.nn.sigmoid(g[:, 0 * H:1 * H])
                f = jax.nn.sigmoid(g[:, 1 * H:2 * H])
                gg = jnp.tanh(g[:, 2 * H:3 * H])
                o = jax.nn.sigmoid(g[:, 3 * H:4 * H])
                c = f * c + i * gg
                h = o * jnp.tanh(c)
                hs[t] = h
            outs.append(jnp.stack(hs, axis=1))             # (B, T, H)
        x = jnp.concatenate(outs, axis=2)                  # (B, T, 2H)
    last = x[:, -1, :]
    return last @ params["cls_w"].T + params["cls_b"]      # (B, 1)


# --------------------------------------------------------------------------
# Demo
# --------------------------------------------------------------------------

if __name__ == "__main__":
    N_VOCAB = 50
    HIDDEN_DIM = 32
    EMBED_DIM = 32
    N_LAYERS = 2
    BATCH = 2
    SEQ = 8

    key = jax.random.PRNGKey(0)
    k_param, k_data = jax.random.split(key)

    raw_params = init_params(k_param, N_VOCAB, HIDDEN_DIM, EMBED_DIM, N_LAYERS)
    packed = prepack_params(raw_params, N_LAYERS, HIDDEN_DIM, EMBED_DIM)

    token_ids = jax.random.randint(k_data, (BATCH, SEQ), 0, N_VOCAB, dtype=jnp.int32)

    logits = sentence_classifier_forward(packed, token_ids, n_layers=N_LAYERS)
    logits = jax.block_until_ready(logits)

    assert logits.shape == (BATCH, 1) and logits.dtype == jnp.float32
    assert bool(jnp.all(jnp.isfinite(logits)))

    ref = reference_forward(raw_params, token_ids, N_LAYERS, HIDDEN_DIM)
    assert bool(jnp.allclose(logits, ref, atol=5e-2, rtol=5e-2)), (logits, ref)

    print("KERNEL_OK")
</pallas_src>

<mosaic_0001>
module attributes {stable_mosaic.version = 11 : i64} {
  func.func @fused_classifier_kernel(%arg0: i32, %arg1: memref<32xi32, #tpu.memory_space<smem>>, %arg2: memref<50x128xf32, #tpu.memory_space<vmem>>, %arg3: memref<128x256xbf16, #tpu.memory_space<vmem>>, %arg4: memref<64x128xbf16, #tpu.memory_space<vmem>>, %arg5: memref<1x256xf32, #tpu.memory_space<vmem>>, %arg6: memref<128x256xbf16, #tpu.memory_space<vmem>>, %arg7: memref<64x128xbf16, #tpu.memory_space<vmem>>, %arg8: memref<1x256xf32, #tpu.memory_space<vmem>>, %arg9: memref<1x64xf32, #tpu.memory_space<vmem>>, %arg10: memref<1x1xf32, #tpu.memory_space<vmem>>, %arg11: memref<2x1xf32, #tpu.memory_space<vmem>>, %arg12: memref<32x128xf32, #tpu.memory_space<vmem>>, %arg13: memref<32x256xf32, #tpu.memory_space<vmem>>) attributes {dimension_semantics = [#tpu.dimension_semantics<arbitrary>], iteration_bounds = array<i64: 1>, scalar_prefetch = 1 : i64, scratch_operands = 2 : i64, tpu.core_type = #tpu.core_type<tc>, window_params = [{pipeline_mode = #tpu.pipeline_mode<synchronous>, transform_indices = @transform_0, window_bounds = array<i64: 50, 128>}, {pipeline_mode = #tpu.pipeline_mode<synchronous>, transform_indices = @transform_1, window_bounds = array<i64: 128, 256>}, {pipeline_mode = #tpu.pipeline_mode<synchronous>, transform_indices = @transform_2, window_bounds = array<i64: 64, 128>}, {pipeline_mode = #tpu.pipeline_mode<synchronous>, transform_indices = @transform_3, window_bounds = array<i64: 1, 256>}, {pipeline_mode = #tpu.pipeline_mode<synchronous>, transform_indices = @transform_4, window_bounds = array<i64: 128, 256>}, {pipeline_mode = #tpu.pipeline_mode<synchronous>, transform_indices = @transform_5, window_bounds = array<i64: 64, 128>}, {pipeline_mode = #tpu.pipeline_mode<synchronous>, transform_indices = @transform_6, window_bounds = array<i64: 1, 256>}, {pipeline_mode = #tpu.pipeline_mode<synchronous>, transform_indices = @transform_7, window_bounds = array<i64: 1, 64>}, {pipeline_mode = #tpu.pipeline_mode<synchronous>, transform_indices = @transform_8, window_bounds = array<i64: 1, 1>}, {pipeline_mode = #tpu.pipeline_mode<synchronous>, transform_indices = @transform_9, window_bounds = array<i64: 2, 1>}]} {
    %c0 = arith.constant 0 : index
    %0 = memref.load %arg1[%c0] : memref<32xi32, #tpu.memory_space<smem>>
    %1 = arith.index_cast %0 : i32 to index
    %c0_0 = arith.constant 0 : index
    %2 = vector.load %arg2[%1, %c0_0] : memref<50x128xf32, #tpu.memory_space<vmem>>, vector<1x128xf32>
    %c0_1 = arith.constant 0 : index
    %c0_2 = arith.constant 0 : index
    %3 = vector.load %arg12[%c0_1, %c0_2] : memref<32x128xf32, #tpu.memory_space<vmem>>, vector<1x128xf32>
    tpu.vector_store %arg12[%c0_1, %c0_2], %2 {strides = array<i32>} : memref<32x128xf32, #tpu.memory_space<vmem>>, vector<1x128xf32>,
    %c1 = arith.constant 1 : index
    %4 = memref.load %arg1[%c1] : memref<32xi32, #tpu.memory_space<smem>>
    %5 = arith.index_cast %4 : i32 to index
    %c0_3 = arith.constant 0 : index
    %6 = vector.load %arg2[%5, %c0_3] : memref<50x128xf32, #tpu.memory_space<vmem>>, vector<1x128xf32>
    %c1_4 = arith.constant 1 : index
    %c0_5 = arith.constant 0 : index
    %7 = vector.load %arg12[%c1_4, %c0_5] : memref<32x128xf32, #tpu.memory_space<vmem>>, vector<1x128xf32>
    tpu.vector_store %arg12[%c1_4, %c0_5], %6 {strides = array<i32>} : memref<32x128xf32, #tpu.memory_space<vmem>>, vector<1x128xf32>,
    %c2 = arith.constant 2 : index
    %8 = memref.load %arg1[%c2] : memref<32xi32, #tpu.memory_space<smem>>
    %9 = arith.index_cast %8 : i32 to index
    %c0_6 = arith.constant 0 : index
    %10 = vector.load %arg2[%9, %c0_6] : memref<50x128xf32, #tpu.memory_space<vmem>>, vector<1x128xf32>
    %c2_7 = arith.constant 2 : index
    %c0_8 = arith.constant 0 : index
    %11 = vector.load %arg12[%c2_7, %c0_8] : memref<32x128xf32, #tpu.memory_space<vmem>>, vector<1x128xf32>
    tpu.vector_store %arg12[%c2_7, %c0_8], %10 {strides = array<i32>} : memref<32x128xf32, #tpu.memory_space<vmem>>, vector<1x128xf32>,
    %c3 = arith.constant 3 : index
    %12 = memref.load %arg1[%c3] : memref<32xi32, #tpu.memory_space<smem>>
    %13 = arith.index_cast %12 : i32 to index
    %c0_9 = arith.constant 0 : index
    %14 = vector.load %arg2[%13, %c0_9] : memref<50x128xf32, #tpu.memory_space<vmem>>, vector<1x128xf32>
    %c3_10 = arith.constant 3 : index
    %c0_11 = arith.constant 0 : index
    %15 = vector.load %arg12[%c3_10, %c0_11] : memref<32x128xf32, #tpu.memory_space<vmem>>, vector<1x128xf32>
    tpu.vector_store %arg12[%c3_10, %c0_11], %14 {strides = array<i32>} : memref<32x128xf32, #tpu.memory_space<vmem>>, vector<1x128xf32>,
    %c4 = arith.constant 4 : index
    %16 = memref.load %arg1[%c4] : memref<32xi32, #tpu.memory_space<smem>>
    %17 = arith.index_cast %16 : i32 to index
    %c0_12 = arith.constant 0 : index
    %18 = vector.load %arg2[%17, %c0_12] : memref<50x128xf32, #tpu.memory_space<vmem>>, vector<1x128xf32>
    %c4_13 = arith.constant 4 : index
    %c0_14 = arith.constant 0 : index
    %19 = vector.load %arg12[%c4_13, %c0_14] : memref<32x128xf32, #tpu.memory_space<vmem>>, vector<1x128xf32>
    tpu.vector_store %arg12[%c4_13, %c0_14], %18 {strides = array<i32>} : memref<32x128xf32, #tpu.memory_space<vmem>>, vector<1x128xf32>,
    %c5 = arith.constant 5 : index
    %20 = memref.load %arg1[%c5] : memref<32xi32, #tpu.memory_space<smem>>
    %21 = arith.index_cast %20 : i32 to index
    %c0_15 = arith.constant 0 : index
    %22 = vector.load %arg2[%21, %c0_15] : memref<50x128xf32, #tpu.memory_space<vmem>>, vector<1x128xf32>
    %c5_16 = arith.constant 5 : index
    %c0_17 = arith.constant 0 : index
    %23 = vector.load %arg12[%c5_16, %c0_17] : memref<32x128xf32, #tpu.memory_space<vmem>>, vector<1x128xf32>
    tpu.vector_store %arg12[%c5_16, %c0_17], %22 {strides = array<i32>} : memref<32x128xf32, #tpu.memory_space<vmem>>, vector<1x128xf32>,
    %c6 = arith.constant 6 : index
    %24 = memref.load %arg1[%c6] : memref<32xi32, #tpu.memory_space<smem>>
    %25 = arith.index_cast %24 : i32 to index
    %c0_18 = arith.constant 0 : index
    %26 = vector.load %arg2[%25, %c0_18] : memref<50x128xf32, #tpu.memory_space<vmem>>, vector<1x128xf32>
    %c6_19 = arith.constant 6 : index
    %c0_20 = arith.constant 0 : index
    %27 = vector.load %arg12[%c6_19, %c0_20] : memref<32x128xf32, #tpu.memory_space<vmem>>, vector<1x128xf32>
    tpu.vector_store %arg12[%c6_19, %c0_20], %26 {strides = array<i32>} : memref<32x128xf32, #tpu.memory_space<vmem>>, vector<1x128xf32>,
    %c7 = arith.constant 7 : index
    %28 = memref.load %arg1[%c7] : memref<32xi32, #tpu.memory_space<smem>>
    %29 = arith.index_cast %28 : i32 to index
    %c0_21 = arith.constant 0 : index
    %30 = vector.load %arg2[%29, %c0_21] : memref<50x128xf32, #tpu.memory_space<vmem>>, vector<1x128xf32>
    %c7_22 = arith.constant 7 : index
    %c0_23 = arith.constant 0 : index
    %31 = vector.load %arg12[%c7_22, %c0_23] : memref<32x128xf32, #tpu.memory_space<vmem>>, vector<1x128xf32>
    tpu.vector_store %arg12[%c7_22, %c0_23], %30 {strides = array<i32>} : memref<32x128xf32, #tpu.memory_space<vmem>>, vector<1x128xf32>,
    %c8 = arith.constant 8 : index
    %32 = memref.load %arg1[%c8] : memref<32xi32, #tpu.memory_space<smem>>
    %33 = arith.index_cast %32 : i32 to index
    %c0_24 = arith.constant 0 : index
    %34 = vector.load %arg2[%33, %c0_24] : memref<50x128xf32, #tpu.memory_space<vmem>>, vector<1x128xf32>
    %c8_25 = arith.constant 8 : index
    %c0_26 = arith.constant 0 : index
    %35 = vector.load %arg12[%c8_25, %c0_26] : memref<32x128xf32, #tpu.memory_space<vmem>>, vector<1x128xf32>
    tpu.vector_store %arg12[%c8_25, %c0_26], %34 {strides = array<i32>} : memref<32x128xf32, #tpu.memory_space<vmem>>, vector<1x128xf32>,
    %c9 = arith.constant 9 : index
    %36 = memref.load %arg1[%c9] : memref<32xi32, #tpu.memory_space<smem>>
    %37 = arith.index_cast %36 : i32 to index
    %c0_27 = arith.constant 0 : index
    %38 = vector.load %arg2[%37, %c0_27] : memref<50x128xf32, #tpu.memory_space<vmem>>, vector<1x128xf32>
    %c9_28 = arith.constant 9 : index
    %c0_29 = arith.constant 0 : index
    %39 = vector.load %arg12[%c9_28, %c0_29] : memref<32x128xf32, #tpu.memory_space<vmem>>, vector<1x128xf32>
    tpu.vector_store %arg12[%c9_28, %c0_29], %38 {strides = array<i32>} : memref<32x128xf32, #tpu.memory_space<vmem>>, vector<1x128xf32>,
    %c10 = arith.constant 10 : index
    %40 = memref.load %arg1[%c10] : memref<32xi32, #tpu.memory_space<smem>>
    %41 = arith.index_cast %40 : i32 to index
    %c0_30 = arith.constant 0 : index
    %42 = vector.load %arg2[%41, %c0_30] : memref<50x128xf32, #tpu.memory_space<vmem>>, vector<1x128xf32>
    %c10_31 = arith.constant 10 : index
    %c0_32 = arith.constant 0 : index
    %43 = vector.load %arg12[%c10_31, %c0_32] : memref<32x128xf32, #tpu.memory_space<vmem>>, vector<1x128xf32>
    tpu.vector_store %arg12[%c10_31, %c0_32], %42 {strides = array<i32>} : memref<32x128xf32, #tpu.memory_space<vmem>>, vector<1x128xf32>,
    %c11 = arith.constant 11 : index
    %44 = memref.load %arg1[%c11] : memref<32xi32, #tpu.memory_space<smem>>
    %45 = arith.index_cast %44 : i32 to index
    %c0_33 = arith.constant 0 : index
    %46 = vector.load %arg2[%45, %c0_33] : memref<50x128xf32, #tpu.memory_space<vmem>>, vector<1x128xf32>
    %c11_34 = arith.constant 11 : index
    %c0_35 = arith.constant 0 : index
    %47 = vector.load %arg12[%c11_34, %c0_35] : memref<32x128xf32, #tpu.memory_space<vmem>>, vector<1x128xf32>
    tpu.vector_store %arg12[%c11_34, %c0_35], %46 {strides = array<i32>} : memref<32x128xf32, #tpu.memory_space<vmem>>, vector<1x128xf32>,
    %c12 = arith.constant 12 : index
    %48 = memref.load %arg1[%c12] : memref<32xi32, #tpu.memory_space<smem>>
    %49 = arith.index_cast %48 : i32 to index
    %c0_36 = arith.constant 0 : index
    %50 = vector.load %arg2[%49, %c0_36] : memref<50x128xf32, #tpu.memory_space<vmem>>, vector<1x128xf32>
    %c12_37 = arith.constant 12 : index
    %c0_38 = arith.constant 0 : index
    %51 = vector.load %arg12[%c12_37, %c0_38] : memref<32x128xf32, #tpu.memory_space<vmem>>, vector<1x128xf32>
    tpu.vector_store %arg12[%c12_37, %c0_38], %50 {strides = array<i32>} : memref<32x128xf32, #tpu.memory_space<vmem>>, vector<1x128xf32>,
    %c13 = arith.constant 13 : index
    %52 = memref.load %arg1[%c13] : memref<32xi32, #tpu.memory_space<smem>>
    %53 = arith.index_cast %52 : i32 to index
    %c0_39 = arith.constant 0 : index
    %54 = vector.load %arg2[%53, %c0_39] : memref<50x128xf32, #tpu.memory_space<vmem>>, vector<1x128xf32>
    %c13_40 = arith.constant 13 : index
    %c0_41 = arith.constant 0 : index
    %55 = vector.load %arg12[%c13_40, %c0_41] : memref<32x128xf32, #tpu.memory_space<vmem>>, vector<1x128xf32>
    tpu.vector_store %arg12[%c13_40, %c0_41], %54 {strides = array<i32>} : memref<32x128xf32, #tpu.memory_space<vmem>>, vector<1x128xf32>,
    %c14 = arith.constant 14 : index
    %56 = memref.load %arg1[%c14] : memref<32xi32, #tpu.memory_space<smem>>
    %57 = arith.index_cast %56 : i32 to index
    %c0_42 = arith.constant 0 : index
    %58 = vector.load %arg2[%57, %c0_42] : memref<50x128xf32, #tpu.memory_space<vmem>>, vector<1x128xf32>
    %c14_43 = arith.constant 14 : index
    %c0_44 = arith.constant 0 : index
    %59 = vector.load %arg12[%c14_43, %c0_44] : memref<32x128xf32, #tpu.memory_space<vmem>>, vector<1x128xf32>
    tpu.vector_store %arg12[%c14_43, %c0_44], %58 {strides = array<i32>} : memref<32x128xf32, #tpu.memory_space<vmem>>, vector<1x128xf32>,
    %c15 = arith.constant 15 : index
    %60 = memref.load %arg1[%c15] : memref<32xi32, #tpu.memory_space<smem>>
    %61 = arith.index_cast %60 : i32 to index
    %c0_45 = arith.constant 0 : index
    %62 = vector.load %arg2[%61, %c0_45] : memref<50x128xf32, #tpu.memory_space<vmem>>, vector<1x128xf32>
    %c15_46 = arith.constant 15 : index
    %c0_47 = arith.constant 0 : index
    %63 = vector.load %arg12[%c15_46, %c0_47] : memref<32x128xf32, #tpu.memory_space<vmem>>, vector<1x128xf32>
    tpu.vector_store %arg12[%c15_46, %c0_47], %62 {strides = array<i32>} : memref<32x128xf32, #tpu.memory_space<vmem>>, vector<1x128xf32>,
    %c16 = arith.constant 16 : index
    %64 = memref.load %arg1[%c16] : memref<32xi32, #tpu.memory_space<smem>>
    %65 = arith.index_cast %64 : i32 to index
    %c0_48 = arith.constant 0 : index
    %66 = vector.load %arg2[%65, %c0_48] : memref<50x128xf32, #tpu.memory_space<vmem>>, vector<1x128xf32>
    %c16_49 = arith.constant 16 : index
    %c0_50 = arith.constant 0 : index
    %67 = vector.load %arg12[%c16_49, %c0_50] : memref<32x128xf32, #tpu.memory_space<vmem>>, vector<1x128xf32>
    tpu.vector_store %arg12[%c16_49, %c0_50], %66 {strides = array<i32>} : memref<32x128xf32, #tpu.memory_space<vmem>>, vector<1x128xf32>,
    %c17 = arith.constant 17 : index
    %68 = memref.load %arg1[%c17] : memref<32xi32, #tpu.memory_space<smem>>
    %69 = arith.index_cast %68 : i32 to index
    %c0_51 = arith.constant 0 : index
    %70 = vector.load %arg2[%69, %c0_51] : memref<50x128xf32, #tpu.memory_space<vmem>>, vector<1x128xf32>
    %c17_52 = arith.constant 17 : index
    %c0_53 = arith.constant 0 : index
    %71 = vector.load %arg12[%c17_52, %c0_53] : memref<32x128xf32, #tpu.memory_space<vmem>>, vector<1x128xf32>
    tpu.vector_store %arg12[%c17_52, %c0_53], %70 {strides = array<i32>} : memref<32x128xf32, #tpu.memory_space<vmem>>, vector<1x128xf32>,
    %c18 = arith.constant 18 : index
    %72 = memref.load %arg1[%c18] : memref<32xi32, #tpu.memory_space<smem>>
    %73 = arith.index_cast %72 : i32 to index
    %c0_54 = arith.constant 0 : index
    %74 = vector.load %arg2[%73, %c0_54] : memref<50x128xf32, #tpu.memory_space<vmem>>, vector<1x128xf32>
    %c18_55 = arith.constant 18 : index
    %c0_56 = arith.constant 0 : index
    %75 = vector.load %arg12[%c18_55, %c0_56] : memref<32x128xf32, #tpu.memory_space<vmem>>, vector<1x128xf32>
    tpu.vector_store %arg12[%c18_55, %c0_56], %74 {strides = array<i32>} : memref<32x128xf32, #tpu.memory_space<vmem>>, vector<1x128xf32>,
    %c19 = arith.constant 19 : index
    %76 = memref.load %arg1[%c19] : memref<32xi32, #tpu.memory_space<smem>>
    %77 = arith.index_cast %76 : i32 to index
    %c0_57 = arith.constant 0 : index
    %78 = vector.load %arg2[%77, %c0_57] : memref<50x128xf32, #tpu.memory_space<vmem>>, vector<1x128xf32>
    %c19_58 = arith.constant 19 : index
    %c0_59 = arith.constant 0 : index
    %79 = vector.load %arg12[%c19_58, %c0_59] : memref<32x128xf32, #tpu.memory_space<vmem>>, vector<1x128xf32>
    tpu.vector_store %arg12[%c19_58, %c0_59], %78 {strides = array<i32>} : memref<32x128xf32, #tpu.memory_space<vmem>>, vector<1x128xf32>,
    %c20 = arith.constant 20 : index
    %80 = memref.load %arg1[%c20] : memref<32xi32, #tpu.memory_space<smem>>
    %81 = arith.index_cast %80 : i32 to index
    %c0_60 = arith.constant 0 : index
    %82 = vector.load %arg2[%81, %c0_60] : memref<50x128xf32, #tpu.memory_space<vmem>>, vector<1x128xf32>
    %c20_61 = arith.constant 20 : index
    %c0_62 = arith.constant 0 : index
    %83 = vector.load %arg12[%c20_61, %c0_62] : memref<32x128xf32, #tpu.memory_space<vmem>>, vector<1x128xf32>
    tpu.vector_store %arg12[%c20_61, %c0_62], %82 {strides = array<i32>} : memref<32x128xf32, #tpu.memory_space<vmem>>, vector<1x128xf32>,
    %c21 = arith.constant 21 : index
    %84 = memref.load %arg1[%c21] : memref<32xi32, #tpu.memory_space<smem>>
    %85 = arith.index_cast %84 : i32 to index
    %c0_63 = arith.constant 0 : index
    %86 = vector.load %arg2[%85, %c0_63] : memref<50x128xf32, #tpu.memory_space<vmem>>, vector<1x128xf32>
    %c21_64 = arith.constant 21 : index
    %c0_65 = arith.constant 0 : index
    %87 = vector.load %arg12[%c21_64, %c0_65] : memref<32x128xf32, #tpu.memory_space<vmem>>, vector<1x128xf32>
    tpu.vector_store %arg12[%c21_64, %c0_65], %86 {strides = array<i32>} : memref<32x128xf32, #tpu.memory_space<vmem>>, vector<1x128xf32>,
    %c22 = arith.constant 22 : index
    %88 = memref.load %arg1[%c22] : memref<32xi32, #tpu.memory_space<smem>>
    %89 = arith.index_cast %88 : i32 to index
    %c0_66 = arith.constant 0 : index
    %90 = vector.load %arg2[%89, %c0_66] : memref<50x128xf32, #tpu.memory_space<vmem>>, vector<1x128xf32>
    %c22_67 = arith.constant 22 : index
    %c0_68 = arith.constant 0 : index
    %91 = vector.load %arg12[%c22_67, %c0_68] : memref<32x128xf32, #tpu.memory_space<vmem>>, vector<1x128xf32>
    tpu.vector_store %arg12[%c22_67, %c0_68], %90 {strides = array<i32>} : memref<32x128xf32, #tpu.memory_space<vmem>>, vector<1x128xf32>,
    %c23 = arith.constant 23 : index
    %92 = memref.load %arg1[%c23] : memref<32xi32, #tpu.memory_space<smem>>
    %93 = arith.index_cast %92 : i32 to index
    %c0_69 = arith.constant 0 : index
    %94 = vector.load %arg2[%93, %c0_69] : memref<50x128xf32, #tpu.memory_space<vmem>>, vector<1x128xf32>
    %c23_70 = arith.constant 23 : index
    %c0_71 = arith.constant 0 : index
    %95 = vector.load %arg12[%c23_70, %c0_71] : memref<32x128xf32, #tpu.memory_space<vmem>>, vector<1x128xf32>
    tpu.vector_store %arg12[%c23_70, %c0_71], %94 {strides = array<i32>} : memref<32x128xf32, #tpu.memory_space<vmem>>, vector<1x128xf32>,
    %c24 = arith.constant 24 : index
    %96 = memref.load %arg1[%c24] : memref<32xi32, #tpu.memory_space<smem>>
    %97 = arith.index_cast %96 : i32 to index
    %c0_72 = arith.constant 0 : index
    %98 = vector.load %arg2[%97, %c0_72] : memref<50x128xf32, #tpu.memory_space<vmem>>, vector<1x128xf32>
    %c24_73 = arith.constant 24 : index
    %c0_74 = arith.constant 0 : index
    %99 = vector.load %arg12[%c24_73, %c0_74] : memref<32x128xf32, #tpu.memory_space<vmem>>, vector<1x128xf32>
    tpu.vector_store %arg12[%c24_73, %c0_74], %98 {strides = array<i32>} : memref<32x128xf32, #tpu.memory_space<vmem>>, vector<1x128xf32>,
    %c25 = arith.constant 25 : index
    %100 = memref.load %arg1[%c25] : memref<32xi32, #tpu.memory_space<smem>>
    %101 = arith.index_cast %100 : i32 to index
    %c0_75 = arith.constant 0 : index
    %102 = vector.load %arg2[%101, %c0_75] : memref<50x128xf32, #tpu.memory_space<vmem>>, vector<1x128xf32>
    %c25_76 = arith.constant 25 : index
    %c0_77 = arith.constant 0 : index
    %103 = vector.load %arg12[%c25_76, %c0_77] : memref<32x128xf32, #tpu.memory_space<vmem>>, vector<1x128xf32>
    tpu.vector_store %arg12[%c25_76, %c0_77], %102 {strides = array<i32>} : memref<32x128xf32, #tpu.memory_space<vmem>>, vector<1x128xf32>,
    %c26 = arith.constant 26 : index
    %104 = memref.load %arg1[%c26] : memref<32xi32, #tpu.memory_space<smem>>
    %105 = arith.index_cast %104 : i32 to index
    %c0_78 = arith.constant 0 : index
    %106 = vector.load %arg2[%105, %c0_78] : memref<50x128xf32, #tpu.memory_space<vmem>>, vector<1x128xf32>
    %c26_79 = arith.constant 26 : index
    %c0_80 = arith.constant 0 : index
    %107 = vector.load %arg12[%c26_79, %c0_80] : memref<32x128xf32, #tpu.memory_space<vmem>>, vector<1x128xf32>
    tpu.vector_store %arg12[%c26_79, %c0_80], %106 {strides = array<i32>} : memref<32x128xf32, #tpu.memory_space<vmem>>, vector<1x128xf32>,
    %c27 = arith.constant 27 : index
    %108 = memref.load %arg1[%c27] : memref<32xi32, #tpu.memory_space<smem>>
    %109 = arith.index_cast %108 : i32 to index
    %c0_81 = arith.constant 0 : index
    %110 = vector.load %arg2[%109, %c0_81] : memref<50x128xf32, #tpu.memory_space<vmem>>, vector<1x128xf32>
    %c27_82 = arith.constant 27 : index
    %c0_83 = arith.constant 0 : index
    %111 = vector.load %arg12[%c27_82, %c0_83] : memref<32x128xf32, #tpu.memory_space<vmem>>, vector<1x128xf32>
    tpu.vector_store %arg12[%c27_82, %c0_83], %110 {strides = array<i32>} : memref<32x128xf32, #tpu.memory_space<vmem>>, vector<1x128xf32>,
    %c28 = arith.constant 28 : index
    %112 = memref.load %arg1[%c28] : memref<32xi32, #tpu.memory_space<smem>>
    %113 = arith.index_cast %112 : i32 to index
    %c0_84 = arith.constant 0 : index
    %114 = vector.load %arg2[%113, %c0_84] : memref<50x128xf32, #tpu.memory_space<vmem>>, vector<1x128xf32>
    %c28_85 = arith.constant 28 : index
    %c0_86 = arith.constant 0 : index
    %115 = vector.load %arg12[%c28_85, %c0_86] : memref<32x128xf32, #tpu.memory_space<vmem>>, vector<1x128xf32>
    tpu.vector_store %arg12[%c28_85, %c0_86], %114 {strides = array<i32>} : memref<32x128xf32, #tpu.memory_space<vmem>>, vector<1x128xf32>,
    %c29 = arith.constant 29 : index
    %116 = memref.load %arg1[%c29] : memref<32xi32, #tpu.memory_space<smem>>
    %117 = arith.index_cast %116 : i32 to index
    %c0_87 = arith.constant 0 : index
    %118 = vector.load %arg2[%117, %c0_87] : memref<50x128xf32, #tpu.memory_space<vmem>>, vector<1x128xf32>
    %c29_88 = arith.constant 29 : index
    %c0_89 = arith.constant 0 : index
    %119 = vector.load %arg12[%c29_88, %c0_89] : memref<32x128xf32, #tpu.memory_space<vmem>>, vector<1x128xf32>
    tpu.vector_store %arg12[%c29_88, %c0_89], %118 {strides = array<i32>} : memref<32x128xf32, #tpu.memory_space<vmem>>, vector<1x128xf32>,
    %c30 = arith.constant 30 : index
    %120 = memref.load %arg1[%c30] : memref<32xi32, #tpu.memory_space<smem>>
    %121 = arith.index_cast %120 : i32 to index
    %c0_90 = arith.constant 0 : index
    %122 = vector.load %arg2[%121, %c0_90] : memref<50x128xf32, #tpu.memory_space<vmem>>, vector<1x128xf32>
    %c30_91 = arith.constant 30 : index
    %c0_92 = arith.constant 0 : index
    %123 = vector.load %arg12[%c30_91, %c0_92] : memref<32x128xf32, #tpu.memory_space<vmem>>, vector<1x128xf32>
    tpu.vector_store %arg12[%c30_91, %c0_92], %122 {strides = array<i32>} : memref<32x128xf32, #tpu.memory_space<vmem>>, vector<1x128xf32>,
    %c31 = arith.constant 31 : index
    %124 = memref.load %arg1[%c31] : memref<32xi32, #tpu.memory_space<smem>>
    %125 = arith.index_cast %124 : i32 to index
    %c0_93 = arith.constant 0 : index
    %126 = vector.load %arg2[%125, %c0_93] : memref<50x128xf32, #tpu.memory_space<vmem>>, vector<1x128xf32>
    %c31_94 = arith.constant 31 : index
    %c0_95 = arith.constant 0 : index
    %127 = vector.load %arg12[%c31_94, %c0_95] : memref<32x128xf32, #tpu.memory_space<vmem>>, vector<1x128xf32>
    tpu.vector_store %arg12[%c31_94, %c0_95], %126 {strides = array<i32>} : memref<32x128xf32, #tpu.memory_space<vmem>>, vector<1x128xf32>,
    %128 = tpu.iota {dimensions = array<i32: 0>} : vector<8x64xi32>
    %129 = tpu.iota {dimensions = array<i32: 1>} : vector<8x64xi32>
    %c4_i32 = arith.constant 4 : i32
    %130 = vector.broadcast %c4_i32 : i32 to vector<8x64xi32>
    %131 = arith.cmpi slt, %128, %130 : vector<8x64xi32>
    %c32_i32 = arith.constant 32 : i32
    %132 = vector.broadcast %c32_i32 : i32 to vector<8x64xi32>
    %133 = arith.cmpi slt, %129, %132 : vector<8x64xi32>
    %134 = arith.andi %131, %133 : vector<8x64xi1>
    %c4_i32_96 = arith.constant 4 : i32
    %135 = vector.broadcast %c4_i32_96 : i32 to vector<8x64xi32>
    %136 = arith.cmpi sge, %128, %135 : vector<8x64xi32>
    %c32_i32_97 = arith.constant 32 : i32
    %137 = vector.broadcast %c32_i32_97 : i32 to vector<8x64xi32>
    %138 = arith.cmpi sge, %129, %137 : vector<8x64xi32>
    %139 = arith.andi %136, %138 : vector<8x64xi1>
    %140 = arith.ori %134, %139 : vector<8x64xi1>
    %c0_98 = arith.constant 0 : index
    %c0_99 = arith.constant 0 : index
    %141 = vector.load %arg12[%c0_98, %c0_99] : memref<32x128xf32, #tpu.memory_space<vmem>>, vector<32x128xf32>
    %142 = arith.truncf %141 : vector<32x128xf32> to vector<32x128xbf16>
    %c0_100 = arith.constant 0 : index
    %c0_101 = arith.constant 0 : index
    %143 = vector.load %arg3[%c0_100, %c0_101] : memref<128x256xbf16, #tpu.memory_space<vmem>>, vector<128x256xbf16>
    %cst = arith.constant dense<0.000000e+00> : vector<32x256xf32>
    %144 = tpu.matmul %142, %143, %cst {dimension_numbers = #tpu.dot_dimension_numbers<[1], [0], [0], [1], [0, 0, 1, 1], [], []>} : vector<32x128xbf16>, vector<128x256xbf16>, vector<32x256xf32> -> vector<32x256xf32>
    %c0_102 = arith.constant 0 : index
    %c0_103 = arith.constant 0 : index
    %145 = vector.load %arg5[%c0_102, %c0_103] : memref<1x256xf32, #tpu.memory_space<vmem>>, vector<1x256xf32>
    %146 = vector.broadcast %145 : vector<1x256xf32> to vector<32x256xf32>
    %147 = arith.addf %144, %146 : vector<32x256xf32>
    %c0_104 = arith.constant 0 : index
    %c0_105 = arith.constant 0 : index
    %148 = vector.load %arg13[%c0_104, %c0_105] : memref<32x256xf32, #tpu.memory_space<vmem>>, vector<32x256xf32>
    tpu.vector_store %arg13[%c0_104, %c0_105], %147 {strides = array<i32>} : memref<32x256xf32, #tpu.memory_space<vmem>>, vector<32x256xf32>,
    %c0_106 = arith.constant 0 : index
    %c0_107 = arith.constant 0 : index
    %149 = vector.load %arg4[%c0_106, %c0_107] : memref<64x128xbf16, #tpu.memory_space<vmem>>, vector<64x128xbf16>
    %cst_108 = arith.constant 0.000000e+00 : f32
    %150 = vector.broadcast %cst_108 : f32 to vector<8x32xf32>
    %c0_109 = arith.constant 0 : index
    %c0_110 = arith.constant 0 : index
    %151 = vector.load %arg13[%c0_109, %c0_110] : memref<32x256xf32, #tpu.memory_space<vmem>>, vector<4x128xf32>
    %c28_111 = arith.constant 28 : index
    %c128 = arith.constant 128 : index
    %152 = vector.load %arg13[%c28_111, %c128] : memref<32x256xf32, #tpu.memory_space<vmem>>, vector<4x128xf32>
    %153 = tpu.concatenate %151, %152 in 0 : vector<4x128xf32>, vector<4x128xf32> -> vector<8x128xf32>
    %154 = vector.extract_strided_slice %153 {offsets = [0, 0], sizes = [8, 96], strides = [1, 1]} : vector<8x128xf32> to vector<8x96xf32>
    %155 = arith.negf %154 : vector<8x96xf32>
    %156 = math.exp %155 : vector<8x96xf32>
    %cst_112 = arith.constant 1.000000e+00 : f32
    %157 = vector.broadcast %cst_112 : f32 to vector<8x96xf32>
    %158 = arith.addf %157, %156 : vector<8x96xf32>
    %159 = arith.divf %157, %158 : vector<8x96xf32>
    %160 = vector.extract_strided_slice %153 {offsets = [0, 96], sizes = [8, 32], strides = [1, 1]} : vector<8x128xf32> to vector<8x32xf32>
    %161 = math.tanh %160 : vector<8x32xf32>
    %162 = vector.extract_strided_slice %159 {offsets = [0, 0], sizes = [8, 32], strides = [1, 1]} : vector<8x96xf32> to vector<8x32xf32>
    %163 = vector.extract_strided_slice %159 {offsets = [0, 32], sizes = [8, 32], strides = [1, 1]} : vector<8x96xf32> to vector<8x32xf32>
    %164 = vector.extract_strided_slice %159 {offsets = [0, 64], sizes = [8, 32], strides = [1, 1]} : vector<8x96xf32> to vector<8x32xf32>
    %165 = arith.mulf %163, %150 : vector<8x32xf32>
    %166 = arith.mulf %162, %161 : vector<8x32xf32>
    %167 = arith.addf %165, %166 : vector<8x32xf32>
    %168 = math.tanh %167 : vector<8x32xf32>
    %169 = arith.mulf %164, %168 : vector<8x32xf32>
    %170 = vector.extract_strided_slice %169 {offsets = [0, 0], sizes = [4, 32], strides = [1, 1]} : vector<8x32xf32> to vector<4x32xf32>
    %c0_113 = arith.constant 0 : index
    %c0_114 = arith.constant 0 : index
    %171 = vector.load %arg12[%c0_113, %c0_114] : memref<32x128xf32, #tpu.memory_space<vmem>>, vector<4x32xf32>
    tpu.vector_store %arg12[%c0_113, %c0_114], %170 {strides = array<i32>} : memref<32x128xf32, #tpu.memory_space<vmem>>, vector<4x32xf32>,
    %172 = vector.extract_strided_slice %169 {offsets = [4, 0], sizes = [4, 32], strides = [1, 1]} : vector<8x32xf32> to vector<4x32xf32>
    %c28_115 = arith.constant 28 : index
    %c32 = arith.constant 32 : index
    %173 = vector.load %arg12[%c28_115, %c32] : memref<32x128xf32, #tpu.memory_space<vmem>>, vector<4x32xf32>
    tpu.vector_store %arg12[%c28_115, %c32], %172 {strides = array<i32>} : memref<32x128xf32, #tpu.memory_space<vmem>>, vector<4x32xf32>,
    %c4_116 = arith.constant 4 : index
    %c0_117 = arith.constant 0 : index
    %174 = vector.load %arg13[%c4_116, %c0_117] : memref<32x256xf32, #tpu.memory_space<vmem>>, vector<4x128xf32>
    %c24_118 = arith.constant 24 : index
    %c128_119 = arith.constant 128 : index
    %175 = vector.load %arg13[%c24_118, %c128_119] : memref<32x256xf32, #tpu.memory_space<vmem>>, vector<4x128xf32>
    %176 = tpu.concatenate %174, %175 in 0 : vector<4x128xf32>, vector<4x128xf32> -> vector<8x128xf32>
    %177 = tpu.concatenate %169, %169 in 1 : vector<8x32xf32>, vector<8x32xf32> -> vector<8x64xf32>
    %cst_120 = arith.constant 0.000000e+00 : f32
    %178 = vector.broadcast %cst_120 : f32 to vector<8x64xf32>
    %179 = arith.select %140, %177, %178 : vector<8x64xi1>, vector<8x64xf32>
    %180 = arith.truncf %179 : vector<8x64xf32> to vector<8x64xbf16>
    %cst_121 = arith.constant dense<0.000000e+00> : vector<8x128xf32>
    %181 = tpu.matmul %180, %149, %cst_121 {dimension_numbers = #tpu.dot_dimension_numbers<[1], [0], [0], [1], [0, 0, 1, 1], [], []>} : vector<8x64xbf16>, vector<64x128xbf16>, vector<8x128xf32> -> vector<8x128xf32>
    %182 = arith.addf %176, %181 : vector<8x128xf32>
    %183 = vector.extract_strided_slice %182 {offsets = [0, 0], sizes = [8, 96], strides = [1, 1]} : vector<8x128xf32> to vector<8x96xf32>
    %184 = arith.negf %183 : vector<8x96xf32>
    %185 = math.exp %184 : vector<8x96xf32>
    %cst_122 = arith.constant 1.000000e+00 : f32
    %186 = vector.broadcast %cst_122 : f32 to vector<8x96xf32>
    %187 = arith.addf %186, %185 : vector<8x96xf32>
    %188 = arith.divf %186, %187 : vector<8x96xf32>
    %189 = vector.extract_strided_slice %182 {offsets = [0, 96], sizes = [8, 32], strides = [1, 1]} : vector<8x128xf32> to vector<8x32xf32>
    %190 = math.tanh %189 : vector<8x32xf32>
    %191 = vector.extract_strided_slice %188 {offsets = [0, 0], sizes = [8, 32], strides = [1, 1]} : vector<8x96xf32> to vector<8x32xf32>
    %192 = vector.extract_strided_slice %188 {offsets = [0, 32], sizes = [8, 32], strides = [1, 1]} : vector<8x96xf32> to vector<8x32xf32>
    %193 = vector.extract_strided_slice %188 {offsets = [0, 64], sizes = [8, 32], strides = [1, 1]} : vector<8x96xf32> to vector<8x32xf32>
    %194 = arith.mulf %192, %167 : vector<8x32xf32>
    %195 = arith.mulf %191, %190 : vector<8x32xf32>
    %196 = arith.addf %194, %195 : vector<8x32xf32>
    %197 = math.tanh %196 : vector<8x32xf32>
    %198 = arith.mulf %193, %197 : vector<8x32xf32>
    %199 = vector.extract_strided_slice %198 {offsets = [0, 0], sizes = [4, 32], strides = [1, 1]} : vector<8x32xf32> to vector<4x32xf32>
    %c4_123 = arith.constant 4 : index
    %c0_124 = arith.constant 0 : index
    %200 = vector.load %arg12[%c4_123, %c0_124] : memref<32x128xf32, #tpu.memory_space<vmem>>, vector<4x32xf32>
    tpu.vector_store %arg12[%c4_123, %c0_124], %199 {strides = array<i32>} : memref<32x128xf32, #tpu.memory_space<vmem>>, vector<4x32xf32>,
    %201 = vector.extract_strided_slice %198 {offsets = [4, 0], sizes = [4, 32], strides = [1, 1]} : vector<8x32xf32> to vector<4x32xf32>
    %c24_125 = arith.constant 24 : index
    %c32_126 = arith.constant 32 : index
    %202 = vector.load %arg12[%c24_125, %c32_126] : memref<32x128xf32, #tpu.memory_space<vmem>>, vector<4x32xf32>
    tpu.vector_store %arg12[%c24_125, %c32_126], %201 {strides = array<i32>} : memref<32x128xf32, #tpu.memory_space<vmem>>, vector<4x32xf32>,
    %c8_127 = arith.constant 8 : index
    %c0_128 = arith.constant 0 : index
    %203 = vector.load %arg13[%c8_127, %c0_128] : memref<32x256xf32, #tpu.memory_space<vmem>>, vector<4x128xf32>
    %c20_129 = arith.constant 20 : index
    %c128_130 = arith.constant 128 : index
    %204 = vector.load %arg13[%c20_129, %c128_130] : memref<32x256xf32, #tpu.memory_space<vmem>>, vector<4x128xf32>
    %205 = tpu.concatenate %203, %204 in 0 : vector<4x128xf32>, vector<4x128xf32> -> vector<8x128xf32>
    %206 = tpu.concatenate %198, %198 in 1 : vector<8x32xf32>, vector<8x32xf32> -> vector<8x64xf32>
    %cst_131 = arith.constant 0.000000e+00 : f32
    %207 = vector.broadcast %cst_131 : f32 to vector<8x64xf32>
    %208 = arith.select %140, %206, %207 : vector<8x64xi1>, vector<8x64xf32>
    %209 = arith.truncf %208 : vector<8x64xf32> to vector<8x64xbf16>
    %cst_132 = arith.constant dense<0.000000e+00> : vector<8x128xf32>
    %210 = tpu.matmul %209, %149, %cst_132 {dimension_numbers = #tpu.dot_dimension_numbers<[1], [0], [0], [1], [0, 0, 1, 1], [], []>} : vector<8x64xbf16>, vector<64x128xbf16>, vector<8x128xf32> -> vector<8x128xf32>
    %211 = arith.addf %205, %210 : vector<8x128xf32>
    %212 = vector.extract_strided_slice %211 {offsets = [0, 0], sizes = [8, 96], strides = [1, 1]} : vector<8x128xf32> to vector<8x96xf32>
    %213 = arith.negf %212 : vector<8x96xf32>
    %214 = math.exp %213 : vector<8x96xf32>
    %cst_133 = arith.constant 1.000000e+00 : f32
    %215 = vector.broadcast %cst_133 : f32 to vector<8x96xf32>
    %216 = arith.addf %215, %214 : vector<8x96xf32>
    %217 = arith.divf %215, %216 : vector<8x96xf32>
    %218 = vector.extract_strided_slice %211 {offsets = [0, 96], sizes = [8, 32], strides = [1, 1]} : vector<8x128xf32> to vector<8x32xf32>
    %219 = math.tanh %218 : vector<8x32xf32>
    %220 = vector.extract_strided_slice %217 {offsets = [0, 0], sizes = [8, 32], strides = [1, 1]} : vector<8x96xf32> to vector<8x32xf32>
    %221 = vector.extract_strided_slice %217 {offsets = [0, 32], sizes = [8, 32], strides = [1, 1]} : vector<8x96xf32> to vector<8x32xf32>
    %222 = vector.extract_strided_slice %217 {offsets = [0, 64], sizes = [8, 32], strides = [1, 1]} : vector<8x96xf32> to vector<8x32xf32>
    %223 = arith.mulf %221, %196 : vector<8x32xf32>
    %224 = arith.mulf %220, %219 : vector<8x32xf32>
    %225 = arith.addf %223, %224 : vector<8x32xf32>
    %226 = math.tanh %225 : vector<8x32xf32>
    %227 = arith.mulf %222, %226 : vector<8x32xf32>
    %228 = vector.extract_strided_slice %227 {offsets = [0, 0], sizes = [4, 32], strides = [1, 1]} : vector<8x32xf32> to vector<4x32xf32>
    %c8_134 = arith.constant 8 : index
    %c0_135 = arith.constant 0 : index
    %229 = vector.load %arg12[%c8_134, %c0_135] : memref<32x128xf32, #tpu.memory_space<vmem>>, vector<4x32xf32>
    tpu.vector_store %arg12[%c8_134, %c0_135], %228 {strides = array<i32>} : memref<32x128xf32, #tpu.memory_space<vmem>>, vector<4x32xf32>,
    %230 = vector.extract_strided_slice %227 {offsets = [4, 0], sizes = [4, 32], strides = [1, 1]} : vector<8x32xf32> to vector<4x32xf32>
    %c20_136 = arith.constant 20 : index
    %c32_137 = arith.constant 32 : index
    %231 = vector.load %arg12[%c20_136, %c32_137] : memref<32x128xf32, #tpu.memory_space<vmem>>, vector<4x32xf32>
    tpu.vector_store %arg12[%c20_136, %c32_137], %230 {strides = array<i32>} : memref<32x128xf32, #tpu.memory_space<vmem>>, vector<4x32xf32>,
    %c12_138 = arith.constant 12 : index
    %c0_139 = arith.constant 0 : index
    %232 = vector.load %arg13[%c12_138, %c0_139] : memref<32x256xf32, #tpu.memory_space<vmem>>, vector<4x128xf32>
    %c16_140 = arith.constant 16 : index
    %c128_141 = arith.constant 128 : index
    %233 = vector.load %arg13[%c16_140, %c128_141] : memref<32x256xf32, #tpu.memory_space<vmem>>, vector<4x128xf32>
    %234 = tpu.concatenate %232, %233 in 0 : vector<4x128xf32>, vector<4x128xf32> -> vector<8x128xf32>
    %235 = tpu.concatenate %227, %227 in 1 : vector<8x32xf32>, vector<8x32xf32> -> vector<8x64xf32>
    %cst_142 = arith.constant 0.000000e+00 : f32
    %236 = vector.broadcast %cst_142 : f32 to vector<8x64xf32>
    %237 = arith.select %140, %235, %236 : vector<8x64xi1>, vector<8x64xf32>
    %238 = arith.truncf %237 : vector<8x64xf32> to vector<8x64xbf16>
    %cst_143 = arith.constant dense<0.000000e+00> : vector<8x128xf32>
    %239 = tpu.matmul %238, %149, %cst_143 {dimension_numbers = #tpu.dot_dimension_numbers<[1], [0], [0], [1], [0, 0, 1, 1], [], []>} : vector<8x64xbf16>, vector<64x128xbf16>, vector<8x128xf32> -> vector<8x128xf32>
    %240 = arith.addf %234, %239 : vector<8x128xf32>
    %241 = vector.extract_strided_slice %240 {offsets = [0, 0], sizes = [8, 96], strides = [1, 1]} : vector<8x128xf32> to vector<8x96xf32>
    %242 = arith.negf %241 : vector<8x96xf32>
    %243 = math.exp %242 : vector<8x96xf32>
    %cst_144 = arith.constant 1.000000e+00 : f32
    %244 = vector.broadcast %cst_144 : f32 to vector<8x96xf32>
    %245 = arith.addf %244, %243 : vector<8x96xf32>
    %246 = arith.divf %244, %245 : vector<8x96xf32>
    %247 = vector.extract_strided_slice %240 {offsets = [0, 96], sizes = [8, 32], strides = [1, 1]} : vector<8x128xf32> to vector<8x32xf32>
    %248 = math.tanh %247 : vector<8x32xf32>
    %249 = vector.extract_strided_slice %246 {offsets = [0, 0], sizes = [8, 32], strides = [1, 1]} : vector<8x96xf32> to vector<8x32xf32>
    %250 = vector.extract_strided_slice %246 {offsets = [0, 32], sizes = [8, 32], strides = [1, 1]} : vector<8x96xf32> to vector<8x32xf32>
    %251 = vector.extract_strided_slice %246 {offsets = [0, 64], sizes = [8, 32], strides = [1, 1]} : vector<8x96xf32> to vector<8x32xf32>
    %252 = arith.mulf %250, %225 : vector<8x32xf32>
    %253 = arith.mulf %249, %248 : vector<8x32xf32>
    %254 = arith.addf %252, %253 : vector<8x32xf32>
    %255 = math.tanh %254 : vector<8x32xf32>
    %256 = arith.mulf %251, %255 : vector<8x32xf32>
    %257 = vector.extract_strided_slice %256 {offsets = [0, 0], sizes = [4, 32], strides = [1, 1]} : vector<8x32xf32> to vector<4x32xf32>
    %c12_145 = arith.constant 12 : index
    %c0_146 = arith.constant 0 : index
    %258 = vector.load %arg12[%c12_145, %c0_146] : memref<32x128xf32, #tpu.memory_space<vmem>>, vector<4x32xf32>
    tpu.vector_store %arg12[%c12_145, %c0_146], %257 {strides = array<i32>} : memref<32x128xf32, #tpu.memory_space<vmem>>, vector<4x32xf32>,
    %259 = vector.extract_strided_slice %256 {offsets = [4, 0], sizes = [4, 32], strides = [1, 1]} : vector<8x32xf32> to vector<4x32xf32>
    %c16_147 = arith.constant 16 : index
    %c32_148 = arith.constant 32 : index
    %260 = vector.load %arg12[%c16_147, %c32_148] : memref<32x128xf32, #tpu.memory_space<vmem>>, vector<4x32xf32>
    tpu.vector_store %arg12[%c16_147, %c32_148], %259 {strides = array<i32>} : memref<32x128xf32, #tpu.memory_space<vmem>>, vector<4x32xf32>,
    %c16_149 = arith.constant 16 : index
    %c0_150 = arith.constant 0 : index
    %261 = vector.load %arg13[%c16_149, %c0_150] : memref<32x256xf32, #tpu.memory_space<vmem>>, vector<4x128xf32>
    %c12_151 = arith.constant 12 : index
    %c128_152 = arith.constant 128 : index
    %262 = vector.load %arg13[%c12_151, %c128_152] : memref<32x256xf32, #tpu.memory_space<vmem>>, vector<4x128xf32>
    %263 = tpu.concatenate %261, %262 in 0 : vector<4x128xf32>, vector<4x128xf32> -> vector<8x128xf32>
    %264 = tpu.concatenate %256, %256 in 1 : vector<8x32xf32>, vector<8x32xf32> -> vector<8x64xf32>
    %cst_153 = arith.constant 0.000000e+00 : f32
    %265 = vector.broadcast %cst_153 : f32 to vector<8x64xf32>
    %266 = arith.select %140, %264, %265 : vector<8x64xi1>, vector<8x64xf32>
    %267 = arith.truncf %266 : vector<8x64xf32> to vector<8x64xbf16>
    %cst_154 = arith.constant dense<0.000000e+00> : vector<8x128xf32>
    %268 = tpu.matmul %267, %149, %cst_154 {dimension_numbers = #tpu.dot_dimension_numbers<[1], [0], [0], [1], [0, 0, 1, 1], [], []>} : vector<8x64xbf16>, vector<64x128xbf16>, vector<8x128xf32> -> vector<8x128xf32>
    %269 = arith.addf %263, %268 : vector<8x128xf32>
    %270 = vector.extract_strided_slice %269 {offsets = [0, 0], sizes = [8, 96], strides = [1, 1]} : vector<8x128xf32> to vector<8x96xf32>
    %271 = arith.negf %270 : vector<8x96xf32>
    %272 = math.exp %271 : vector<8x96xf32>
    %cst_155 = arith.constant 1.000000e+00 : f32
    %273 = vector.broadcast %cst_155 : f32 to vector<8x96xf32>
    %274 = arith.addf %273, %272 : vector<8x96xf32>
    %275 = arith.divf %273, %274 : vector<8x96xf32>
    %276 = vector.extract_strided_slice %269 {offsets = [0, 96], sizes = [8, 32], strides = [1, 1]} : vector<8x128xf32> to vector<8x32xf32>
    %277 = math.tanh %276 : vector<8x32xf32>
    %278 = vector.extract_strided_slice %275 {offsets = [0, 0], sizes = [8, 32], strides = [1, 1]} : vector<8x96xf32> to vector<8x32xf32>
    %279 = vector.extract_strided_slice %275 {offsets = [0, 32], sizes = [8, 32], strides = [1, 1]} : vector<8x96xf32> to vector<8x32xf32>
    %280 = vector.extract_strided_slice %275 {offsets = [0, 64], sizes = [8, 32], strides = [1, 1]} : vector<8x96xf32> to vector<8x32xf32>
    %281 = arith.mulf %279, %254 : vector<8x32xf32>
    %282 = arith.mulf %278, %277 : vector<8x32xf32>
    %283 = arith.addf %281, %282 : vector<8x32xf32>
    %284 = math.tanh %283 : vector<8x32xf32>
    %285 = arith.mulf %280, %284 : vector<8x32xf32>
    %286 = vector.extract_strided_slice %285 {offsets = [0, 0], sizes = [4, 32], strides = [1, 1]} : vector<8x32xf32> to vector<4x32xf32>
    %c16_156 = arith.constant 16 : index
    %c0_157 = arith.constant 0 : index
    %287 = vector.load %arg12[%c16_156, %c0_157] : memref<32x128xf32, #tpu.memory_space<vmem>>, vector<4x32xf32>
    tpu.vector_store %arg12[%c16_156, %c0_157], %286 {strides = array<i32>} : memref<32x128xf32, #tpu.memory_space<vmem>>, vector<4x32xf32>,
    %288 = vector.extract_strided_slice %285 {offsets = [4, 0], sizes = [4, 32], strides = [1, 1]} : vector<8x32xf32> to vector<4x32xf32>
    %c12_158 = arith.constant 12 : index
    %c32_159 = arith.constant 32 : index
    %289 = vector.load %arg12[%c12_158, %c32_159] : memref<32x128xf32, #tpu.memory_space<vmem>>, vector<4x32xf32>
    tpu.vector_store %arg12[%c12_158, %c32_159], %288 {strides = array<i32>} : memref<32x128xf32, #tpu.memory_space<vmem>>, vector<4x32xf32>,
    %c20_160 = arith.constant 20 : index
    %c0_161 = arith.constant 0 : index
    %290 = vector.load %arg13[%c20_160, %c0_161] : memref<32x256xf32, #tpu.memory_space<vmem>>, vector<4x128xf32>
    %c8_162 = arith.constant 8 : index
    %c128_163 = arith.constant 128 : index
    %291 = vector.load %arg13[%c8_162, %c128_163] : memref<32x256xf32, #tpu.memory_space<vmem>>, vector<4x128xf32>
    %292 = tpu.concatenate %290, %291 in 0 : vector<4x128xf32>, vector<4x128xf32> -> vector<8x128xf32>
    %293 = tpu.concatenate %285, %285 in 1 : vector<8x32xf32>, vector<8x32xf32> -> vector<8x64xf32>
    %cst_164 = arith.constant 0.000000e+00 : f32
    %294 = vector.broadcast %cst_164 : f32 to vector<8x64xf32>
    %295 = arith.select %140, %293, %294 : vector<8x64xi1>, vector<8x64xf32>
    %296 = arith.truncf %295 : vector<8x64xf32> to vector<8x64xbf16>
    %cst_165 = arith.constant dense<0.000000e+00> : vector<8x128xf32>
    %297 = tpu.matmul %296, %149, %cst_165 {dimension_numbers = #tpu.dot_dimension_numbers<[1], [0], [0], [1], [0, 0, 1, 1], [], []>} : vector<8x64xbf16>, vector<64x128xbf16>, vector<8x128xf32> -> vector<8x128xf32>
    %298 = arith.addf %292, %297 : vector<8x128xf32>
    %299 = vector.extract_strided_slice %298 {offsets = [0, 0], sizes = [8, 96], strides = [1, 1]} : vector<8x128xf32> to vector<8x96xf32>
    %300 = arith.negf %299 : vector<8x96xf32>
    %301 = math.exp %300 : vector<8x96xf32>
    %cst_166 = arith.constant 1.000000e+00 : f32
    %302 = vector.broadcast %cst_166 : f32 to vector<8x96xf32>
    %303 = arith.addf %302, %301 : vector<8x96xf32>
    %304 = arith.divf %302, %303 : vector<8x96xf32>
    %305 = vector.extract_strided_slice %298 {offsets = [0, 96], sizes = [8, 32], strides = [1, 1]} : vector<8x128xf32> to vector<8x32xf32>
    %306 = math.tanh %305 : vector<8x32xf32>
    %307 = vector.extract_strided_slice %304 {offsets = [0, 0], sizes = [8, 32], strides = [1, 1]} : vector<8x96xf32> to vector<8x32xf32>
    %308 = vector.extract_strided_slice %304 {offsets = [0, 32], sizes = [8, 32], strides = [1, 1]} : vector<8x96xf32> to vector<8x32xf32>
    %309 = vector.extract_strided_slice %304 {offsets = [0, 64], sizes = [8, 32], strides = [1, 1]} : vector<8x96xf32> to vector<8x32xf32>
    %310 = arith.mulf %308, %283 : vector<8x32xf32>
    %311 = arith.mulf %307, %306 : vector<8x32xf32>
    %312 = arith.addf %310, %311 : vector<8x32xf32>
    %313 = math.tanh %312 : vector<8x32xf32>
    %314 = arith.mulf %309, %313 : vector<8x32xf32>
    %315 = vector.extract_strided_slice %314 {offsets = [0, 0], sizes = [4, 32], strides = [1, 1]} : vector<8x32xf32> to vector<4x32xf32>
    %c20_167 = arith.constant 20 : index
    %c0_168 = arith.constant 0 : index
    %316 = vector.load %arg12[%c20_167, %c0_168] : memref<32x128xf32, #tpu.memory_space<vmem>>, vector<4x32xf32>
    tpu.vector_store %arg12[%c20_167, %c0_168], %315 {strides = array<i32>} : memref<32x128xf32, #tpu.memory_space<vmem>>, vector<4x32xf32>,
    %317 = vector.extract_strided_slice %314 {offsets = [4, 0], sizes = [4, 32], strides = [1, 1]} : vector<8x32xf32> to vector<4x32xf32>
    %c8_169 = arith.constant 8 : index
    %c32_170 = arith.constant 32 : index
    %318 = vector.load %arg12[%c8_169, %c32_170] : memref<32x128xf32, #tpu.memory_space<vmem>>, vector<4x32xf32>
    tpu.vector_store %arg12[%c8_169, %c32_170], %317 {strides = array<i32>} : memref<32x128xf32, #tpu.memory_space<vmem>>, vector<4x32xf32>,
    %c24_171 = arith.constant 24 : index
    %c0_172 = arith.constant 0 : index
    %319 = vector.load %arg13[%c24_171, %c0_172] : memref<32x256xf32, #tpu.memory_space<vmem>>, vector<4x128xf32>
    %c4_173 = arith.constant 4 : index
    %c128_174 = arith.constant 128 : index
    %320 = vector.load %arg13[%c4_173, %c128_174] : memref<32x256xf32, #tpu.memory_space<vmem>>, vector<4x128xf32>
    %321 = tpu.concatenate %319, %320 in 0 : vector<4x128xf32>, vector<4x128xf32> -> vector<8x128xf32>
    %322 = tpu.concatenate %314, %314 in 1 : vector<8x32xf32>, vector<8x32xf32> -> vector<8x64xf32>
    %cst_175 = arith.constant 0.000000e+00 : f32
    %323 = vector.broadcast %cst_175 : f32 to vector<8x64xf32>
    %324 = arith.select %140, %322, %323 : vector<8x64xi1>, vector<8x64xf32>
    %325 = arith.truncf %324 : vector<8x64xf32> to vector<8x64xbf16>
    %cst_176 = arith.constant dense<0.000000e+00> : vector<8x128xf32>
    %326 = tpu.matmul %325, %149, %cst_176 {dimension_numbers = #tpu.dot_dimension_numbers<[1], [0], [0], [1], [0, 0, 1, 1], [], []>} : vector<8x64xbf16>, vector<64x128xbf16>, vector<8x128xf32> -> vector<8x128xf32>
    %327 = arith.addf %321, %326 : vector<8x128xf32>
    %328 = vector.extract_strided_slice %327 {offsets = [0, 0], sizes = [8, 96], strides = [1, 1]} : vector<8x128xf32> to vector<8x96xf32>
    %329 = arith.negf %328 : vector<8x96xf32>
    %330 = math.exp %329 : vector<8x96xf32>
    %cst_177 = arith.constant 1.000000e+00 : f32
    %331 = vector.broadcast %cst_177 : f32 to vector<8x96xf32>
    %332 = arith.addf %331, %330 : vector<8x96xf32>
    %333 = arith.divf %331, %332 : vector<8x96xf32>
    %334 = vector.extract_strided_slice %327 {offsets = [0, 96], sizes = [8, 32], strides = [1, 1]} : vector<8x128xf32> to vector<8x32xf32>
    %335 = math.tanh %334 : vector<8x32xf32>
    %336 = vector.extract_strided_slice %333 {offsets = [0, 0], sizes = [8, 32], strides = [1, 1]} : vector<8x96xf32> to vector<8x32xf32>
    %337 = vector.extract_strided_slice %333 {offsets = [0, 32], sizes = [8, 32], strides = [1, 1]} : vector<8x96xf32> to vector<8x32xf32>
    %338 = vector.extract_strided_slice %333 {offsets = [0, 64], sizes = [8, 32], strides = [1, 1]} : vector<8x96xf32> to vector<8x32xf32>
    %339 = arith.mulf %337, %312 : vector<8x32xf32>
    %340 = arith.mulf %336, %335 : vector<8x32xf32>
    %341 = arith.addf %339, %340 : vector<8x32xf32>
    %342 = math.tanh %341 : vector<8x32xf32>
    %343 = arith.mulf %338, %342 : vector<8x32xf32>
    %344 = vector.extract_strided_slice %343 {offsets = [0, 0], sizes = [4, 32], strides = [1, 1]} : vector<8x32xf32> to vector<4x32xf32>
    %c24_178 = arith.constant 24 : index
    %c0_179 = arith.constant 0 : index
    %345 = vector.load %arg12[%c24_178, %c0_179] : memref<32x128xf32, #tpu.memory_space<vmem>>, vector<4x32xf32>
    tpu.vector_store %arg12[%c24_178, %c0_179], %344 {strides = array<i32>} : memref<32x128xf32, #tpu.memory_space<vmem>>, vector<4x32xf32>,
    %346 = vector.extract_strided_slice %343 {offsets = [4, 0], sizes = [4, 32], strides = [1, 1]} : vector<8x32xf32> to vector<4x32xf32>
    %c4_180 = arith.constant 4 : index
    %c32_181 = arith.constant 32 : index
    %347 = vector.load %arg12[%c4_180, %c32_181] : memref<32x128xf32, #tpu.memory_space<vmem>>, vector<4x32xf32>
    tpu.vector_store %arg12[%c4_180, %c32_181], %346 {strides = array<i32>} : memref<32x128xf32, #tpu.memory_space<vmem>>, vector<4x32xf32>,
    %c28_182 = arith.constant 28 : index
    %c0_183 = arith.constant 0 : index
    %348 = vector.load %arg13[%c28_182, %c0_183] : memref<32x256xf32, #tpu.memory_space<vmem>>, vector<4x128xf32>
    %c0_184 = arith.constant 0 : index
    %c128_185 = arith.constant 128 : index
    %349 = vector.load %arg13[%c0_184, %c128_185] : memref<32x256xf32, #tpu.memory_space<vmem>>, vector<4x128xf32>
    %350 = tpu.concatenate %348, %349 in 0 : vector<4x128xf32>, vector<4x128xf32> -> vector<8x128xf32>
    %351 = tpu.concatenate %343, %343 in 1 : vector<8x32xf32>, vector<8x32xf32> -> vector<8x64xf32>
    %cst_186 = arith.constant 0.000000e+00 : f32
    %352 = vector.broadcast %cst_186 : f32 to vector<8x64xf32>
    %353 = arith.select %140, %351, %352 : vector<8x64xi1>, vector<8x64xf32>
    %354 = arith.truncf %353 : vector<8x64xf32> to vector<8x64xbf16>
    %cst_187 = arith.constant dense<0.000000e+00> : vector<8x128xf32>
    %355 = tpu.matmul %354, %149, %cst_187 {dimension_numbers = #tpu.dot_dimension_numbers<[1], [0], [0], [1], [0, 0, 1, 1], [], []>} : vector<8x64xbf16>, vector<64x128xbf16>, vector<8x128xf32> -> vector<8x128xf32>
    %356 = arith.addf %350, %355 : vector<8x128xf32>
    %357 = vector.extract_strided_slice %356 {offsets = [0, 0], sizes = [8, 96], strides = [1, 1]} : vector<8x128xf32> to vector<8x96xf32>
    %358 = arith.negf %357 : vector<8x96xf32>
    %359 = math.exp %358 : vector<8x96xf32>
    %cst_188 = arith.constant 1.000000e+00 : f32
    %360 = vector.broadcast %cst_188 : f32 to vector<8x96xf32>
    %361 = arith.addf %360, %359 : vector<8x96xf32>
    %362 = arith.divf %360, %361 : vector<8x96xf32>
    %363 = vector.extract_strided_slice %356 {offsets = [0, 96], sizes = [8, 32], strides = [1, 1]} : vector<8x128xf32> to vector<8x32xf32>
    %364 = math.tanh %363 : vector<8x32xf32>
    %365 = vector.extract_strided_slice %362 {offsets = [0, 0], sizes = [8, 32], strides = [1, 1]} : vector<8x96xf32> to vector<8x32xf32>
    %366 = vector.extract_strided_slice %362 {offsets = [0, 32], sizes = [8, 32], strides = [1, 1]} : vector<8x96xf32> to vector<8x32xf32>
    %367 = vector.extract_strided_slice %362 {offsets = [0, 64], sizes = [8, 32], strides = [1, 1]} : vector<8x96xf32> to vector<8x32xf32>
    %368 = arith.mulf %366, %341 : vector<8x32xf32>
    %369 = arith.mulf %365, %364 : vector<8x32xf32>
    %370 = arith.addf %368, %369 : vector<8x32xf32>
    %371 = math.tanh %370 : vector<8x32xf32>
    %372 = arith.mulf %367, %371 : vector<8x32xf32>
    %373 = vector.extract_strided_slice %372 {offsets = [0, 0], sizes = [4, 32], strides = [1, 1]} : vector<8x32xf32> to vector<4x32xf32>
    %c28_189 = arith.constant 28 : index
    %c0_190 = arith.constant 0 : index
    %374 = vector.load %arg12[%c28_189, %c0_190] : memref<32x128xf32, #tpu.memory_space<vmem>>, vector<4x32xf32>
    tpu.vector_store %arg12[%c28_189, %c0_190], %373 {strides = array<i32>} : memref<32x128xf32, #tpu.memory_space<vmem>>, vector<4x32xf32>,
    %375 = vector.extract_strided_slice %372 {offsets = [4, 0], sizes = [4, 32], strides = [1, 1]} : vector<8x32xf32> to vector<4x32xf32>
    %c0_191 = arith.constant 0 : index
    %c32_192 = arith.constant 32 : index
    %376 = vector.load %arg12[%c0_191, %c32_192] : memref<32x128xf32, #tpu.memory_space<vmem>>, vector<4x32xf32>
    tpu.vector_store %arg12[%c0_191, %c32_192], %375 {strides = array<i32>} : memref<32x128xf32, #tpu.memory_space<vmem>>, vector<4x32xf32>,
    %c0_193 = arith.constant 0 : index
    %c0_194 = arith.constant 0 : index
    %377 = vector.load %arg12[%c0_193, %c0_194] : memref<32x128xf32, #tpu.memory_space<vmem>>, vector<32x128xf32>
    %378 = arith.truncf %377 : vector<32x128xf32> to vector<32x128xbf16>
    %c0_195 = arith.constant 0 : index
    %c0_196 = arith.constant 0 : index
    %379 = vector.load %arg6[%c0_195, %c0_196] : memref<128x256xbf16, #tpu.memory_space<vmem>>, vector<128x256xbf16>
    %cst_197 = arith.constant dense<0.000000e+00> : vector<32x256xf32>
    %380 = tpu.matmul %378, %379, %cst_197 {dimension_numbers = #tpu.dot_dimension_numbers<[1], [0], [0], [1], [0, 0, 1, 1], [], []>} : vector<32x128xbf16>, vector<128x256xbf16>, vector<32x256xf32> -> vector<32x256xf32>
    %c0_198 = arith.constant 0 : index
    %c0_199 = arith.constant 0 : index
    %381 = vector.load %arg8[%c0_198, %c0_199] : memref<1x256xf32, #tpu.memory_space<vmem>>, vector<1x256xf32>
    %382 = vector.broadcast %381 : vector<1x256xf32> to vector<32x256xf32>
    %383 = arith.addf %380, %382 : vector<32x256xf32>
    %c0_200 = arith.constant 0 : index
    %c0_201 = arith.constant 0 : index
    %384 = vector.load %arg13[%c0_200, %c0_201] : memref<32x256xf32, #tpu.memory_space<vmem>>, vector<32x256xf32>
    tpu.vector_store %arg13[%c0_200, %c0_201], %383 {strides = array<i32>} : memref<32x256xf32, #tpu.memory_space<vmem>>, vector<32x256xf32>,
    %c0_202 = arith.constant 0 : index
    %c0_203 = arith.constant 0 : index
    %385 = vector.load %arg7[%c0_202, %c0_203] : memref<64x128xbf16, #tpu.memory_space<vmem>>, vector<64x128xbf16>
    %cst_204 = arith.constant 0.000000e+00 : f32
    %386 = vector.broadcast %cst_204 : f32 to vector<8x32xf32>
    %c0_205 = arith.constant 0 : index
    %c0_206 = arith.constant 0 : index
    %387 = vector.load %arg13[%c0_205, %c0_206] : memref<32x256xf32, #tpu.memory_space<vmem>>, vector<4x128xf32>
    %c28_207 = arith.constant 28 : index
    %c128_208 = arith.constant 128 : index
    %388 = vector.load %arg13[%c28_207, %c128_208] : memref<32x256xf32, #tpu.memory_space<vmem>>, vector<4x128xf32>
    %389 = tpu.concatenate %387, %388 in 0 : vector<4x128xf32>, vector<4x128xf32> -> vector<8x128xf32>
    %390 = vector.extract_strided_slice %389 {offsets = [0, 0], sizes = [8, 96], strides = [1, 1]} : vector<8x128xf32> to vector<8x96xf32>
    %391 = arith.negf %390 : vector<8x96xf32>
    %392 = math.exp %391 : vector<8x96xf32>
    %cst_209 = arith.constant 1.000000e+00 : f32
    %393 = vector.broadcast %cst_209 : f32 to vector<8x96xf32>
    %394 = arith.addf %393, %392 : vector<8x96xf32>
    %395 = arith.divf %393, %394 : vector<8x96xf32>
    %396 = vector.extract_strided_slice %389 {offsets = [0, 96], sizes = [8, 32], strides = [1, 1]} : vector<8x128xf32> to vector<8x32xf32>
    %397 = math.tanh %396 : vector<8x32xf32>
    %398 = vector.extract_strided_slice %395 {offsets = [0, 0], sizes = [8, 32], strides = [1, 1]} : vector<8x96xf32> to vector<8x32xf32>
    %399 = vector.extract_strided_slice %395 {offsets = [0, 32], sizes = [8, 32], strides = [1, 1]} : vector<8x96xf32> to vector<8x32xf32>
    %400 = vector.extract_strided_slice %395 {offsets = [0, 64], sizes = [8, 32], strides = [1, 1]} : vector<8x96xf32> to vector<8x32xf32>
    %401 = arith.mulf %399, %386 : vector<8x32xf32>
    %402 = arith.mulf %398, %397 : vector<8x32xf32>
    %403 = arith.addf %401, %402 : vector<8x32xf32>
    %404 = math.tanh %403 : vector<8x32xf32>
    %405 = arith.mulf %400, %404 : vector<8x32xf32>
    %406 = vector.extract_strided_slice %405 {offsets = [4, 0], sizes = [4, 32], strides = [1, 1]} : vector<8x32xf32> to vector<4x32xf32>
    %c4_210 = arith.constant 4 : index
    %c0_211 = arith.constant 0 : index
    %407 = vector.load %arg13[%c4_210, %c0_211] : memref<32x256xf32, #tpu.memory_space<vmem>>, vector<4x128xf32>
    %c24_212 = arith.constant 24 : index
    %c128_213 = arith.constant 128 : index
    %408 = vector.load %arg13[%c24_212, %c128_213] : memref<32x256xf32, #tpu.memory_space<vmem>>, vector<4x128xf32>
    %409 = tpu.concatenate %407, %408 in 0 : vector<4x128xf32>, vector<4x128xf32> -> vector<8x128xf32>
    %410 = tpu.concatenate %405, %405 in 1 : vector<8x32xf32>, vector<8x32xf32> -> vector<8x64xf32>
    %cst_214 = arith.constant 0.000000e+00 : f32
    %411 = vector.broadcast %cst_214 : f32 to vector<8x64xf32>
    %412 = arith.select %140, %410, %411 : vector<8x64xi1>, vector<8x64xf32>
    %413 = arith.truncf %412 : vector<8x64xf32> to vector<8x64xbf16>
    %cst_215 = arith.constant dense<0.000000e+00> : vector<8x128xf32>
    %414 = tpu.matmul %413, %385, %cst_215 {dimension_numbers = #tpu.dot_dimension_numbers<[1], [0], [0], [1], [0, 0, 1, 1], [], []>} : vector<8x64xbf16>, vector<64x128xbf16>, vector<8x128xf32> -> vector<8x128xf32>
    %415 = arith.addf %409, %414 : vector<8x128xf32>
    %416 = vector.extract_strided_slice %415 {offsets = [0, 0], sizes = [8, 96], strides = [1, 1]} : vector<8x128xf32> to vector<8x96xf32>
    %417 = arith.negf %416 : vector<8x96xf32>
    %418 = math.exp %417 : vector<8x96xf32>
    %cst_216 = arith.constant 1.000000e+00 : f32
    %419 = vector.broadcast %cst_216 : f32 to vector<8x96xf32>
    %420 = arith.addf %419, %418 : vector<8x96xf32>
    %421 = arith.divf %419, %420 : vector<8x96xf32>
    %422 = vector.extract_strided_slice %415 {offsets = [0, 96], sizes = [8, 32], strides = [1, 1]} : vector<8x128xf32> to vector<8x32xf32>
    %423 = math.tanh %422 : vector<8x32xf32>
    %424 = vector.extract_strided_slice %421 {offsets = [0, 0], sizes = [8, 32], strides = [1, 1]} : vector<8x96xf32> to vector<8x32xf32>
    %425 = vector.extract_strided_slice %421 {offsets = [0, 32], sizes = [8, 32], strides = [1, 1]} : vector<8x96xf32> to vector<8x32xf32>
    %426 = vector.extract_strided_slice %421 {offsets = [0, 64], sizes = [8, 32], strides = [1, 1]} : vector<8x96xf32> to vector<8x32xf32>
    %427 = arith.mulf %425, %403 : vector<8x32xf32>
    %428 = arith.mulf %424, %423 : vector<8x32xf32>
    %429 = arith.addf %427, %428 : vector<8x32xf32>
    %430 = math.tanh %429 : vector<8x32xf32>
    %431 = arith.mulf %426, %430 : vector<8x32xf32>
    %c8_217 = arith.constant 8 : index
    %c0_218 = arith.constant 0 : index
    %432 = vector.load %arg13[%c8_217, %c0_218] : memref<32x256xf32, #tpu.memory_space<vmem>>, vector<4x128xf32>
    %c20_219 = arith.constant 20 : index
    %c128_220 = arith.constant 128 : index
    %433 = vector.load %arg13[%c20_219, %c128_220] : memref<32x256xf32, #tpu.memory_space<vmem>>, vector<4x128xf32>
    %434 = tpu.concatenate %432, %433 in 0 : vector<4x128xf32>, vector<4x128xf32> -> vector<8x128xf32>
    %435 = tpu.concatenate %431, %431 in 1 : vector<8x32xf32>, vector<8x32xf32> -> vector<8x64xf32>
    %cst_221 = arith.constant 0.000000e+00 : f32
    %436 = vector.broadcast %cst_221 : f32 to vector<8x64xf32>
    %437 = arith.select %140, %435, %436 : vector<8x64xi1>, vector<8x64xf32>
    %438 = arith.truncf %437 : vector<8x64xf32> to vector<8x64xbf16>
    %cst_222 = arith.constant dense<0.000000e+00> : vector<8x128xf32>
    %439 = tpu.matmul %438, %385, %cst_222 {dimension_numbers = #tpu.dot_dimension_numbers<[1], [0], [0], [1], [0, 0, 1, 1], [], []>} : vector<8x64xbf16>, vector<64x128xbf16>, vector<8x128xf32> -> vector<8x128xf32>
    %440 = arith.addf %434, %439 : vector<8x128xf32>
    %441 = vector.extract_strided_slice %440 {offsets = [0, 0], sizes = [8, 96], strides = [1, 1]} : vector<8x128xf32> to vector<8x96xf32>
    %442 = arith.negf %441 : vector<8x96xf32>
    %443 = math.exp %442 : vector<8x96xf32>
    %cst_223 = arith.constant 1.000000e+00 : f32
    %444 = vector.broadcast %cst_223 : f32 to vector<8x96xf32>
    %445 = arith.addf %444, %443 : vector<8x96xf32>
    %446 = arith.divf %444, %445 : vector<8x96xf32>
    %447 = vector.extract_strided_slice %440 {offsets = [0, 96], sizes = [8, 32], strides = [1, 1]} : vector<8x128xf32> to vector<8x32xf32>
    %448 = math.tanh %447 : vector<8x32xf32>
    %449 = vector.extract_strided_slice %446 {offsets = [0, 0], sizes = [8, 32], strides = [1, 1]} : vector<8x96xf32> to vector<8x32xf32>
    %450 = vector.extract_strided_slice %446 {offsets = [0, 32], sizes = [8, 32], strides = [1, 1]} : vector<8x96xf32> to vector<8x32xf32>
    %451 = vector.extract_strided_slice %446 {offsets = [0, 64], sizes = [8, 32], strides = [1, 1]} : vector<8x96xf32> to vector<8x32xf32>
    %452 = arith.mulf %450, %429 : vector<8x32xf32>
    %453 = arith.mulf %449, %448 : vector<8x32xf32>
    %454 = arith.addf %452, %453 : vector<8x32xf32>
    %455 = math.tanh %454 : vector<8x32xf32>
    %456 = arith.mulf %451, %455 : vector<8x32xf32>
    %c12_224 = arith.constant 12 : index
    %c0_225 = arith.constant 0 : index
    %457 = vector.load %arg13[%c12_224, %c0_225] : memref<32x256xf32, #tpu.memory_space<vmem>>, vector<4x128xf32>
    %c16_226 = arith.constant 16 : index
    %c128_227 = arith.constant 128 : index
    %458 = vector.load %arg13[%c16_226, %c128_227] : memref<32x256xf32, #tpu.memory_space<vmem>>, vector<4x128xf32>
    %459 = tpu.concatenate %457, %458 in 0 : vector<4x128xf32>, vector<4x128xf32> -> vector<8x128xf32>
    %460 = tpu.concatenate %456, %456 in 1 : vector<8x32xf32>, vector<8x32xf32> -> vector<8x64xf32>
    %cst_228 = arith.constant 0.000000e+00 : f32
    %461 = vector.broadcast %cst_228 : f32 to vector<8x64xf32>
    %462 = arith.select %140, %460, %461 : vector<8x64xi1>, vector<8x64xf32>
    %463 = arith.truncf %462 : vector<8x64xf32> to vector<8x64xbf16>
    %cst_229 = arith.constant dense<0.000000e+00> : vector<8x128xf32>
    %464 = tpu.matmul %463, %385, %cst_229 {dimension_numbers = #tpu.dot_dimension_numbers<[1], [0], [0], [1], [0, 0, 1, 1], [], []>} : vector<8x64xbf16>, vector<64x128xbf16>, vector<8x128xf32> -> vector<8x128xf32>
    %465 = arith.addf %459, %464 : vector<8x128xf32>
    %466 = vector.extract_strided_slice %465 {offsets = [0, 0], sizes = [8, 96], strides = [1, 1]} : vector<8x128xf32> to vector<8x96xf32>
    %467 = arith.negf %466 : vector<8x96xf32>
    %468 = math.exp %467 : vector<8x96xf32>
    %cst_230 = arith.constant 1.000000e+00 : f32
    %469 = vector.broadcast %cst_230 : f32 to vector<8x96xf32>
    %470 = arith.addf %469, %468 : vector<8x96xf32>
    %471 = arith.divf %469, %470 : vector<8x96xf32>
    %472 = vector.extract_strided_slice %465 {offsets = [0, 96], sizes = [8, 32], strides = [1, 1]} : vector<8x128xf32> to vector<8x32xf32>
    %473 = math.tanh %472 : vector<8x32xf32>
    %474 = vector.extract_strided_slice %471 {offsets = [0, 0], sizes = [8, 32], strides = [1, 1]} : vector<8x96xf32> to vector<8x32xf32>
    %475 = vector.extract_strided_slice %471 {offsets = [0, 32], sizes = [8, 32], strides = [1, 1]} : vector<8x96xf32> to vector<8x32xf32>
    %476 = vector.extract_strided_slice %471 {offsets = [0, 64], sizes = [8, 32], strides = [1, 1]} : vector<8x96xf32> to vector<8x32xf32>
    %477 = arith.mulf %475, %454 : vector<8x32xf32>
    %478 = arith.mulf %474, %473 : vector<8x32xf32>
    %479 = arith.addf %477, %478 : vector<8x32xf32>
    %480 = math.tanh %479 : vector<8x32xf32>
    %481 = arith.mulf %476, %480 : vector<8x32xf32>
    %c16_231 = arith.constant 16 : index
    %c0_232 = arith.constant 0 : index
    %482 = vector.load %arg13[%c16_231, %c0_232] : memref<32x256xf32, #tpu.memory_space<vmem>>, vector<4x128xf32>
    %c12_233 = arith.constant 12 : index
    %c128_234 = arith.constant 128 : index
    %483 = vector.load %arg13[%c12_233, %c128_234] : memref<32x256xf32, #tpu.memory_space<vmem>>, vector<4x128xf32>
    %484 = tpu.concatenate %482, %483 in 0 : vector<4x128xf32>, vector<4x128xf32> -> vector<8x128xf32>
    %485 = tpu.concatenate %481, %481 in 1 : vector<8x32xf32>, vector<8x32xf32> -> vector<8x64xf32>
    %cst_235 = arith.constant 0.000000e+00 : f32
    %486 = vector.broadcast %cst_235 : f32 to vector<8x64xf32>
    %487 = arith.select %140, %485, %486 : vector<8x64xi1>, vector<8x64xf32>
    %488 = arith.truncf %487 : vector<8x64xf32> to vector<8x64xbf16>
    %cst_236 = arith.constant dense<0.000000e+00> : vector<8x128xf32>
    %489 = tpu.matmul %488, %385, %cst_236 {dimension_numbers = #tpu.dot_dimension_numbers<[1], [0], [0], [1], [0, 0, 1, 1], [], []>} : vector<8x64xbf16>, vector<64x128xbf16>, vector<8x128xf32> -> vector<8x128xf32>
    %490 = arith.addf %484, %489 : vector<8x128xf32>
    %491 = vector.extract_strided_slice %490 {offsets = [0, 0], sizes = [8, 96], strides = [1, 1]} : vector<8x128xf32> to vector<8x96xf32>
    %492 = arith.negf %491 : vector<8x96xf32>
    %493 = math.exp %492 : vector<8x96xf32>
    %cst_237 = arith.constant 1.000000e+00 : f32
    %494 = vector.broadcast %cst_237 : f32 to vector<8x96xf32>
    %495 = arith.addf %494, %493 : vector<8x96xf32>
    %496 = arith.divf %494, %495 : vector<8x96xf32>
    %497 = vector.extract_strided_slice %490 {offsets = [0, 96], sizes = [8, 32], strides = [1, 1]} : vector<8x128xf32> to vector<8x32xf32>
    %498 = math.tanh %497 : vector<8x32xf32>
    %499 = vector.extract_strided_slice %496 {offsets = [0, 0], sizes = [8, 32], strides = [1, 1]} : vector<8x96xf32> to vector<8x32xf32>
    %500 = vector.extract_strided_slice %496 {offsets = [0, 32], sizes = [8, 32], strides = [1, 1]} : vector<8x96xf32> to vector<8x32xf32>
    %501 = vector.extract_strided_slice %496 {offsets = [0, 64], sizes = [8, 32], strides = [1, 1]} : vector<8x96xf32> to vector<8x32xf32>
    %502 = arith.mulf %500, %479 : vector<8x32xf32>
    %503 = arith.mulf %499, %498 : vector<8x32xf32>
    %504 = arith.addf %502, %503 : vector<8x32xf32>
    %505 = math.tanh %504 : vector<8x32xf32>
    %506 = arith.mulf %501, %505 : vector<8x32xf32>
    %c20_238 = arith.constant 20 : index
    %c0_239 = arith.constant 0 : index
    %507 = vector.load %arg13[%c20_238, %c0_239] : memref<32x256xf32, #tpu.memory_space<vmem>>, vector<4x128xf32>
    %c8_240 = arith.constant 8 : index
    %c128_241 = arith.constant 128 : index
    %508 = vector.load %arg13[%c8_240, %c128_241] : memref<32x256xf32, #tpu.memory_space<vmem>>, vector<4x128xf32>
    %509 = tpu.concatenate %507, %508 in 0 : vector<4x128xf32>, vector<4x128xf32> -> vector<8x128xf32>
    %510 = tpu.concatenate %506, %506 in 1 : vector<8x32xf32>, vector<8x32xf32> -> vector<8x64xf32>
    %cst_242 = arith.constant 0.000000e+00 : f32
    %511 = vector.broadcast %cst_242 : f32 to vector<8x64xf32>
    %512 = arith.select %140, %510, %511 : vector<8x64xi1>, vector<8x64xf32>
    %513 = arith.truncf %512 : vector<8x64xf32> to vector<8x64xbf16>
    %cst_243 = arith.constant dense<0.000000e+00> : vector<8x128xf32>
    %514 = tpu.matmul %513, %385, %cst_243 {dimension_numbers = #tpu.dot_dimension_numbers<[1], [0], [0], [1], [0, 0, 1, 1], [], []>} : vector<8x64xbf16>, vector<64x128xbf16>, vector<8x128xf32> -> vector<8x128xf32>
    %515 = arith.addf %509, %514 : vector<8x128xf32>
    %516 = vector.extract_strided_slice %515 {offsets = [0, 0], sizes = [8, 96], strides = [1, 1]} : vector<8x128xf32> to vector<8x96xf32>
    %517 = arith.negf %516 : vector<8x96xf32>
    %518 = math.exp %517 : vector<8x96xf32>
    %cst_244 = arith.constant 1.000000e+00 : f32
    %519 = vector.broadcast %cst_244 : f32 to vector<8x96xf32>
    %520 = arith.addf %519, %518 : vector<8x96xf32>
    %521 = arith.divf %519, %520 : vector<8x96xf32>
    %522 = vector.extract_strided_slice %515 {offsets = [0, 96], sizes = [8, 32], strides = [1, 1]} : vector<8x128xf32> to vector<8x32xf32>
    %523 = math.tanh %522 : vector<8x32xf32>
    %524 = vector.extract_strided_slice %521 {offsets = [0, 0], sizes = [8, 32], strides = [1, 1]} : vector<8x96xf32> to vector<8x32xf32>
    %525 = vector.extract_strided_slice %521 {offsets = [0, 32], sizes = [8, 32], strides = [1, 1]} : vector<8x96xf32> to vector<8x32xf32>
    %526 = vector.extract_strided_slice %521 {offsets = [0, 64], sizes = [8, 32], strides = [1, 1]} : vector<8x96xf32> to vector<8x32xf32>
    %527 = arith.mulf %525, %504 : vector<8x32xf32>
    %528 = arith.mulf %524, %523 : vector<8x32xf32>
    %529 = arith.addf %527, %528 : vector<8x32xf32>
    %530 = math.tanh %529 : vector<8x32xf32>
    %531 = arith.mulf %526, %530 : vector<8x32xf32>
    %c24_245 = arith.constant 24 : index
    %c0_246 = arith.constant 0 : index
    %532 = vector.load %arg13[%c24_245, %c0_246] : memref<32x256xf32, #tpu.memory_space<vmem>>, vector<4x128xf32>
    %c4_247 = arith.constant 4 : index
    %c128_248 = arith.constant 128 : index
    %533 = vector.load %arg13[%c4_247, %c128_248] : memref<32x256xf32, #tpu.memory_space<vmem>>, vector<4x128xf32>
    %534 = tpu.concatenate %532, %533 in 0 : vector<4x128xf32>, vector<4x128xf32> -> vector<8x128xf32>
    %535 = tpu.concatenate %531, %531 in 1 : vector<8x32xf32>, vector<8x32xf32> -> vector<8x64xf32>
    %cst_249 = arith.constant 0.000000e+00 : f32
    %536 = vector.broadcast %cst_249 : f32 to vector<8x64xf32>
    %537 = arith.select %140, %535, %536 : vector<8x64xi1>, vector<8x64xf32>
    %538 = arith.truncf %537 : vector<8x64xf32> to vector<8x64xbf16>
    %cst_250 = arith.constant dense<0.000000e+00> : vector<8x128xf32>
    %539 = tpu.matmul %538, %385, %cst_250 {dimension_numbers = #tpu.dot_dimension_numbers<[1], [0], [0], [1], [0, 0, 1, 1], [], []>} : vector<8x64xbf16>, vector<64x128xbf16>, vector<8x128xf32> -> vector<8x128xf32>
    %540 = arith.addf %534, %539 : vector<8x128xf32>
    %541 = vector.extract_strided_slice %540 {offsets = [0, 0], sizes = [8, 96], strides = [1, 1]} : vector<8x128xf32> to vector<8x96xf32>
    %542 = arith.negf %541 : vector<8x96xf32>
    %543 = math.exp %542 : vector<8x96xf32>
    %cst_251 = arith.constant 1.000000e+00 : f32
    %544 = vector.broadcast %cst_251 : f32 to vector<8x96xf32>
    %545 = arith.addf %544, %543 : vector<8x96xf32>
    %546 = arith.divf %544, %545 : vector<8x96xf32>
    %547 = vector.extract_strided_slice %540 {offsets = [0, 96], sizes = [8, 32], strides = [1, 1]} : vector<8x128xf32> to vector<8x32xf32>
    %548 = math.tanh %547 : vector<8x32xf32>
    %549 = vector.extract_strided_slice %546 {offsets = [0, 0], sizes = [8, 32], strides = [1, 1]} : vector<8x96xf32> to vector<8x32xf32>
    %550 = vector.extract_strided_slice %546 {offsets = [0, 32], sizes = [8, 32], strides = [1, 1]} : vector<8x96xf32> to vector<8x32xf32>
    %551 = vector.extract_strided_slice %546 {offsets = [0, 64], sizes = [8, 32], strides = [1, 1]} : vector<8x96xf32> to vector<8x32xf32>
    %552 = arith.mulf %550, %529 : vector<8x32xf32>
    %553 = arith.mulf %549, %548 : vector<8x32xf32>
    %554 = arith.addf %552, %553 : vector<8x32xf32>
    %555 = math.tanh %554 : vector<8x32xf32>
    %556 = arith.mulf %551, %555 : vector<8x32xf32>
    %c28_252 = arith.constant 28 : index
    %c0_253 = arith.constant 0 : index
    %557 = vector.load %arg13[%c28_252, %c0_253] : memref<32x256xf32, #tpu.memory_space<vmem>>, vector<4x128xf32>
    %c0_254 = arith.constant 0 : index
    %c128_255 = arith.constant 128 : index
    %558 = vector.load %arg13[%c0_254, %c128_255] : memref<32x256xf32, #tpu.memory_space<vmem>>, vector<4x128xf32>
    %559 = tpu.concatenate %557, %558 in 0 : vector<4x128xf32>, vector<4x128xf32> -> vector<8x128xf32>
    %560 = tpu.concatenate %556, %556 in 1 : vector<8x32xf32>, vector<8x32xf32> -> vector<8x64xf32>
    %cst_256 = arith.constant 0.000000e+00 : f32
    %561 = vector.broadcast %cst_256 : f32 to vector<8x64xf32>
    %562 = arith.select %140, %560, %561 : vector<8x64xi1>, vector<8x64xf32>
    %563 = arith.truncf %562 : vector<8x64xf32> to vector<8x64xbf16>
    %cst_257 = arith.constant dense<0.000000e+00> : vector<8x128xf32>
    %564 = tpu.matmul %563, %385, %cst_257 {dimension_numbers = #tpu.dot_dimension_numbers<[1], [0], [0], [1], [0, 0, 1, 1], [], []>} : vector<8x64xbf16>, vector<64x128xbf16>, vector<8x128xf32> -> vector<8x128xf32>
    %565 = arith.addf %559, %564 : vector<8x128xf32>
    %566 = vector.extract_strided_slice %565 {offsets = [0, 0], sizes = [8, 96], strides = [1, 1]} : vector<8x128xf32> to vector<8x96xf32>
    %567 = arith.negf %566 : vector<8x96xf32>
    %568 = math.exp %567 : vector<8x96xf32>
    %cst_258 = arith.constant 1.000000e+00 : f32
    %569 = vector.broadcast %cst_258 : f32 to vector<8x96xf32>
    %570 = arith.addf %569, %568 : vector<8x96xf32>
    %571 = arith.divf %569, %570 : vector<8x96xf32>
    %572 = vector.extract_strided_slice %565 {offsets = [0, 96], sizes = [8, 32], strides = [1, 1]} : vector<8x128xf32> to vector<8x32xf32>
    %573 = math.tanh %572 : vector<8x32xf32>
    %574 = vector.extract_strided_slice %571 {offsets = [0, 0], sizes = [8, 32], strides = [1, 1]} : vector<8x96xf32> to vector<8x32xf32>
    %575 = vector.extract_strided_slice %571 {offsets = [0, 32], sizes = [8, 32], strides = [1, 1]} : vector<8x96xf32> to vector<8x32xf32>
    %576 = vector.extract_strided_slice %571 {offsets = [0, 64], sizes = [8, 32], strides = [1, 1]} : vector<8x96xf32> to vector<8x32xf32>
    %577 = arith.mulf %575, %554 : vector<8x32xf32>
    %578 = arith.mulf %574, %573 : vector<8x32xf32>
    %579 = arith.addf %577, %578 : vector<8x32xf32>
    %580 = math.tanh %579 : vector<8x32xf32>
    %581 = arith.mulf %576, %580 : vector<8x32xf32>
    %582 = vector.extract_strided_slice %581 {offsets = [0, 0], sizes = [4, 32], strides = [1, 1]} : vector<8x32xf32> to vector<4x32xf32>
    %583 = tpu.concatenate %582, %406 in 1 : vector<4x32xf32>, vector<4x32xf32> -> vector<4x64xf32>
    %c0_259 = arith.constant 0 : index
    %c0_260 = arith.constant 0 : index
    %584 = vector.load %arg9[%c0_259, %c0_260] : memref<1x64xf32, #tpu.memory_space<vmem>>, vector<1x64xf32>
    %585 = vector.broadcast %584 : vector<1x64xf32> to vector<4x64xf32>
    %586 = arith.mulf %583, %585 : vector<4x64xf32>
    %cst_261 = arith.constant dense<0.000000e+00> : vector<4xf32>
    %587 = vector.multi_reduction <add>, %586, %cst_261 [1] : vector<4x64xf32> to vector<4xf32>
    %588 = vector.shape_cast %587 : vector<4xf32> to vector<4x1xf32>
    %c0_262 = arith.constant 0 : index
    %c0_263 = arith.constant 0 : index
    %589 = vector.load %arg10[%c0_262, %c0_263] : memref<1x1xf32, #tpu.memory_space<vmem>>, vector<1x1xf32>
    %590 = vector.broadcast %589 : vector<1x1xf32> to vector<4x1xf32>
    %591 = arith.addf %588, %590 : vector<4x1xf32>
    %592 = vector.extract_strided_slice %591 {offsets = [0, 0], sizes = [2, 1], strides = [1, 1]} : vector<4x1xf32> to vector<2x1xf32>
    %c0_264 = arith.constant 0 : index
    %c0_265 = arith.constant 0 : index
    %593 = vector.load %arg11[%c0_264, %c0_265] : memref<2x1xf32, #tpu.memory_space<vmem>>, vector<2x1xf32>
    tpu.vector_store %arg11[%c0_264, %c0_265], %592 {strides = array<i32>} : memref<2x1xf32, #tpu.memory_space<vmem>>, vector<2x1xf32>,
    return
  }
  func.func @transform_0(%arg0: i32, %arg1: memref<32xi32, #tpu.memory_space<smem>>) -> (i32, i32) {
    %c0_i32 = arith.constant 0 : i32
    %c0_i32_0 = arith.constant 0 : i32
    %c0_i32_1 = arith.constant 0 : i32
    return %c0_i32, %c0_i32_0 : i32, i32
  }
  func.func @transform_1(%arg0: i32, %arg1: memref<32xi32, #tpu.memory_space<smem>>) -> (i32, i32) {
    %c0_i32 = arith.constant 0 : i32
    %c0_i32_0 = arith.constant 0 : i32
    %c0_i32_1 = arith.constant 0 : i32
    return %c0_i32, %c0_i32_0 : i32, i32
  }
  func.func @transform_2(%arg0: i32, %arg1: memref<32xi32, #tpu.memory_space<smem>>) -> (i32, i32) {
    %c0_i32 = arith.constant 0 : i32
    %c0_i32_0 = arith.constant 0 : i32
    %c0_i32_1 = arith.constant 0 : i32
    return %c0_i32, %c0_i32_0 : i32, i32
  }
  func.func @transform_3(%arg0: i32, %arg1: memref<32xi32, #tpu.memory_space<smem>>) -> (i32, i32) {
    %c0_i32 = arith.constant 0 : i32
    %c0_i32_0 = arith.constant 0 : i32
    %c0_i32_1 = arith.constant 0 : i32
    return %c0_i32, %c0_i32_0 : i32, i32
  }
  func.func @transform_4(%arg0: i32, %arg1: memref<32xi32, #tpu.memory_space<smem>>) -> (i32, i32) {
    %c0_i32 = arith.constant 0 : i32
    %c0_i32_0 = arith.constant 0 : i32
    %c0_i32_1 = arith.constant 0 : i32
    return %c0_i32, %c0_i32_0 : i32, i32
  }
  func.func @transform_5(%arg0: i32, %arg1: memref<32xi32, #tpu.memory_space<smem>>) -> (i32, i32) {
    %c0_i32 = arith.constant 0 : i32
    %c0_i32_0 = arith.constant 0 : i32
    %c0_i32_1 = arith.constant 0 : i32
    return %c0_i32, %c0_i32_0 : i32, i32
  }
  func.func @transform_6(%arg0: i32, %arg1: memref<32xi32, #tpu.memory_space<smem>>) -> (i32, i32) {
    %c0_i32 = arith.constant 0 : i32
    %c0_i32_0 = arith.constant 0 : i32
    %c0_i32_1 = arith.constant 0 : i32
    return %c0_i32, %c0_i32_0 : i32, i32
  }
  func.func @transform_7(%arg0: i32, %arg1: memref<32xi32, #tpu.memory_space<smem>>) -> (i32, i32) {
    %c0_i32 = arith.constant 0 : i32
    %c0_i32_0 = arith.constant 0 : i32
    %c0_i32_1 = arith.constant 0 : i32
    return %c0_i32, %c0_i32_0 : i32, i32
  }
  func.func @transform_8(%arg0: i32, %arg1: memref<32xi32, #tpu.memory_space<smem>>) -> (i32, i32) {
    %c0_i32 = arith.constant 0 : i32
    %c0_i32_0 = arith.constant 0 : i32
    %c0_i32_1 = arith.constant 0 : i32
    return %c0_i32, %c0_i32_0 : i32, i32
  }
  func.func @transform_9(%arg0: i32, %arg1: memref<32xi32, #tpu.memory_space<smem>>) -> (i32, i32) {
    %c0_i32 = arith.constant 0 : i32
    %c0_i32_0 = arith.constant 0 : i32
    %c0_i32_1 = arith.constant 0 : i32
    return %c0_i32, %c0_i32_0 : i32, i32
  }
}

</mosaic_0001>

<bundles_post_ra>
// kernel: sentence_classifier_forward.1
= control target key start
LH: loop header
LB: loop body
LE: loop exit
PB: predicated region body
PF: predicated region fallthrough
CT: control target
= control target key end

     0   :  { %s3155_s0 = inlined_call_operand.vmem [shape: s32[32], index: 0, kind: input, shape index: {}]   ;;  %s3156_s1 = inlined_call_operand.hbm [shape: f32[50,128], index: 1, kind: input, shape index: {}]   ;;  %s3157_s2 = inlined_call_operand.hbm [shape: bf16[128,256], index: 2, kind: input, shape index: {}]   ;;  %s3158_s3 = inlined_call_operand.vmem [shape: bf16[64,128], index: 3, kind: input, shape index: {}]   ;;  %s3159_s4 = inlined_call_operand.vmem [shape: f32[1,256], index: 4, kind: input, shape index: {}]   ;;  %s3160_s5 = inlined_call_operand.hbm [shape: bf16[128,256], index: 5, kind: input, shape index: {}]   ;;  %s3161_s6 = inlined_call_operand.hbm [shape: bf16[64,128], index: 6, kind: input, shape index: {}]   ;;  %s3162_s7 = inlined_call_operand.vmem [shape: f32[1,256], index: 7, kind: input, shape index: {}]   ;;  %s3163_s8 = inlined_call_operand.vmem [shape: f32[1,64], index: 8, kind: input, shape index: {}]   ;;  %s3164_s10 = inlined_call_operand.vmem [shape: f32[2,1], index: 10, kind: output, shape index: {}]   ;;  %s3165_s9 = inlined_call_operand.<no memory space> [shape: f32[1,1], index: 9, kind: input, shape index: {}]  }
   0x1   :  { %s15_s15 = sshll.u32 %s3155_s0, 4  ;;  %v19_v0 = vstv %s3165_s9  ;;  %s16_s15 = int_to_ptr.vmem [resolvable:$true] %s15_s15 }
   0x2   :  { %20 = vst [vmem:[#allocation6] sm:$0x1] %v19_v0  ;;  %s2523_s18 = scalar_lea.vmem %s16_s15, 16  ;;  %p2528_p1 = scmp.lt.s32.totalorder %s16_s15, %s16_s15 }
   0x3   :  { %p2524_p0 = scmp.ne.s32.totalorder %s16_s15, %s2523_s18  ;;  %p2529_p2 = scmp.lt.s32.totalorder %s2523_s18, %s2523_s18 }
   0x5   :  { %p2530_p3 = por %p2529_p2, %p2528_p1 }
   0x7   :  { %p2531_p4 = pnand %p2530_p3, %p2524_p0 }
   0x9   :  { %2534 = shalt.err (!%p2531_p4)  }
   0xa   :  { %s2623_s19 = smov [#allocation5]  }
   0xb   :  { %18 = dma.vmem_to_smem %s16_s15, 16, %s2623_s19, [#allocation4] }
   0xc   :  { %2615 = dma.done.wait [#allocation4], 16 }
   0xd   :  { %2616 = vsyncadd [#allocation4], 4294967280 }
   0xe   :  { %22 = sfence }
   0xf   :  { %23 = vsyncpa [#allocation8], 0 }
  0x10   :  { %24 = vsyncpa [#allocation10], 0 }
  0x11   :  { %25 = vsyncpa [#allocation13], 0  ;;  %s2624_s0 = smov [#allocation9]   ;;  %s2625_s9 = smov [#allocation7]  }
  0x12   :  { %s43_s20 = sshll.u32 %s2624_s0, 4  ;;  %s31_s21 = sshll.u32 %s2625_s9, 4  ;;  %s44_s20 = int_to_ptr.vmem [resolvable:$true] %s43_s20  ;;  %s32_s21 = int_to_ptr.vmem [resolvable:$true] %s31_s21 }
  0x13   :  { %s2543_s22 = scalar_lea.vmem %s44_s20, 2048  ;;  %p2548_p6 = scmp.lt.s32.totalorder %s44_s20, %s44_s20 }
  0x14   :  { %p2544_p5 = scmp.ne.s32.totalorder %s44_s20, %s2543_s22  ;;  %p2549_p7 = scmp.lt.s32.totalorder %s2543_s22, %s2543_s22 }
  0x16   :  { %p2550_p8 = por %p2549_p7, %p2548_p6 }
  0x18   :  { %p2551_p9 = pnand %p2550_p8, %p2544_p5 }
  0x1a   :  { %2554 = shalt.err (!%p2551_p9)
}
  0x1b   :  { %s2626_s23 = smov 128   ;;  %s2627_s24 = smov 8  }
  0x1c   :  { %49 = dma.hbm_to_vmem [thread:$0]  %s3157_s2, 2048, %s44_s20, [#allocation10], %s2626_s23, %s2626_s23, %s2627_s24  }
  0x1d   :  { %s2563_s27 = scalar_lea.vmem %s32_s21, 896  ;;  %p2568_p11 = scmp.lt.s32.totalorder %s32_s21, %s32_s21 }
  0x1e   :  { %p2564_p10 = scmp.ne.s32.totalorder %s32_s21, %s2563_s27  ;;  %p2569_p12 = scmp.lt.s32.totalorder %s2563_s27, %s2563_s27 }
  0x20   :  { %p2570_p13 = por %p2569_p12, %p2568_p11 }
  0x22   :  { %p2571_p0 = pnand %p2570_p13, %p2564_p10 }
  0x24   :  { %2574 = shalt.err (!%p2571_p0)
}
  0x25   :  { %37 = dma.hbm_to_vmem [thread:$0]  %s3156_s1, 896, %s32_s21, [#allocation8], %s2626_s23, %s2626_s23, %s2627_s24  }
  0x26   :  { %s2628_s30 = smov [#allocation11]   ;;  %s2629_s12 = smov [#allocation12]  }
  0x27   :  { %s59_s11 = sshll.u32 %s2628_s30, 4  ;;  %s71_s13 = sshll.u32 %s2629_s12, 4  ;;  %s60_s11 = int_to_ptr.vmem [resolvable:$true] %s59_s11  ;;  %s72_s13 = int_to_ptr.vmem [resolvable:$true] %s71_s13 }
  0x28   :  { %s2583_s14 = scalar_lea.vmem %s60_s11, 2048  ;;  %p2588_p2 = scmp.lt.s32.totalorder %s60_s11, %s60_s11 }
  0x29   :  { %p2584_p1 = scmp.ne.s32.totalorder %s60_s11, %s2583_s14  ;;  %p2589_p3 = scmp.lt.s32.totalorder %s2583_s14, %s2583_s14 }
  0x2b   :  { %p2590_p4 = por %p2589_p3, %p2588_p2 }
  0x2d   :  { %p2591_p5 = pnand %p2590_p4, %p2584_p1 }
  0x2f   :  { %2594 = shalt.err (!%p2591_p5)
}
  0x30   :  { %65 = dma.hbm_to_vmem [thread:$0]  %s3160_s5, 2048, %s60_s11, [#allocation10], %s2626_s23, %s2626_s23, %s2627_s24  }
  0x31   :  { %s2603_s16 = scalar_lea.vmem %s72_s13, 512  ;;  %p2608_p7 = scmp.lt.s32.totalorder %s72_s13, %s72_s13 }
  0x32   :  { %p2604_p6 = scmp.ne.s32.totalorder %s72_s13, %s2603_s16  ;;  %p2609_p8 = scmp.lt.s32.totalorder %s2603_s16, %s2603_s16 }
  0x34   :  { %p2610_p9 = por %p2609_p8, %p2608_p7 }
  0x36   :  { %p2611_p10 = pnand %p2610_p9, %p2604_p6 }
  0x38   :  { %2614 = shalt.err (!%p2611_p10)
}
  0x39   :  { %s2630_s1 = smov 64   ;;  %s2631_s17 = smov 4  }
  0x3a   :  { %77 = dma.hbm_to_vmem [thread:$0]  %s3161_s6, 512, %s72_s13, [#allocation13], %s2630_s1, %s2630_s1, %s2631_s17  }
  0x3b   :  { %2617 = dma.done.wait [#allocation8], 896  }
  0x3c   :  { %2618 = vsyncadd [#allocation8], 4294966400 }
  0x3d   :  { %2619 = dma.done.wait [#allocation10], 4096  }
  0x3e   :  { %2620 = vsyncadd [#allocation10], 4294963200 }
  0x3f   :  { %2621 = dma.done.wait [#allocation13], 512  }
  0x40   :  { %2622 = vsyncadd [#allocation13], 4294966784  ;;  %v2632_v1 = vmov 0   ;;  %s97_s5 = sld [smem:[#allocation5]]  ;;  %v2339_v2 = vld [vmem:[#allocation9 + $0x74] ss:$8 sps:$4 sm:$0xff]   ;;  %v225_v56 = vlaneseq }
  0x41   :  { %382 = vmatprep.mubr.bf16.mxu0 %v2632_v1  ;;  %s1984_s0 = sld [smem:[#allocation5 + $0x1]]  ;;  %v2341_v3 = vld [vmem:[#allocation9 + $0x70] ss:$8 sps:$4 sm:$0xff]   ;;  %350 = vmatprep.subr.bf16.mxu0 %v2339_v2  ;;  %v2342_v4 = vld [vmem:[#allocation9 + $0x64] ss:$8 sps:$4 sm:$0xff]   ;;  %vm421_vm0 = vcmask 1043456  }
  0x42   :  { %s1985_s20 = sld [smem:[#allocation5 + $0x2]]  ;;  %351 = vmatpush1.bf16.msra.mxu0 %v2341_v3  ;;  %v2344_v5 = vld [vmem:[#allocation9 + $0x60] ss:$8 sps:$4 sm:$0xff]   ;;  %v2345_v6 = vld [vmem:[#allocation9 + $0x54] ss:$8 sps:$4 sm:$0xff]   ;;  %v2772_v57 = vshrl.u32 %v225_v56, 7 }
  0x43   :  { %s1986_s9 = sld [smem:[#allocation5 + $0x3]]  ;;  %352 = vmatprep.subr.bf16.mxu0 %v2342_v4  ;;  %v2347_v7 = vld [vmem:[#allocation9 + $0x50] ss:$8 sps:$4 sm:$0xff]   ;;  %v2348_v8 = vld [vmem:[#allocation9 + $0x44] ss:$8 sps:$4 sm:$0xff]   ;;  %vm2635_vm1 = vmmov 0  }
  0x44   :  { %s2713_s21 = sld [smem:[#allocation5 + $0x4]]  ;;  %v2350_v9 = vld [vmem:[#allocation9 + $0x40] ss:$8 sps:$4 sm:$0xff]   ;;  %v2351_v10 = vld [vmem:[#allocation9 + $0x34] ss:$8 sps:$4 sm:$0xff]   ;;  %v262_v58 = vsub.s32 0, %v2772_v57 }
  0x45   :  { %s2715_s22 = sld [smem:[#allocation5 + $0x5]]  ;;  %v2353_v17 = vld [vmem:[#allocation9 + $0x30] ss:$8 sps:$4 sm:$0xff]   ;;  %v2354_v18 = vld [vmem:[#allocation9 + $0x24] ss:$8 sps:$4 sm:$0xff]   ;;  %v266_v60 = vsub.s32 1, %v2772_v57 }
  0x46   :  { %353 = vmatpush1.bf16.msra.mxu0 %v2344_v5  ;;  %s2717_s6 = sld [smem:[#allocation5 + $0x6]]  ;;  %s98_s24 = scalar_lea.vmem [#allocation7], %s97_s5  ;;  %v2356_v21 = vld [vmem:[#allocation9 + $0x20] ss:$8 sps:$4 sm:$0xff]   ;;  %v2357_v22 = vld [vmem:[#allocation9 + $0x14] ss:$8 sps:$4 sm:$0xff]  }
  0x47   :  { %354 = vmatprep.subr.bf16.mxu0 %v2345_v6  ;;  %s2719_s23 = sld [smem:[#allocation5 + $0x7]]  ;;  %v99_v11 = vld [vmem:[%s98_s24] sm:$0x1]  ;;  %s102_s25 = scalar_lea.vmem [#allocation7], %s1984_s0  ;;  %v2359_v25 = vld [vmem:[#allocation9 + $0x10] ss:$8 sps:$4 sm:$0xff]  }
  0x48   :  { %100 = vst [vmem:[#allocation2] sm:$0x1] %v99_v11  ;;  %v103_v12 = vld [vmem:[%s102_s25] sm:$0x1]  ;;  %s106_s26 = scalar_lea.vmem [#allocation7], %s1985_s20  ;;  %s1991_s30 = sld [smem:[#allocation5 + $0x8]] }
  0x49   :  { %v107_v13 = vld [vmem:[%s106_s26] sm:$0x1]  ;;  %s110_s27 = scalar_lea.vmem [#allocation7], %s1986_s9  ;;  %104 = vst [vmem:[#allocation2 + $0x1] sm:$0x1] %v103_v12  ;;  %s1992_s11 = sld [smem:[#allocation5 + $0x9]] }
  0x4a   :  { %355 = vmatpush1.bf16.msra.mxu0 %v2347_v7  ;;  %v111_v14 = vld [vmem:[%s110_s27] sm:$0x1]  ;;  %108 = vst [vmem:[#allocation2 + $0x2] sm:$0x1] %v107_v13  ;;  %s114_s28 = scalar_lea.vmem [#allocation7], %s2713_s21  ;;  %s1993_s12 = sld [smem:[#allocation5 + $0xa]] }
  0x4b   :  { %356 = vmatprep.subr.bf16.mxu0 %v2348_v8  ;;  %112 = vst [vmem:[#allocation2 + $0x3] sm:$0x1] %v111_v14  ;;  %v115_v15 = vld [vmem:[%s114_s28] sm:$0x1]  ;;  %s118_s29 = scalar_lea.vmem [#allocation7], %s2715_s22  ;;  %s1994_s14 = sld [smem:[#allocation5 + $0xb]] }
  0x4c   :  { %v119_v16 = vld [vmem:[%s118_s29] sm:$0x1]  ;;  %116 = vst [vmem:[#allocation2 + $0x4] sm:$0x1] %v115_v15  ;;  %s122_s13 = scalar_lea.vmem [#allocation7], %s2717_s6  ;;  %s1995_s15 = sld [smem:[#allocation5 + $0xc]] }
  0x4d   :  { %120 = vst [vmem:[#allocation2 + $0x5] sm:$0x1] %v119_v16  ;;  %v123_v19 = vld [vmem:[%s122_s13] sm:$0x1]  ;;  %s126_s2 = scalar_lea.vmem [#allocation7], %s2719_s23  ;;  %s2725_s16 = sld [smem:[#allocation5 + $0xd]] }
  0x4e   :  { %357 = vmatpush1.bf16.msra.mxu0 %v2350_v9  ;;  %124 = vst [vmem:[#allocation2 + $0x6] sm:$0x1] %v123_v19  ;;  %v127_v20 = vld [vmem:[%s126_s2] sm:$0x1]  ;;  %s2727_s17 = sld [smem:[#allocation5 + $0xe]]  ;;  %s130_s18 = scalar_lea.vmem [#allocation7], %s1991_s30 }
  0x4f   :  { %358 = vmatprep.subr.bf16.mxu0 %v2351_v10  ;;  %128 = vst [vmem:[#allocation2 + $0x7] sm:$0x1] %v127_v20  ;;  %v131_v23 = vld [vmem:[%s130_s18] sm:$0x1]  ;;  %s2729_s19 = sld [smem:[#allocation5 + $0xf]]  ;;  %s134_s5 = scalar_lea.vmem [#allocation7], %s1992_s11 }
  0x50   :  { %132 = vst [vmem:[#allocation2 + $0x8] sm:$0x1] %v131_v23  ;;  %v135_v24 = vld [vmem:[%s134_s5] sm:$0x1]  ;;  %s2731_s0 = sld [smem:[#allocation5 + $0x10]]  ;;  %s138_s20 = scalar_lea.vmem [#allocation7], %s1993_s12 }
  0x51   :  { %136 = vst [vmem:[#allocation2 + $0x9] sm:$0x1] %v135_v24  ;;  %v139_v26 = vld [vmem:[%s138_s20] sm:$0x1]  ;;  %s2733_s9 = sld [smem:[#allocation5 + $0x11]]  ;;  %s142_s21 = scalar_lea.vmem [#allocation7], %s1994_s14 }
  0x52   :  { %359 = vmatpush1.bf16.msra.mxu0 %v2353_v17  ;;  %v2360_v27 = vld [vmem:[#allocation9 + $0x4] ss:$8 sps:$4 sm:$0xff]   ;;  %140 = vst [vmem:[#allocation2 + $0xa] sm:$0x1] %v139_v26  ;;  %s2735_s22 = sld [smem:[#allocation5 + $0x12]]  ;;  %s146_s6 = scalar_lea.vmem [#allocation7], %s1995_s15 }
  0x53   :  { %360 = vmatprep.subr.bf16.mxu0 %v2354_v18  ;;  %v143_v28 = vld [vmem:[%s142_s21] sm:$0x1]  ;;  %s2737_s23 = sld [smem:[#allocation5 + $0x13]]  ;;  %s150_s24 = scalar_lea.vmem [#allocation7], %s2725_s16  ;;  %v2362_v31 = vld [vmem:[#allocation9] ss:$8 sps:$4 sm:$0xff]  }
  0x54   :  { %144 = vst [vmem:[#allocation2 + $0xb] sm:$0x1] %v143_v28  ;;  %v147_v29 = vld [vmem:[%s146_s6] sm:$0x1]  ;;  %s2740_s25 = sld [smem:[#allocation5 + $0x14]]  ;;  %s154_s26 = scalar_lea.vmem [#allocation7], %s2727_s17 }
  0x55   :  { %148 = vst [vmem:[#allocation2 + $0xc] sm:$0x1] %v147_v29  ;;  %v151_v30 = vld [vmem:[%s150_s24] sm:$0x1]  ;;  %s2743_s27 = sld [smem:[#allocation5 + $0x15]]  ;;  %s158_s28 = scalar_lea.vmem [#allocation7], %s2729_s19 }
  0x56   :  { %361 = vmatpush1.bf16.msra.mxu0 %v2356_v21  ;;  %152 = vst [vmem:[#allocation2 + $0xd] sm:$0x1] %v151_v30  ;;  %v155_v32 = vld [vmem:[%s154_s26] sm:$0x1]  ;;  %s2746_s29 = sld [smem:[#allocation5 + $0x16]]  ;;  %s162_s30 = scalar_lea.vmem [#allocation7], %s2731_s0 }
  0x57   :  { %362 = vmatprep.subr.bf16.mxu0 %v2357_v22  ;;  %156 = vst [vmem:[#allocation2 + $0xe] sm:$0x1] %v155_v32  ;;  %v159_v33 = vld [vmem:[%s158_s28] sm:$0x1]  ;;  %s2749_s11 = sld [smem:[#allocation5 + $0x17]]  ;;  %s166_s12 = scalar_lea.vmem [#allocation7], %s2733_s9 }
  0x58   :  { %160 = vst [vmem:[#allocation2 + $0xf] sm:$0x1] %v159_v33  ;;  %v163_v34 = vld [vmem:[%s162_s30] sm:$0x1]  ;;  %s2752_s13 = sld [smem:[#allocation5 + $0x18]]  ;;  %s170_s14 = scalar_lea.vmem [#allocation7], %s2735_s22 }
  0x59   :  { %164 = vst [vmem:[#allocation2 + $0x10] sm:$0x1] %v163_v34  ;;  %v167_v35 = vld [vmem:[%s166_s12] sm:$0x1]  ;;  %s2755_s2 = sld [smem:[#allocation5 + $0x19]]  ;;  %s174_s15 = scalar_lea.vmem [#allocation7], %s2737_s23 }
  0x5a   :  { %363 = vmatpush1.bf16.msra.mxu0 %v2359_v25  ;;  %168 = vst [vmem:[#allocation2 + $0x11] sm:$0x1] %v167_v35  ;;  %v171_v36 = vld [vmem:[%s170_s14] sm:$0x1]  ;;  %s2758_s16 = sld [smem:[#allocation5 + $0x1a]]  ;;  %s178_s17 = scalar_lea.vmem [#allocation7], %s2740_s25 }
  0x5b   :  { %364 = vmatprep.subr.bf16.mxu0 %v2360_v27  ;;  %v236_v37 = vld [vmem:[#allocation2] sm:$0xff]  ;;  %172 = vst [vmem:[#allocation2 + $0x12] sm:$0x1] %v171_v36  ;;  %s2761_s18 = sld [smem:[#allocation5 + $0x1b]]  ;;  %s182_s19 = scalar_lea.vmem [#allocation7], %s2743_s27  ;;  %v2792_v29 = vld [vmem:[%s3158_s3 + $0x18] sm:$0xff]  }
  0x5c   :  { %v175_v38 = vld [vmem:[%s174_s15] sm:$0x1]  ;;  %s2011_s5 = sld [smem:[#allocation5 + $0x1c]]  ;;  %s186_s0 = scalar_lea.vmem [#allocation7], %s2746_s29  ;;  %v2634_v30 = vmov 0.0   ;;  %v2809_v32 = vld [vmem:[%s3158_s3 + $0x8] sm:$0xff]  }
  0x5d   :  { %176 = vst [vmem:[#allocation2 + $0x13] sm:$0x1] %v175_v38  ;;  %v179_v39 = vld [vmem:[%s178_s17] sm:$0x1]  ;;  %s2012_s20 = sld [smem:[#allocation5 + $0x1d]]  ;;  %s190_s9 = scalar_lea.vmem [#allocation7], %s2749_s11  ;;  %2157 = vmatprep.subr.bf16.mxu1 %v2634_v30  ;;  %2165 = vmatprep.mubr.msk.bf16.mxu1 %vm2635_vm1, %v2634_v30 }
  0x5e   :  { %365 = vmatpush1.bf16.msra.mxu0 %v2362_v31  ;;  %180 = vst [vmem:[#allocation2 + $0x14] sm:$0x1] %v179_v39  ;;  %v183_v40 = vld [vmem:[%s182_s19] sm:$0x1]  ;;  %s2013_s21 = sld [smem:[#allocation5 + $0x1e]]  ;;  %s194_s22 = scalar_lea.vmem [#allocation7], %s2752_s13  ;;  %2158 = vmatpush3.bf16.msra.mxu1 %v2792_v29 }
  0x5f   :  { %184 = vst [vmem:[#allocation2 + $0x15] sm:$0x1] %v183_v40  ;;  %v187_v41 = vld [vmem:[%s186_s0] sm:$0x1]  ;;  %v237_v42 = vld [vmem:[#allocation2 + $0x8] sm:$0xff]  ;;  %s2014_s6 = sld [smem:[#allocation5 + $0x1f]]  ;;  %2181 = vmatprep.subr.bf16.mxu0 %v2634_v30  ;;  %2159 = vmatprep.subr.bf16.mxu1 %v2634_v30 }
  0x60   :  { %188 = vst [vmem:[#allocation2 + $0x16] sm:$0x1] %v187_v41  ;;  %v191_v43 = vld [vmem:[%s190_s9] sm:$0x1]  ;;  %v240_v44 = vpack.c.bf16 %v237_v42, %v236_v37  ;;  %s198_s23 = scalar_lea.vmem [#allocation7], %s2755_s2  ;;  %s202_s24 = scalar_lea.vmem [#allocation7], %s2758_s16 }
  0x61   :  { %192 = vst [vmem:[#allocation2 + $0x17] sm:$0x1] %v191_v43  ;;  %v195_v45 = vld [vmem:[%s194_s22] sm:$0x1]  ;;  %s206_s25 = scalar_lea.vmem [#allocation7], %s2761_s18  ;;  %v2800_v31 = vld [vmem:[%s3158_s3 + $0x10] sm:$0xff]  }
  0x62   :  { %196 = vst [vmem:[#allocation2 + $0x18] sm:$0x1] %v195_v45  ;;  %v199_v46 = vld [vmem:[%s198_s23] sm:$0x1]  ;;  %383 = vmatmul.mubr.bf16.vlgmr.msra.gmra.mxu0 %v240_v44  ;;  %s210_s26 = scalar_lea.vmem [#allocation7], %s2011_s5  ;;  %2160 = vmatpush3.bf16.msra.mxu1 %v2800_v31  ;;  %s2636_s19 = smov 96  }
  0x63   :  { %200 = vst [vmem:[#allocation2 + $0x19] sm:$0x1] %v199_v46  ;;  %v203_v47 = vld [vmem:[%s202_s24] sm:$0x1]  ;;  %392 = vmatprep.mubr.bf16.mxu0 %v2632_v1  ;;  %s214_s27 = scalar_lea.vmem [#allocation7], %s2012_s20  ;;  %2182 = vmatpush3.bf16.msra.mxu0 %v2792_v29  ;;  %v228_v37 = vand.u32 127, %v225_v56 }
  0x64   :  { %204 = vst [vmem:[#allocation2 + $0x1a] sm:$0x1] %v203_v47  ;;  %v207_v48 = vld [vmem:[%s206_s25] sm:$0x1]  ;;  %s218_s28 = scalar_lea.vmem [#allocation7], %s2013_s21  ;;  %2183 = vmatprep.subr.bf16.mxu0 %v2634_v30  ;;  %2161 = vmatprep.subr.bf16.mxu1 %v2634_v30  ;;  %vm229_vm2 = vcmp.lt.s32.totalorder %v2772_v57, 4 }
  0x65   :  { %208 = vst [vmem:[#allocation2 + $0x1b] sm:$0x1] %v207_v48  ;;  %v211_v49 = vld [vmem:[%s210_s26] sm:$0x1]  ;;  %s222_s29 = scalar_lea.vmem [#allocation7], %s2014_s6  ;;  %vm230_vm3 = vcmp.lt.s32.totalorder %v228_v37, 32 }
  0x66   :  { %212 = vst [vmem:[#allocation2 + $0x1c] sm:$0x1] %v211_v49  ;;  %v215_v50 = vld [vmem:[%s214_s27] sm:$0x1]  ;;  %2162 = vmatpush3.bf16.msra.mxu1 %v2809_v32  ;;  %vm232_vm4 = vcmp.ge.s32.totalorder %v2772_v57, 4  ;;  %vm233_vm5 = vcmp.ge.s32.totalorder %v228_v37, 32  ;;  %vm231_vm6 = vmand %vm229_vm2, %vm230_vm3 }
  0x67   :  { %216 = vst [vmem:[#allocation2 + $0x1d] sm:$0x1] %v215_v50  ;;  %v219_v51 = vld [vmem:[%s218_s28] sm:$0x1]  ;;  %2184 = vmatpush3.bf16.msra.mxu0 %v2800_v31  ;;  %2163 = vmatprep.subr.bf16.mxu1 %v2634_v30  ;;  %vm234_vm7 = vmand %vm232_vm4, %vm233_vm5  ;;  %vm467_vm8 = vcmask 261120   ;;  %vm451_vm9 = vcmask 257024  }
  0x68   :  { %220 = vst [vmem:[#allocation2 + $0x1e] sm:$0x1] %v219_v51  ;;  %v223_v52 = vld [vmem:[%s222_s29] sm:$0x1]  ;;  %v238_v53 = vld [vmem:[#allocation2 + $0x10] sm:$0xff]  ;;  %2185 = vmatprep.subr.bf16.mxu0 %v2634_v30  ;;  %vm456_vm10 = vcmask 523524   ;;  %vm2837_vm11 = vmor %vm231_vm6, %vm234_vm7 }
  0x69   :  { %224 = vst [vmem:[#allocation2 + $0x1f] sm:$0x1] %v223_v52  ;;  %v258_v59 = vld [vmem:[%s3159_s4] sm:$0x3]  ;;  %s2633_s4 = smov 32   ;;  %vm495_vm12 = vcmask 523264  }
  0x6a   :  { %v263_v61 = vrot.slane %v258_v59, %v262_v58  ;;  %v267_v62 = vrot.slane %v258_v59, %v266_v60  ;;  %v2822_v34 = vld [vmem:[%s3158_s3] sm:$0xff]   ;;  %vm1931_vm13 = vcmask 519168   ;;  %vm1943_vm14 = vcmask 1024  }
  0x6b   :  { %2186 = vmatpush3.bf16.msra.mxu0 %v2809_v32  ;;  %2164 = vmatpush3.bf16.msra.mxu1 %v2822_v34 }
  0x6c   :  { %2187 = vmatprep.subr.bf16.mxu0 %v2634_v30  ;;  %2169 = vmatprep.subr.bf16.mxu1 %v2634_v30 }
  0x6f   :  { %2188 = vmatpush3.bf16.msra.mxu0 %v2822_v34 }
  0x70   :  { %v239_v54 = vld [vmem:[#allocation2 + $0x18] sm:$0xff]  ;;  %2205 = vmatprep.subr.bf16.mxu0 %v2634_v30 }
  0x71   :  { %v241_v55 = vpack.c.bf16 %v239_v54, %v238_v53 }
  0x73   :  { %393 = vmatmul.mubr.bf16.gmra.mxu0 %v241_v55 }
  0x74   :  { %2189 = vmatprep.mubr.msk.bf16.mxu0 %vm2635_vm1, %v2634_v30 }
 0x122   :  { %v384_v63 = vpop.f32.mrf.mxu0 }
 0x123   :  { %v385_v0 = vadd.f32 %v384_v63, %v263_v61 }
 0x124   :  { %v386_v2 = vpop.f32.mrf.mxu0 }
 0x125   :  { %403 = vst [vmem:[#allocation3 + $0x30] sm:$0xff] %v385_v0  ;;  %v387_v3 = vadd.f32 %v386_v2, %v267_v62 }
 0x126   :  { %v388_v4 = vpop.f32.mrf.mxu0 }
 0x127   :  { %404 = vst [vmem:[#allocation3] sm:$0xff] %v387_v3  ;;  %v389_v5 = vadd.f32 %v388_v4, %v263_v61 }
 0x128   :  { %v390_v6 = vpop.f32.mrf.mxu0 }
 0x129   :  { %405 = vst [vmem:[#allocation3 + $0x18] sm:$0xff] %v389_v5  ;;  %v391_v7 = vadd.f32 %v390_v6, %v267_v62 }
 0x12b   :  { %406 = vst [vmem:[#allocation3 + $0x10] sm:$0xff] %v391_v7 }
 0x12c   :  { %v419_v16 = vld [vmem:[#allocation3 + $0x30] sm:$0xf]  ;;  %v458_v45 = vld [vmem:[#allocation3 + $0x30] sm:$0xf0] }
 0x12d   :  { %v461_v47 = vrot.slane %v458_v45, 4 }
 0x130   :  { %v656_v45 = vld [vmem:[#allocation3 + $0x18] sm:$0xf0] }
 0x133   :  { %v394_v8 = vpop.f32.mrf.mxu0 }
 0x134   :  { %v395_v9 = vadd.f32 %v394_v8, %v263_v61 }
 0x135   :  { %v396_v10 = vpop.f32.mrf.mxu0 }
 0x136   :  { %407 = vst [vmem:[#allocation3 + $0x8] sm:$0xff] %v395_v9  ;;  %v397_v11 = vadd.f32 %v396_v10, %v267_v62 }
 0x137   :  { %v398_v12 = vpop.f32.mrf.mxu0 }
 0x138   :  { %408 = vst [vmem:[#allocation3 + $0x20] sm:$0xff] %v397_v11  ;;  %v399_v13 = vadd.f32 %v398_v12, %v263_v61 }
 0x139   :  { %v400_v14 = vpop.f32.mrf.mxu0 }
 0x13a   :  { %409 = vst [vmem:[#allocation3 + $0x28] sm:$0xff] %v399_v13  ;;  %v401_v15 = vadd.f32 %v400_v14, %v267_v62  ;;  %v573_v13 = vld [vmem:[#allocation3 + $0x18] sm:$0xf] }
 0x13c   :  { %410 = vst [vmem:[#allocation3 + $0x38] sm:$0xff] %v401_v15 }
 0x13f   :  { %v574_v12 = vld [vmem:[#allocation3 + $0x20] sm:$0xf0] }
 0x140   :  { %v575_v14 = vsel %vm421_vm0, %v573_v13, %v574_v12  ;;  %v745_v12 = vld [vmem:[#allocation3 + $0x8] sm:$0xf]  ;;  %v746_v13 = vld [vmem:[#allocation3 + $0x10] sm:$0xf0] }
 0x143   :  { %v420_v17 = vld [vmem:[#allocation3 + $0x38] sm:$0xf0]  ;;  %v459_v44 = vld [vmem:[#allocation3 + $0x38] sm:$0xf] }
 0x144   :  { %v422_v18 = vsel %vm421_vm0, %v419_v16, %v420_v17  ;;  %v464_v46 = vrot.slane %v459_v44, 4  ;;  %v657_v44 = vld [vmem:[#allocation3 + $0x20] sm:$0xf] }
 0x145   :  { %2395 = vtanh.f32 %v422_v18  ;;  %v2031_v20 = vmul.f32 -1.442695, %v422_v18 }
 0x146   :  { %v466_v48 = vsel %vm421_vm0, %v461_v47, %v464_v46  ;;  %v662_v46 = vrot.slane %v657_v44, 4  ;;  %v659_v47 = vrot.slane %v656_v45, 4  ;;  %v828_v44 = vld [vmem:[#allocation3 + $0x8] sm:$0xf0]  ;;  %v829_v45 = vld [vmem:[#allocation3 + $0x10] sm:$0xf] }
 0x147   :  { %2397 = vpow2.f32 %v2031_v20 }
 0x152   :  { %v2396_v19 = vpop.eup %2395 }
 0x153   :  { %432 = vrot.lane.b32.xlu0 %v2396_v19, %s2633_s4 }
 0x154   :  { %v2398_v21 = vpop.eup %2397 }
 0x155   :  { %v426_v22 = vadd.f32 1.0, %v2398_v21 }
 0x157   :  { %2399 = vrcp.f32 %v426_v22 }
 0x164   :  { %v2400_v23 = vpop.eup %2399 }
 0x165   :  { %v430_v26 = vmul.f32 0.0, %v2400_v23 }
 0x1c5   :  { %v433_v24 = vpop.permute.xlu0 %432 }
 0x1c6   :  { %v435_v25 = vmul.f32 %v2400_v23, %v433_v24 }
 0x1c8   :  { %437 = vrot.lane.b32.xlu0 %v435_v25, %s2633_s4 }
 0x23a   :  { %v438_v27 = vpop.permute.xlu0 %437 }
 0x23b   :  { %v2786_v28 = vadd.f32 %v438_v27, %v430_v26 }
 0x23d   :  { %2401 = vtanh.f32 %v2786_v28 }
 0x24a   :  { %v2402_v33 = vpop.eup %2401 }
 0x24b   :  { %443 = vrot.lane.b32.xlu1 %v2402_v33, %s2633_s4 }
 0x2bd   :  { %v444_v35 = vpop.permute.xlu1 %443 }
 0x2be   :  { %v446_v36 = vmul.f32 %v2400_v23, %v444_v35 }
 0x2c0   :  { %453 = vrot.lane.b32.xlu0 %v446_v36, %s2636_s19  ;;  %448 = vrot.lane.b32.xlu1 %v446_v36, %s2630_s1 }
 0x332   :  { %v454_v39 = vpop.permute.xlu0 %453  ;;  %v449_v40 = vpop.permute.xlu1 %448 }
 0x333   :  { %v468_v41 = vsel %vm467_vm8, %v449_v40, %v454_v39  ;;  %452 = vst.msk [vmem:[#allocation2] sm:$0xf] %vm451_vm9, %v449_v40 }
 0x334   :  { %457 = vst.msk [vmem:[#allocation2 + $0x18] sm:$0xf0] %vm456_vm10, %v454_v39  ;;  %v469_v42 = vsel %vm2837_vm11, %v468_v41, 0.0 }
 0x335   :  { %v470_v43 = vpack.c.bf16 %v469_v42, %v469_v42 }
 0x337   :  { %2166 = vmatmul.mubr.msk.bf16.vlgmr.msra.gmra.mxu1 %vm495_vm12, %v470_v43 }
 0x338   :  { %2170 = vmatpush3.bf16.msra.mxu1 %v2792_v29  ;;  %2177 = vmatprep.mubr.msk.bf16.mxu1 %vm2635_vm1, %v2634_v30 }
 0x339   :  { %2171 = vmatprep.subr.bf16.mxu1 %v2634_v30 }
 0x33c   :  { %2172 = vmatpush3.bf16.msra.mxu1 %v2800_v31 }
 0x33d   :  { %2173 = vmatprep.subr.bf16.mxu1 %v2634_v30 }
 0x340   :  { %2174 = vmatpush3.bf16.msra.mxu1 %v2809_v32 }
 0x341   :  { %2175 = vmatprep.subr.bf16.mxu1 %v2634_v30 }
 0x344   :  { %2176 = vmatpush3.bf16.msra.mxu1 %v2822_v34 }
 0x345   :  { %2193 = vmatprep.subr.bf16.mxu1 %v2634_v30 }
 0x3f7   :  { %v533_v49 = vpop.f32.mrf.mxu1 }
 0x3f8   :  { %v539_v50 = vadd.f32 %v533_v49, %v466_v48  ;;  %v664_v48 = vsel %vm421_vm0, %v659_v47, %v662_v46  ;;  %v834_v46 = vrot.slane %v829_v45, 4 }
 0x3f9   :  { %v2167_v51 = vpop.f32.mrf.mxu1 }
 0x3fa   :  { %2403 = vtanh.f32 %v539_v50  ;;  %v2037_v55 = vmul.f32 -1.442695, %v539_v50 }
 0x3fb   :  { %v536_v52 = vpop.f32.mrf.mxu1 }
 0x3fc   :  { %2405 = vpow2.f32 %v2037_v55 }
 0x3fd   :  { %v2168_v53 = vpop.f32.mrf.mxu1 }
 0x407   :  { %v2404_v54 = vpop.eup %2403 }
 0x408   :  { %549 = vrot.lane.b32.xlu1 %v2404_v54, %s2633_s4 }
 0x409   :  { %v2406_v56 = vpop.eup %2405 }
 0x40a   :  { %v543_v59 = vadd.f32 1.0, %v2406_v56 }
 0x40c   :  { %2407 = vrcp.f32 %v543_v59 }
 0x419   :  { %v2408_v61 = vpop.eup %2407 }
 0x41a   :  { %v547_v0 = vmul.f32 %v2408_v61, %v2786_v28 }
 0x47a   :  { %v550_v62 = vpop.permute.xlu1 %549 }
 0x47b   :  { %v552_v63 = vmul.f32 %v2408_v61, %v550_v62 }
 0x47d   :  { %554 = vrot.lane.b32.xlu0 %v552_v63, %s2633_s4 }
 0x4ef   :  { %v555_v2 = vpop.permute.xlu0 %554 }
 0x4f0   :  { %v557_v3 = vadd.f32 %v555_v2, %v547_v0 }
 0x4f2   :  { %2409 = vtanh.f32 %v557_v3 }
 0x4ff   :  { %v2410_v4 = vpop.eup %2409 }
 0x500   :  { %560 = vrot.lane.b32.xlu1 %v2410_v4, %s2633_s4 }
 0x572   :  { %v561_v5 = vpop.permute.xlu1 %560 }
 0x573   :  { %v563_v6 = vmul.f32 %v2408_v61, %v561_v5 }
 0x575   :  { %569 = vrot.lane.b32.xlu1 %v563_v6, %s2636_s19  ;;  %565 = vrot.lane.b32.xlu0 %v563_v6, %s2630_s1 }
 0x5e7   :  { %v570_v7 = vpop.permute.xlu1 %569  ;;  %v566_v8 = vpop.permute.xlu0 %565 }
 0x5e8   :  { %v576_v9 = vsel %vm467_vm8, %v566_v8, %v570_v7  ;;  %568 = vst.msk [vmem:[#allocation2 + $0x4] sm:$0xf] %vm451_vm9, %v566_v8 }
 0x5e9   :  { %572 = vst.msk [vmem:[#allocation2 + $0x14] sm:$0xf0] %vm456_vm10, %v570_v7  ;;  %v577_v10 = vsel %vm2837_vm11, %v576_v9, 0.0 }
 0x5ea   :  { %v578_v11 = vpack.c.bf16 %v577_v10, %v577_v10 }
 0x5ec   :  { %2178 = vmatmul.mubr.msk.bf16.vlgmr.msra.gmra.mxu1 %vm495_vm12, %v578_v11 }
 0x5ed   :  { %2194 = vmatpush3.bf16.msra.mxu1 %v2792_v29  ;;  %2201 = vmatprep.mubr.msk.bf16.mxu1 %vm2635_vm1, %v2634_v30 }
 0x5ee   :  { %2195 = vmatprep.subr.bf16.mxu1 %v2634_v30 }
 0x5f1   :  { %2196 = vmatpush3.bf16.msra.mxu1 %v2800_v31 }
 0x5f2   :  { %2197 = vmatprep.subr.bf16.mxu1 %v2634_v30 }
 0x5f5   :  { %2198 = vmatpush3.bf16.msra.mxu1 %v2809_v32 }
 0x5f6   :  { %2199 = vmatprep.subr.bf16.mxu1 %v2634_v30 }
 0x5f9   :  { %2200 = vmatpush3.bf16.msra.mxu1 %v2822_v34 }
 0x5fa   :  { %2217 = vmatprep.subr.bf16.mxu1 %v2634_v30 }
 0x6ac   :  { %v616_v15 = vpop.f32.mrf.mxu1 }
 0x6ad   :  { %v622_v16 = vadd.f32 %v616_v15, %v575_v14  ;;  %v747_v14 = vsel %vm421_vm0, %v745_v12, %v746_v13 }
 0x6ae   :  { %v2179_v17 = vpop.f32.mrf.mxu1 }
 0x6af   :  { %2411 = vtanh.f32 %v622_v16  ;;  %v2039_v21 = vmul.f32 -1.442695, %v622_v16 }
 0x6b0   :  { %v619_v18 = vpop.f32.mrf.mxu1 }
 0x6b1   :  { %2413 = vpow2.f32 %v2039_v21 }
 0x6b2   :  { %v2180_v19 = vpop.f32.mrf.mxu1 }
 0x6bc   :  { %v2412_v20 = vpop.eup %2411 }
 0x6bd   :  { %632 = vrot.lane.b32.xlu0 %v2412_v20, %s2633_s4 }
 0x6be   :  { %v2414_v22 = vpop.eup %2413 }
 0x6bf   :  { %v626_v23 = vadd.f32 1.0, %v2414_v22 }
 0x6c1   :  { %2415 = vrcp.f32 %v626_v23 }
 0x6ce   :  { %v2416_v24 = vpop.eup %2415 }
 0x6cf   :  { %v630_v27 = vmul.f32 %v2416_v24, %v557_v3 }
 0x72f   :  { %v633_v25 = vpop.permute.xlu0 %632 }
 0x730   :  { %v635_v26 = vmul.f32 %v2416_v24, %v633_v25 }
 0x732   :  { %637 = vrot.lane.b32.xlu1 %v635_v26, %s2633_s4 }
 0x7a4   :  { %v638_v28 = vpop.permute.xlu1 %637 }
 0x7a5   :  { %v640_v33 = vadd.f32 %v638_v28, %v630_v27 }
 0x7a7   :  { %2417 = vtanh.f32 %v640_v33 }
 0x7b4   :  { %v2418_v35 = vpop.eup %2417 }
 0x7b5   :  { %643 = vrot.lane.b32.xlu0 %v2418_v35, %s2633_s4 }
 0x827   :  { %v644_v36 = vpop.permute.xlu0 %643 }
 0x828   :  { %v646_v37 = vmul.f32 %v2416_v24, %v644_v36 }
 0x82a   :  { %652 = vrot.lane.b32.xlu0 %v646_v37, %s2636_s19  ;;  %648 = vrot.lane.b32.xlu1 %v646_v37, %s2630_s1 }
 0x89c   :  { %v653_v39 = vpop.permute.xlu0 %652  ;;  %v649_v40 = vpop.permute.xlu1 %648 }
 0x89d   :  { %v665_v41 = vsel %vm467_vm8, %v649_v40, %v653_v39  ;;  %651 = vst.msk [vmem:[#allocation2 + $0x8] sm:$0xf] %vm451_vm9, %v649_v40 }
 0x89e   :  { %655 = vst.msk [vmem:[#allocation2 + $0x10] sm:$0xf0] %vm456_vm10, %v653_v39  ;;  %v666_v42 = vsel %vm2837_vm11, %v665_v41, 0.0 }
 0x89f   :  { %v667_v43 = vpack.c.bf16 %v666_v42, %v666_v42 }
 0x8a1   :  { %2190 = vmatmul.mubr.msk.bf16.vlgmr.msra.gmra.mxu0 %vm495_vm12, %v667_v43 }
 0x8a2   :  { %2206 = vmatpush3.bf16.msra.mxu0 %v2792_v29  ;;  %2213 = vmatprep.mubr.msk.bf16.mxu0 %vm2635_vm1, %v2634_v30 }
 0x8a3   :  { %2207 = vmatprep.subr.bf16.mxu0 %v2634_v30 }
 0x8a6   :  { %2208 = vmatpush3.bf16.msra.mxu0 %v2800_v31 }
 0x8a7   :  { %2209 = vmatprep.subr.bf16.mxu0 %v2634_v30 }
 0x8aa   :  { %2210 = vmatpush3.bf16.msra.mxu0 %v2809_v32 }
 0x8ab   :  { %2211 = vmatprep.subr.bf16.mxu0 %v2634_v30 }
 0x8ae   :  { %2212 = vmatpush3.bf16.msra.mxu0 %v2822_v34 }
 0x8af   :  { %2229 = vmatprep.subr.bf16.mxu0 %v2634_v30 }
 0x961   :  { %v705_v49 = vpop.f32.mrf.mxu0 }
 0x962   :  { %v711_v50 = vadd.f32 %v705_v49, %v664_v48 }
 0x963   :  { %v2191_v51 = vpop.f32.mrf.mxu0 }
 0x964   :  { %2419 = vtanh.f32 %v711_v50  ;;  %v2041_v55 = vmul.f32 -1.442695, %v711_v50 }
 0x965   :  { %v708_v52 = vpop.f32.mrf.mxu0 }
 0x966   :  { %2421 = vpow2.f32 %v2041_v55 }
 0x967   :  { %v2192_v53 = vpop.f32.mrf.mxu0 }
 0x971   :  { %v2420_v54 = vpop.eup %2419 }
 0x972   :  { %721 = vrot.lane.b32.xlu1 %v2420_v54, %s2633_s4 }
 0x973   :  { %v2422_v56 = vpop.eup %2421 }
 0x974   :  { %v715_v59 = vadd.f32 1.0, %v2422_v56 }
 0x976   :  { %2423 = vrcp.f32 %v715_v59 }
 0x983   :  { %v2424_v61 = vpop.eup %2423 }
 0x984   :  { %v719_v0 = vmul.f32 %v2424_v61, %v640_v33 }
 0x9e4   :  { %v722_v62 = vpop.permute.xlu1 %721 }
 0x9e5   :  { %v724_v63 = vmul.f32 %v2424_v61, %v722_v62 }
 0x9e7   :  { %726 = vrot.lane.b32.xlu0 %v724_v63, %s2633_s4 }
 0xa59   :  { %v727_v2 = vpop.permute.xlu0 %726 }
 0xa5a   :  { %v729_v3 = vadd.f32 %v727_v2, %v719_v0 }
 0xa5c   :  { %2425 = vtanh.f32 %v729_v3 }
 0xa69   :  { %v2426_v4 = vpop.eup %2425 }
 0xa6a   :  { %732 = vrot.lane.b32.xlu1 %v2426_v4, %s2633_s4 }
 0xadc   :  { %v733_v5 = vpop.permute.xlu1 %732 }
 0xadd   :  { %v735_v6 = vmul.f32 %v2424_v61, %v733_v5 }
 0xadf   :  { %741 = vrot.lane.b32.xlu1 %v735_v6, %s2636_s19  ;;  %737 = vrot.lane.b32.xlu0 %v735_v6, %s2630_s1 }
 0xb51   :  { %v742_v7 = vpop.permute.xlu1 %741  ;;  %v738_v8 = vpop.permute.xlu0 %737 }
 0xb52   :  { %v748_v9 = vsel %vm467_vm8, %v738_v8, %v742_v7  ;;  %740 = vst.msk [vmem:[#allocation2 + $0xc] sm:$0xf] %vm451_vm9, %v738_v8  ;;  %v917_v8 = vld [vmem:[#allocation3 + $0x28] sm:$0xf] }
 0xb53   :  { %744 = vst.msk [vmem:[#allocation2 + $0xc] sm:$0xf0] %vm456_vm10, %v742_v7  ;;  %v749_v10 = vsel %vm2837_vm11, %v748_v9, 0.0  ;;  %v918_v9 = vld [vmem:[#allocation3] sm:$0xf0] }
 0xb54   :  { %v750_v11 = vpack.c.bf16 %v749_v10, %v749_v10  ;;  %v919_v10 = vsel %vm421_vm0, %v917_v8, %v918_v9  ;;  %v2382_v8 = vld [vmem:[#allocation11 + $0x20] ss:$8 sps:$4 sm:$0xff]   ;;  %v2385_v9 = vld [vmem:[#allocation11 + $0x10] ss:$8 sps:$4 sm:$0xff]  }
 0xb56   :  { %2202 = vmatmul.mubr.msk.bf16.vlgmr.msra.gmra.mxu1 %vm495_vm12, %v750_v11 }
 0xb57   :  { %2218 = vmatpush3.bf16.msra.mxu1 %v2792_v29  ;;  %2225 = vmatprep.mubr.msk.bf16.mxu1 %vm2635_vm1, %v2634_v30 }
 0xb58   :  { %2219 = vmatprep.subr.bf16.mxu1 %v2634_v30 }
 0xb5b   :  { %2220 = vmatpush3.bf16.msra.mxu1 %v2800_v31 }
 0xb5c   :  { %2221 = vmatprep.subr.bf16.mxu1 %v2634_v30 }
 0xb5f   :  { %2222 = vmatpush3.bf16.msra.mxu1 %v2809_v32 }
 0xb60   :  { %2223 = vmatprep.subr.bf16.mxu1 %v2634_v30 }
 0xb63   :  { %2224 = vmatpush3.bf16.msra.mxu1 %v2822_v34 }
 0xc16   :  { %v788_v15 = vpop.f32.mrf.mxu1 }
 0xc17   :  { %v794_v16 = vadd.f32 %v788_v15, %v747_v14 }
 0xc18   :  { %v2203_v17 = vpop.f32.mrf.mxu1 }
 0xc19   :  { %2427 = vtanh.f32 %v794_v16  ;;  %v2043_v21 = vmul.f32 -1.442695, %v794_v16 }
 0xc1a   :  { %v791_v18 = vpop.f32.mrf.mxu1 }
 0xc1b   :  { %2429 = vpow2.f32 %v2043_v21 }
 0xc1c   :  { %v2204_v19 = vpop.f32.mrf.mxu1 }
 0xc26   :  { %v2428_v20 = vpop.eup %2427 }
 0xc27   :  { %804 = vrot.lane.b32.xlu0 %v2428_v20, %s2633_s4 }
 0xc28   :  { %v2430_v22 = vpop.eup %2429 }
 0xc29   :  { %v798_v23 = vadd.f32 1.0, %v2430_v22 }
 0xc2b   :  { %2431 = vrcp.f32 %v798_v23 }
 0xc38   :  { %v2432_v24 = vpop.eup %2431 }
 0xc39   :  { %v802_v27 = vmul.f32 %v2432_v24, %v729_v3 }
 0xc99   :  { %v805_v25 = vpop.permute.xlu0 %804 }
 0xc9a   :  { %v807_v26 = vmul.f32 %v2432_v24, %v805_v25 }
 0xc9c   :  { %809 = vrot.lane.b32.xlu1 %v807_v26, %s2633_s4 }
 0xd0e   :  { %v810_v28 = vpop.permute.xlu1 %809 }
 0xd0f   :  { %v812_v33 = vadd.f32 %v810_v28, %v802_v27 }
 0xd11   :  { %2433 = vtanh.f32 %v812_v33 }
 0xd1e   :  { %v2434_v35 = vpop.eup %2433 }
 0xd1f   :  { %815 = vrot.lane.b32.xlu0 %v2434_v35, %s2633_s4 }
 0xd91   :  { %v816_v36 = vpop.permute.xlu0 %815 }
 0xd92   :  { %v818_v37 = vmul.f32 %v2432_v24, %v816_v36 }
 0xd94   :  { %824 = vrot.lane.b32.xlu0 %v818_v37, %s2636_s19  ;;  %820 = vrot.lane.b32.xlu1 %v818_v37, %s2630_s1 }
 0xe06   :  { %v825_v39 = vpop.permute.xlu0 %824  ;;  %v821_v40 = vpop.permute.xlu1 %820 }
 0xe07   :  { %827 = vst.msk [vmem:[#allocation2 + $0x8] sm:$0xf0] %vm456_vm10, %v825_v39  ;;  %v837_v41 = vsel %vm467_vm8, %v821_v40, %v825_v39 }
 0xe08   :  { %823 = vst.msk [vmem:[#allocation2 + $0x10] sm:$0xf] %vm451_vm9, %v821_v40  ;;  %v838_v42 = vsel %vm2837_vm11, %v837_v41, 0.0  ;;  %v1000_v40 = vld [vmem:[#allocation3 + $0x28] sm:$0xf0] }
 0xe09   :  { %v839_v43 = vpack.c.bf16 %v838_v42, %v838_v42  ;;  %v1001_v41 = vld [vmem:[#allocation3] sm:$0xf]  ;;  %v1003_v42 = vrot.slane %v1000_v40, 4 }
 0xe0b   :  { %2214 = vmatmul.mubr.msk.bf16.vlgmr.msra.gmra.mxu0 %vm495_vm12, %v839_v43  ;;  %v1006_v43 = vrot.slane %v1001_v41, 4 }
 0xe0c   :  { %2230 = vmatpush3.bf16.msra.mxu0 %v2792_v29  ;;  %2237 = vmatprep.mubr.msk.bf16.mxu0 %vm2635_vm1, %v2634_v30  ;;  %v831_v29 = vrot.slane %v828_v44, 4 }
 0xe0d   :  { %2231 = vmatprep.subr.bf16.mxu0 %v2634_v30  ;;  %v1008_v44 = vsel %vm421_vm0, %v1003_v42, %v1006_v43 }
 0xe0e   :  { %v836_v47 = vsel %vm421_vm0, %v831_v29, %v834_v46 }
 0xe10   :  { %2232 = vmatpush3.bf16.msra.mxu0 %v2800_v31 }
 0xe11   :  { %2233 = vmatprep.subr.bf16.mxu0 %v2634_v30 }
 0xe14   :  { %2234 = vmatpush3.bf16.msra.mxu0 %v2809_v32 }
 0xe15   :  { %2235 = vmatprep.subr.bf16.mxu0 %v2634_v30 }
 0xe18   :  { %2236 = vmatpush3.bf16.msra.mxu0 %v2822_v34 }
 0xe19   :  { %2241 = vmatprep.subr.bf16.mxu0 %v2634_v30 }
 0xecb   :  { %v877_v48 = vpop.f32.mrf.mxu0 }
 0xecc   :  { %v883_v49 = vadd.f32 %v877_v48, %v836_v47 }
 0xecd   :  { %v2215_v50 = vpop.f32.mrf.mxu0 }
 0xece   :  { %2435 = vtanh.f32 %v883_v49  ;;  %v2045_v32 = vmul.f32 -1.442695, %v883_v49 }
 0xecf   :  { %v880_v31 = vpop.f32.mrf.mxu0 }
 0xed0   :  { %2437 = vpow2.f32 %v2045_v32 }
 0xed1   :  { %v2216_v51 = vpop.f32.mrf.mxu0 }
 0xedb   :  { %v2436_v52 = vpop.eup %2435 }
 0xedc   :  { %893 = vrot.lane.b32.xlu1 %v2436_v52, %s2633_s4 }
 0xedd   :  { %v2438_v34 = vpop.eup %2437 }
 0xede   :  { %v887_v53 = vadd.f32 1.0, %v2438_v34 }
 0xee0   :  { %2439 = vrcp.f32 %v887_v53 }
 0xeed   :  { %v2440_v54 = vpop.eup %2439 }
 0xeee   :  { %v891_v59 = vmul.f32 %v2440_v54, %v812_v33 }
 0xf4e   :  { %v894_v55 = vpop.permute.xlu1 %893 }
 0xf4f   :  { %v896_v56 = vmul.f32 %v2440_v54, %v894_v55 }
 0xf51   :  { %898 = vrot.lane.b32.xlu0 %v896_v56, %s2633_s4  ;;  %v2367_v56 = vld [vmem:[#allocation11 + $0x70] ss:$8 sps:$4 sm:$0xff]  }
 0xfc3   :  { %v899_v61 = vpop.permute.xlu0 %898 }
 0xfc4   :  { %v901_v62 = vadd.f32 %v899_v61, %v891_v59  ;;  %v2369_v59 = vld [vmem:[#allocation11 + $0x74] ss:$8 sps:$4 sm:$0xff]   ;;  %v2372_v61 = vld [vmem:[#allocation11 + $0x64] ss:$8 sps:$4 sm:$0xff]  }
 0xfc5   :  { %1203 = vmatprep.subr.bf16.mxu1 %v2369_v59  ;;  %v3016_v59 = vld [vmem:[#allocation12] sm:$0xff]  }
 0xfc6   :  { %2441 = vtanh.f32 %v901_v62 }
 0xfd3   :  { %v2442_v63 = vpop.eup %2441 }
 0xfd4   :  { %904 = vrot.lane.b32.xlu1 %v2442_v63, %s2633_s4  ;;  %v2375_v63 = vld [vmem:[#allocation11 + $0x54] ss:$8 sps:$4 sm:$0xff]  }
0x1046   :  { %v905_v0 = vpop.permute.xlu1 %904 }
0x1047   :  { %v907_v2 = vmul.f32 %v2440_v54, %v905_v0  ;;  %v2373_v0 = vld [vmem:[#allocation11 + $0x50] ss:$8 sps:$4 sm:$0xff]  }
0x1049   :  { %913 = vrot.lane.b32.xlu1 %v907_v2, %s2636_s19  ;;  %909 = vrot.lane.b32.xlu0 %v907_v2, %s2630_s1  ;;  %v2378_v2 = vld [vmem:[#allocation11 + $0x44] ss:$8 sps:$4 sm:$0xff]  }
0x10bb   :  { %v914_v3 = vpop.permute.xlu1 %913  ;;  %v910_v4 = vpop.permute.xlu0 %909 }
0x10bc   :  { %916 = vst.msk [vmem:[#allocation2 + $0x4] sm:$0xf0] %vm456_vm10, %v914_v3  ;;  %v920_v5 = vsel %vm467_vm8, %v910_v4, %v914_v3 }
0x10bd   :  { %912 = vst.msk [vmem:[#allocation2 + $0x14] sm:$0xf] %vm451_vm9, %v910_v4  ;;  %v921_v6 = vsel %vm2837_vm11, %v920_v5, 0.0  ;;  %v2376_v4 = vld [vmem:[#allocation11 + $0x40] ss:$8 sps:$4 sm:$0xff]  }
0x10be   :  { %v922_v7 = vpack.c.bf16 %v921_v6, %v921_v6  ;;  %v2381_v5 = vld [vmem:[#allocation11 + $0x34] ss:$8 sps:$4 sm:$0xff]   ;;  %v2379_v6 = vld [vmem:[#allocation11 + $0x30] ss:$8 sps:$4 sm:$0xff]  }
0x10c0   :  { %2226 = vmatmul.mubr.msk.bf16.vlgmr.msra.gmra.mxu1 %vm495_vm12, %v922_v7  ;;  %v2384_v7 = vld [vmem:[#allocation11 + $0x24] ss:$8 sps:$4 sm:$0xff]  }
0x10c1   :  { %1235 = vmatprep.mubr.bf16.mxu1 %v2632_v1  ;;  %1204 = vmatpush1.bf16.msra.mxu1 %v2367_v56 }
0x10c2   :  { %1205 = vmatprep.subr.bf16.mxu1 %v2372_v61 }
0x1180   :  { %v960_v11 = vpop.f32.mrf.mxu1 }
0x1181   :  { %v966_v12 = vadd.f32 %v960_v11, %v919_v10  ;;  %v2387_v10 = vld [vmem:[#allocation11 + $0x14] ss:$8 sps:$4 sm:$0xff]   ;;  %v2390_v11 = vld [vmem:[#allocation11 + $0x4] ss:$8 sps:$4 sm:$0xff]  }
0x1182   :  { %v2227_v13 = vpop.f32.mrf.mxu1 }
0x1183   :  { %2443 = vtanh.f32 %v966_v12  ;;  %v2047_v17 = vmul.f32 -1.442695, %v966_v12  ;;  %v2388_v12 = vld [vmem:[#allocation11] ss:$8 sps:$4 sm:$0xff]  }
0x1184   :  { %v963_v14 = vpop.f32.mrf.mxu1 }
0x1185   :  { %2445 = vpow2.f32 %v2047_v17 }
0x1186   :  { %v2228_v15 = vpop.f32.mrf.mxu1 }
0x1190   :  { %v2444_v16 = vpop.eup %2443 }
0x1191   :  { %976 = vrot.lane.b32.xlu0 %v2444_v16, %s2633_s4 }
0x1192   :  { %v2446_v18 = vpop.eup %2445 }
0x1193   :  { %v970_v19 = vadd.f32 1.0, %v2446_v18  ;;  %v1090_v18 = vld [vmem:[#allocation2 + $0x8] sm:$0xff] }
0x1195   :  { %2447 = vrcp.f32 %v970_v19 }
0x11a2   :  { %v2448_v20 = vpop.eup %2447 }
0x11a3   :  { %v974_v23 = vmul.f32 %v2448_v20, %v901_v62  ;;  %v2370_v62 = vld [vmem:[#allocation11 + $0x60] ss:$8 sps:$4 sm:$0xff]  }
0x11a4   :  { %1206 = vmatpush1.bf16.msra.mxu1 %v2370_v62 }
0x11a5   :  { %1207 = vmatprep.subr.bf16.mxu1 %v2375_v63 }
0x11a8   :  { %1208 = vmatpush1.bf16.msra.mxu1 %v2373_v0 }
0x11a9   :  { %1209 = vmatprep.subr.bf16.mxu1 %v2378_v2 }
0x11ac   :  { %1210 = vmatpush1.bf16.msra.mxu1 %v2376_v4 }
0x11ad   :  { %1211 = vmatprep.subr.bf16.mxu1 %v2381_v5 }
0x11b0   :  { %1212 = vmatpush1.bf16.msra.mxu1 %v2379_v6 }
0x11b1   :  { %1213 = vmatprep.subr.bf16.mxu1 %v2384_v7 }
0x11b4   :  { %1214 = vmatpush1.bf16.msra.mxu1 %v2382_v8 }
0x11b5   :  { %1215 = vmatprep.subr.bf16.mxu1 %v2387_v10 }
0x11b8   :  { %1216 = vmatpush1.bf16.msra.mxu1 %v2385_v9 }
0x11b9   :  { %1217 = vmatprep.subr.bf16.mxu1 %v2390_v11 }
0x11bc   :  { %1218 = vmatpush1.bf16.msra.mxu1 %v2388_v12 }
0x11bd   :  { %2265 = vmatprep.subr.bf16.mxu1 %v2634_v30 }
0x1203   :  { %v977_v21 = vpop.permute.xlu0 %976 }
0x1204   :  { %v979_v22 = vmul.f32 %v2448_v20, %v977_v21  ;;  %v1091_v21 = vld [vmem:[#allocation2 + $0x10] sm:$0xff] }
0x1206   :  { %981 = vrot.lane.b32.xlu1 %v979_v22, %s2633_s4 }
0x1278   :  { %v982_v24 = vpop.permute.xlu1 %981 }
0x1279   :  { %v984_v25 = vadd.f32 %v982_v24, %v974_v23  ;;  %v1111_v23 = vld [vmem:[%s3162_s7] sm:$0x3] }
0x127a   :  { %v1116_v24 = vrot.slane %v1111_v23, %v262_v58 }
0x127b   :  { %2449 = vtanh.f32 %v984_v25 }
0x1288   :  { %v2450_v26 = vpop.eup %2449 }
0x1289   :  { %987 = vrot.lane.b32.xlu0 %v2450_v26, %s2633_s4 }
0x12fb   :  { %v988_v27 = vpop.permute.xlu0 %987 }
0x12fc   :  { %v990_v28 = vmul.f32 %v2448_v20, %v988_v27 }
0x12fe   :  { %996 = vrot.lane.b32.xlu0 %v990_v28, %s2636_s19  ;;  %992 = vrot.lane.b32.xlu1 %v990_v28, %s2630_s1 }
0x1370   :  { %v997_v33 = vpop.permute.xlu0 %996  ;;  %v993_v35 = vpop.permute.xlu1 %992 }
0x1371   :  { %999 = vst.msk [vmem:[#allocation2] sm:$0xf0] %vm456_vm10, %v997_v33  ;;  %v1009_v36 = vsel %vm467_vm8, %v993_v35, %v997_v33 }
0x1372   :  { %995 = vst.msk [vmem:[#allocation2 + $0x18] sm:$0xf] %vm451_vm9, %v993_v35  ;;  %v1010_v37 = vsel %vm2837_vm11, %v1009_v36, 0.0 }
0x1373   :  { %v1011_v39 = vpack.c.bf16 %v1010_v37, %v1010_v37 }
0x1375   :  { %2238 = vmatmul.mubr.msk.bf16.vlgmr.msra.gmra.mxu0 %vm495_vm12, %v1011_v39 }
0x1376   :  { %2249 = vmatprep.mubr.msk.bf16.mxu0 %vm2635_vm1, %v2634_v30 }
0x1435   :  { %v1049_v45 = vpop.f32.mrf.mxu0 }
0x1436   :  { %v1055_v29 = vadd.f32 %v1049_v45, %v1008_v44 }
0x1437   :  { %v2239_v46 = vpop.f32.mrf.mxu0 }
0x1438   :  { %2451 = vtanh.f32 %v1055_v29  ;;  %v2049_v50 = vmul.f32 -1.442695, %v1055_v29 }
0x1439   :  { %v1052_v47 = vpop.f32.mrf.mxu0 }
0x143a   :  { %2453 = vpow2.f32 %v2049_v50 }
0x143b   :  { %v2240_v48 = vpop.f32.mrf.mxu0 }
0x1445   :  { %v2452_v49 = vpop.eup %2451 }
0x1446   :  { %1065 = vrot.lane.b32.xlu1 %v2452_v49, %s2633_s4 }
0x1447   :  { %v2454_v31 = vpop.eup %2453 }
0x1448   :  { %v1059_v51 = vadd.f32 1.0, %v2454_v31 }
0x144a   :  { %2455 = vrcp.f32 %v1059_v51 }
0x1457   :  { %v2456_v52 = vpop.eup %2455 }
0x1458   :  { %v1063_v53 = vmul.f32 %v2456_v52, %v984_v25  ;;  %v1120_v25 = vrot.slane %v1111_v23, %v266_v60 }
0x14b8   :  { %v1066_v32 = vpop.permute.xlu1 %1065 }
0x14b9   :  { %v1068_v34 = vmul.f32 %v2456_v52, %v1066_v32 }
0x14bb   :  { %1070 = vrot.lane.b32.xlu0 %v1068_v34, %s2633_s4 }
0x152d   :  { %v1071_v54 = vpop.permute.xlu0 %1070 }
0x152e   :  { %v1073_v55 = vadd.f32 %v1071_v54, %v1063_v53  ;;  %v2997_v53 = vld [vmem:[#allocation12 + $0x18] sm:$0xff]   ;;  %v3000_v54 = vld [vmem:[#allocation12 + $0x10] sm:$0xff]  }
0x152f   :  { %2242 = vmatpush3.bf16.msra.mxu0 %v2997_v53 }
0x1530   :  { %2457 = vtanh.f32 %v1073_v55  ;;  %2243 = vmatprep.subr.bf16.mxu0 %v2634_v30  ;;  %v3006_v55 = vld [vmem:[#allocation12 + $0x8] sm:$0xff]  }
0x1533   :  { %2244 = vmatpush3.bf16.msra.mxu0 %v3000_v54 }
0x1534   :  { %2245 = vmatprep.subr.bf16.mxu0 %v2634_v30 }
0x1537   :  { %2246 = vmatpush3.bf16.msra.mxu0 %v3006_v55 }
0x1538   :  { %2247 = vmatprep.subr.bf16.mxu0 %v2634_v30 }
0x153b   :  { %2248 = vmatpush3.bf16.msra.mxu0 %v3016_v59 }
0x153c   :  { %2253 = vmatprep.subr.bf16.mxu0 %v2634_v30 }
0x153d   :  { %v2458_v3 = vpop.eup %2457 }
0x153e   :  { %1076 = vrot.lane.b32.xlu1 %v2458_v3, %s2633_s4 }
0x15b0   :  { %v1077_v13 = vpop.permute.xlu1 %1076 }
0x15b1   :  { %v1079_v14 = vmul.f32 %v2456_v52, %v1077_v13 }
0x15b3   :  { %1081 = vrot.lane.b32.xlu1 %v1079_v14, %s2630_s1  ;;  %1085 = vrot.lane.b32.xlu0 %v1079_v14, %s2636_s19 }
0x1625   :  { %v1082_v15 = vpop.permute.xlu1 %1081  ;;  %v1086_v16 = vpop.permute.xlu0 %1085 }
0x1626   :  { %1084 = vst.msk [vmem:[#allocation2 + $0x1c] sm:$0xf] %vm451_vm9, %v1082_v15 }
0x1627   :  { %1088 = vst.msk [vmem:[#allocation2 - $0x4] sm:$0xf0] %vm456_vm10, %v1086_v16 }
0x162d   :  { %v1092_v20 = vld [vmem:[#allocation2 + $0x18] sm:$0xff] }
0x162e   :  { %v1089_v17 = vld [vmem:[#allocation2] sm:$0xff]  ;;  %v1094_v22 = vpack.c.bf16 %v1092_v20, %v1091_v21 }
0x162f   :  { %v1093_v19 = vpack.c.bf16 %v1090_v18, %v1089_v17 }
0x1631   :  { %1236 = vmatmul.mubr.bf16.vlgmr.msra.gmra.mxu1 %v1093_v19 }
0x1632   :  { %1245 = vmatprep.mubr.bf16.mxu1 %v2632_v1  ;;  %2266 = vmatpush3.bf16.msra.mxu1 %v2997_v53 }
0x1633   :  { %2267 = vmatprep.subr.bf16.mxu1 %v2634_v30 }
0x1636   :  { %2268 = vmatpush3.bf16.msra.mxu1 %v3000_v54 }
0x1637   :  { %2269 = vmatprep.subr.bf16.mxu1 %v2634_v30 }
0x1639   :  { %1246 = vmatmul.mubr.bf16.gmra.mxu1 %v1094_v22 }
0x163a   :  { %2273 = vmatprep.mubr.msk.bf16.mxu1 %vm2635_vm1, %v2634_v30  ;;  %2270 = vmatpush3.bf16.msra.mxu1 %v3006_v55 }
0x163b   :  { %2271 = vmatprep.subr.bf16.mxu1 %v2634_v30 }
0x163e   :  { %2272 = vmatpush3.bf16.msra.mxu1 %v3016_v59 }
0x163f   :  { %2289 = vmatprep.subr.bf16.mxu1 %v2634_v30 }
0x16f1   :  { %v1237_v26 = vpop.f32.mrf.mxu1 }
0x16f2   :  { %v1238_v27 = vadd.f32 %v1237_v26, %v1116_v24 }
0x16f3   :  { %v1239_v1 = vpop.f32.mrf.mxu1 }
0x16f4   :  { %1256 = vst [vmem:[#allocation3 + $0x30] sm:$0xff] %v1238_v27  ;;  %v1240_v28 = vadd.f32 %v1239_v1, %v1120_v25 }
0x16f5   :  { %v1241_v33 = vpop.f32.mrf.mxu1 }
0x16f6   :  { %1257 = vst [vmem:[#allocation3] sm:$0xff] %v1240_v28  ;;  %v1242_v35 = vadd.f32 %v1241_v33, %v1116_v24 }
0x16f7   :  { %v1243_v36 = vpop.f32.mrf.mxu1 }
0x16f8   :  { %1258 = vst [vmem:[#allocation3 + $0x18] sm:$0xff] %v1242_v35  ;;  %v1244_v37 = vadd.f32 %v1243_v36, %v1120_v25 }
0x16f9   :  { %v1247_v39 = vpop.f32.mrf.mxu1 }
0x16fa   :  { %1259 = vst [vmem:[#allocation3 + $0x10] sm:$0xff] %v1244_v37  ;;  %v1248_v40 = vadd.f32 %v1247_v39, %v1116_v24 }
0x16fb   :  { %v1249_v41 = vpop.f32.mrf.mxu1  ;;  %v1272_v44 = vld [vmem:[#allocation3 + $0x30] sm:$0xf]  ;;  %v1299_v6 = vld [vmem:[#allocation3 + $0x30] sm:$0xf0] }
0x16fc   :  { %1260 = vst [vmem:[#allocation3 + $0x8] sm:$0xff] %v1248_v40  ;;  %v1250_v58 = vadd.f32 %v1249_v41, %v1120_v25  ;;  %v1302_v8 = vrot.slane %v1299_v6, 4 }
0x16fd   :  { %v1251_v42 = vpop.f32.mrf.mxu1 }
0x16fe   :  { %1261 = vst [vmem:[#allocation3 + $0x20] sm:$0xff] %v1250_v58  ;;  %v1252_v57 = vadd.f32 %v1251_v42, %v1116_v24 }
0x16ff   :  { %v1253_v60 = vpop.f32.mrf.mxu1  ;;  %v1410_v39 = vld [vmem:[#allocation3 + $0x18] sm:$0xf] }
0x1700   :  { %1262 = vst [vmem:[#allocation3 + $0x28] sm:$0xff] %v1252_v57  ;;  %v1254_v43 = vadd.f32 %v1253_v60, %v1120_v25 }
0x1702   :  { %1263 = vst [vmem:[#allocation3 + $0x38] sm:$0xff] %v1254_v43 }
0x1705   :  { %v1411_v37 = vld [vmem:[#allocation3 + $0x20] sm:$0xf0] }
0x1706   :  { %v1412_v40 = vsel %vm421_vm0, %v1410_v39, %v1411_v37 }
0x1709   :  { %v1273_v45 = vld [vmem:[#allocation3 + $0x38] sm:$0xf0]  ;;  %v1300_v5 = vld [vmem:[#allocation3 + $0x38] sm:$0xf] }
0x170a   :  { %v1274_v29 = vsel %vm421_vm0, %v1272_v44, %v1273_v45  ;;  %v1305_v7 = vrot.slane %v1300_v5, 4 }
0x170b   :  { %2459 = vtanh.f32 %v1274_v29  ;;  %v2066_v47 = vmul.f32 -1.442695, %v1274_v29 }
0x170c   :  { %v1307_v9 = vsel %vm421_vm0, %v1302_v8, %v1305_v7 }
0x170d   :  { %2461 = vpow2.f32 %v2066_v47 }
0x1718   :  { %v2460_v46 = vpop.eup %2459 }
0x1719   :  { %1284 = vrot.lane.b32.xlu0 %v2460_v46, %s2633_s4 }
0x171a   :  { %v2462_v48 = vpop.eup %2461 }
0x171b   :  { %v1278_v49 = vadd.f32 1.0, %v2462_v48 }
0x171d   :  { %2463 = vrcp.f32 %v1278_v49 }
0x172a   :  { %v2464_v50 = vpop.eup %2463 }
0x172b   :  { %v1282_v52 = vmul.f32 0.0, %v2464_v50 }
0x178b   :  { %v1285_v31 = vpop.permute.xlu0 %1284 }
0x178c   :  { %v1287_v51 = vmul.f32 %v2464_v50, %v1285_v31 }
0x178e   :  { %1289 = vrot.lane.b32.xlu1 %v1287_v51, %s2633_s4 }
0x1800   :  { %v1290_v32 = vpop.permute.xlu1 %1289 }
0x1801   :  { %v2994_v34 = vadd.f32 %v1290_v32, %v1282_v52 }
0x1803   :  { %2465 = vtanh.f32 %v2994_v34 }
0x1810   :  { %v2466_v56 = vpop.eup %2465 }
0x1811   :  { %1295 = vrot.lane.b32.xlu0 %v2466_v56, %s2633_s4 }
0x1883   :  { %v1296_v61 = vpop.permute.xlu0 %1295 }
0x1884   :  { %v3022_v62 = vmul.f32 %v2464_v50, %v1296_v61 }
0x1886   :  { %1312 = vrot.lane.b32.xlu0 %v3022_v62, %s2636_s19  ;;  %1309 = vrot.lane.b32.xlu1 %v3022_v62, %s2630_s1 }
0x18f8   :  { %v1313_v63 = vpop.permute.xlu0 %1312  ;;  %v1310_v0 = vpop.permute.xlu1 %1309 }
0x18f9   :  { %v1315_v2 = vsel %vm467_vm8, %v1310_v0, %v1313_v63 }
0x18fa   :  { %v1316_v3 = vsel %vm2837_vm11, %v1315_v2, 0.0  ;;  %v1492_v2 = vld [vmem:[#allocation3 + $0x20] sm:$0xf] }
0x18fb   :  { %v1317_v4 = vpack.c.bf16 %v1316_v3, %v1316_v3  ;;  %v1491_v3 = vld [vmem:[#allocation3 + $0x18] sm:$0xf0] }
0x18fc   :  { %v1494_v5 = vrot.slane %v1491_v3, 4 }
0x18fd   :  { %2250 = vmatmul.mubr.msk.bf16.vlgmr.msra.gmra.mxu0 %vm495_vm12, %v1317_v4  ;;  %v1497_v4 = vrot.slane %v1492_v2, 4 }
0x18fe   :  { %2254 = vmatpush3.bf16.msra.mxu0 %v2997_v53  ;;  %2261 = vmatprep.mubr.msk.bf16.mxu0 %vm2635_vm1, %v2634_v30 }
0x18ff   :  { %2255 = vmatprep.subr.bf16.mxu0 %v2634_v30  ;;  %v1499_v6 = vsel %vm421_vm0, %v1494_v5, %v1497_v4 }
0x1902   :  { %2256 = vmatpush3.bf16.msra.mxu0 %v3000_v54 }
0x1903   :  { %2257 = vmatprep.subr.bf16.mxu0 %v2634_v30 }
0x1906   :  { %2258 = vmatpush3.bf16.msra.mxu0 %v3006_v55 }
0x1907   :  { %2259 = vmatprep.subr.bf16.mxu0 %v2634_v30 }
0x190a   :  { %2260 = vmatpush3.bf16.msra.mxu0 %v3016_v59 }
0x190b   :  { %2277 = vmatprep.subr.bf16.mxu0 %v2634_v30 }
0x19bd   :  { %v1379_v10 = vpop.f32.mrf.mxu0 }
0x19be   :  { %v1385_v11 = vadd.f32 %v1379_v10, %v1307_v9 }
0x19bf   :  { %v2251_v12 = vpop.f32.mrf.mxu0 }
0x19c0   :  { %2467 = vtanh.f32 %v1385_v11  ;;  %v2072_v16 = vmul.f32 -1.442695, %v1385_v11 }
0x19c1   :  { %v1382_v13 = vpop.f32.mrf.mxu0 }
0x19c2   :  { %2469 = vpow2.f32 %v2072_v16 }
0x19c3   :  { %v2252_v14 = vpop.f32.mrf.mxu0 }
0x19cd   :  { %v2468_v15 = vpop.eup %2467 }
0x19ce   :  { %1395 = vrot.lane.b32.xlu1 %v2468_v15, %s2633_s4 }
0x19cf   :  { %v2470_v17 = vpop.eup %2469 }
0x19d0   :  { %v1389_v18 = vadd.f32 1.0, %v2470_v17 }
0x19d2   :  { %2471 = vrcp.f32 %v1389_v18 }
0x19df   :  { %v2472_v19 = vpop.eup %2471 }
0x19e0   :  { %v1393_v22 = vmul.f32 %v2472_v19, %v2994_v34 }
0x1a40   :  { %v1396_v20 = vpop.permute.xlu1 %1395 }
0x1a41   :  { %v1398_v21 = vmul.f32 %v2472_v19, %v1396_v20 }
0x1a43   :  { %1400 = vrot.lane.b32.xlu0 %v1398_v21, %s2633_s4 }
0x1ab5   :  { %v1401_v23 = vpop.permute.xlu0 %1400 }
0x1ab6   :  { %v1403_v24 = vadd.f32 %v1401_v23, %v1393_v22 }
0x1ab8   :  { %2473 = vtanh.f32 %v1403_v24 }
0x1ac5   :  { %v2474_v25 = vpop.eup %2473 }
0x1ac6   :  { %1406 = vrot.lane.b32.xlu1 %v2474_v25, %s2633_s4 }
0x1b38   :  { %v1407_v26 = vpop.permute.xlu1 %1406 }
0x1b39   :  { %v1409_v27 = vmul.f32 %v2472_v19, %v1407_v26 }
0x1b3b   :  { %1417 = vrot.lane.b32.xlu1 %v1409_v27, %s2636_s19  ;;  %1414 = vrot.lane.b32.xlu0 %v1409_v27, %s2630_s1 }
0x1bad   :  { %v1418_v1 = vpop.permute.xlu1 %1417  ;;  %v1415_v28 = vpop.permute.xlu0 %1414 }
0x1bae   :  { %v1420_v33 = vsel %vm467_vm8, %v1415_v28, %v1418_v1 }
0x1baf   :  { %v1421_v35 = vsel %vm2837_vm11, %v1420_v33, 0.0  ;;  %v1578_v33 = vld [vmem:[#allocation3 + $0x8] sm:$0xf] }
0x1bb0   :  { %v1422_v36 = vpack.c.bf16 %v1421_v35, %v1421_v35  ;;  %v1579_v35 = vld [vmem:[#allocation3 + $0x10] sm:$0xf0] }
0x1bb2   :  { %2262 = vmatmul.mubr.msk.bf16.vlgmr.msra.gmra.mxu0 %vm495_vm12, %v1422_v36  ;;  %v1580_v36 = vsel %vm421_vm0, %v1578_v33, %v1579_v35 }
0x1bb3   :  { %2278 = vmatpush3.bf16.msra.mxu0 %v2997_v53  ;;  %2285 = vmatprep.mubr.msk.bf16.mxu0 %vm2635_vm1, %v2634_v30 }
0x1bb4   :  { %2279 = vmatprep.subr.bf16.mxu0 %v2634_v30 }
0x1bb7   :  { %2280 = vmatpush3.bf16.msra.mxu0 %v3000_v54 }
0x1bb8   :  { %2281 = vmatprep.subr.bf16.mxu0 %v2634_v30 }
0x1bbb   :  { %2282 = vmatpush3.bf16.msra.mxu0 %v3006_v55 }
0x1bbc   :  { %2283 = vmatprep.subr.bf16.mxu0 %v2634_v30 }
0x1bbf   :  { %2284 = vmatpush3.bf16.msra.mxu0 %v3016_v59 }
0x1bc0   :  { %2301 = vmatprep.subr.bf16.mxu0 %v2634_v30 }
0x1c72   :  { %v1460_v41 = vpop.f32.mrf.mxu0 }
0x1c73   :  { %v1466_v58 = vadd.f32 %v1460_v41, %v1412_v40 }
0x1c74   :  { %v2263_v42 = vpop.f32.mrf.mxu0 }
0x1c75   :  { %2475 = vtanh.f32 %v1466_v58  ;;  %v2074_v44 = vmul.f32 -1.442695, %v1466_v58 }
0x1c76   :  { %v1463_v57 = vpop.f32.mrf.mxu0 }
0x1c77   :  { %2477 = vpow2.f32 %v2074_v44 }
0x1c78   :  { %v2264_v60 = vpop.f32.mrf.mxu0 }
0x1c82   :  { %v2476_v43 = vpop.eup %2475 }
0x1c83   :  { %1476 = vrot.lane.b32.xlu0 %v2476_v43, %s2633_s4 }
0x1c84   :  { %v2478_v45 = vpop.eup %2477 }
0x1c85   :  { %v1470_v29 = vadd.f32 1.0, %v2478_v45 }
0x1c87   :  { %2479 = vrcp.f32 %v1470_v29 }
0x1c94   :  { %v2480_v46 = vpop.eup %2479 }
0x1c95   :  { %v1474_v49 = vmul.f32 %v2480_v46, %v1403_v24 }
0x1cf5   :  { %v1477_v47 = vpop.permute.xlu0 %1476 }
0x1cf6   :  { %v1479_v48 = vmul.f32 %v2480_v46, %v1477_v47 }
0x1cf8   :  { %1481 = vrot.lane.b32.xlu1 %v1479_v48, %s2633_s4 }
0x1d6a   :  { %v1482_v50 = vpop.permute.xlu1 %1481 }
0x1d6b   :  { %v1484_v31 = vadd.f32 %v1482_v50, %v1474_v49 }
0x1d6d   :  { %2481 = vtanh.f32 %v1484_v31 }
0x1d7a   :  { %v2482_v51 = vpop.eup %2481 }
0x1d7b   :  { %1487 = vrot.lane.b32.xlu0 %v2482_v51, %s2633_s4 }
0x1ded   :  { %v1488_v52 = vpop.permute.xlu0 %1487 }
0x1dee   :  { %v1490_v32 = vmul.f32 %v2480_v46, %v1488_v52 }
0x1df0   :  { %1504 = vrot.lane.b32.xlu0 %v1490_v32, %s2636_s19  ;;  %1501 = vrot.lane.b32.xlu1 %v1490_v32, %s2630_s1 }
0x1e62   :  { %v1505_v34 = vpop.permute.xlu0 %1504  ;;  %v1502_v56 = vpop.permute.xlu1 %1501 }
0x1e63   :  { %v1507_v61 = vsel %vm467_vm8, %v1502_v56, %v1505_v34 }
0x1e64   :  { %v1508_v63 = vsel %vm2837_vm11, %v1507_v61, 0.0  ;;  %v1659_v61 = vld [vmem:[#allocation3 + $0x8] sm:$0xf0] }
0x1e65   :  { %v1509_v0 = vpack.c.bf16 %v1508_v63, %v1508_v63  ;;  %v1660_v63 = vld [vmem:[#allocation3 + $0x10] sm:$0xf] }
0x1e66   :  { %v1665_v2 = vrot.slane %v1660_v63, 4 }
0x1e67   :  { %2274 = vmatmul.mubr.msk.bf16.vlgmr.msra.gmra.mxu1 %vm495_vm12, %v1509_v0  ;;  %v1662_v0 = vrot.slane %v1659_v61, 4 }
0x1e68   :  { %2290 = vmatpush3.bf16.msra.mxu1 %v2997_v53  ;;  %2297 = vmatprep.mubr.msk.bf16.mxu1 %vm2635_vm1, %v2634_v30 }
0x1e69   :  { %2291 = vmatprep.subr.bf16.mxu1 %v2634_v30 }
0x1e6c   :  { %2292 = vmatpush3.bf16.msra.mxu1 %v3000_v54 }
0x1e6d   :  { %2293 = vmatprep.subr.bf16.mxu1 %v2634_v30 }
0x1e70   :  { %2294 = vmatpush3.bf16.msra.mxu1 %v3006_v55 }
0x1e71   :  { %2295 = vmatprep.subr.bf16.mxu1 %v2634_v30 }
0x1e74   :  { %2296 = vmatpush3.bf16.msra.mxu1 %v3016_v59 }
0x1e75   :  { %2313 = vmatprep.subr.bf16.mxu1 %v2634_v30 }
0x1f27   :  { %v1547_v7 = vpop.f32.mrf.mxu1 }
0x1f28   :  { %v1553_v8 = vadd.f32 %v1547_v7, %v1499_v6 }
0x1f29   :  { %v2275_v9 = vpop.f32.mrf.mxu1 }
0x1f2a   :  { %2483 = vtanh.f32 %v1553_v8  ;;  %v2076_v13 = vmul.f32 -1.442695, %v1553_v8 }
0x1f2b   :  { %v1550_v10 = vpop.f32.mrf.mxu1 }
0x1f2c   :  { %2485 = vpow2.f32 %v2076_v13 }
0x1f2d   :  { %v2276_v11 = vpop.f32.mrf.mxu1 }
0x1f37   :  { %v2484_v12 = vpop.eup %2483 }
0x1f38   :  { %1563 = vrot.lane.b32.xlu1 %v2484_v12, %s2633_s4 }
0x1f39   :  { %v2486_v14 = vpop.eup %2485 }
0x1f3a   :  { %v1557_v15 = vadd.f32 1.0, %v2486_v14 }
0x1f3c   :  { %2487 = vrcp.f32 %v1557_v15 }
0x1f49   :  { %v2488_v16 = vpop.eup %2487 }
0x1f4a   :  { %v1561_v19 = vmul.f32 %v2488_v16, %v1484_v31 }
0x1faa   :  { %v1564_v17 = vpop.permute.xlu1 %1563 }
0x1fab   :  { %v1566_v18 = vmul.f32 %v2488_v16, %v1564_v17 }
0x1fad   :  { %1568 = vrot.lane.b32.xlu0 %v1566_v18, %s2633_s4 }
0x201f   :  { %v1569_v20 = vpop.permute.xlu0 %1568 }
0x2020   :  { %v1571_v21 = vadd.f32 %v1569_v20, %v1561_v19 }
0x2022   :  { %2489 = vtanh.f32 %v1571_v21 }
0x202f   :  { %v2490_v22 = vpop.eup %2489 }
0x2030   :  { %1574 = vrot.lane.b32.xlu1 %v2490_v22, %s2633_s4  ;;  %v1746_v22 = vld [vmem:[#allocation3 + $0x28] sm:$0xf] }
0x20a2   :  { %v1575_v23 = vpop.permute.xlu1 %1574 }
0x20a3   :  { %v1577_v24 = vmul.f32 %v2488_v16, %v1575_v23  ;;  %v1747_v23 = vld [vmem:[#allocation3] sm:$0xf0] }
0x20a5   :  { %1585 = vrot.lane.b32.xlu1 %v1577_v24, %s2636_s19  ;;  %1582 = vrot.lane.b32.xlu0 %v1577_v24, %s2630_s1  ;;  %v1748_v24 = vsel %vm421_vm0, %v1746_v22, %v1747_v23 }
0x2117   :  { %v1586_v25 = vpop.permute.xlu1 %1585  ;;  %v1583_v26 = vpop.permute.xlu0 %1582 }
0x2118   :  { %v1588_v27 = vsel %vm467_vm8, %v1583_v26, %v1586_v25 }
0x2119   :  { %v1589_v1 = vsel %vm2837_vm11, %v1588_v27, 0.0 }
0x211a   :  { %v1590_v28 = vpack.c.bf16 %v1589_v1, %v1589_v1 }
0x211c   :  { %2286 = vmatmul.mubr.msk.bf16.vlgmr.msra.gmra.mxu0 %vm495_vm12, %v1590_v28 }
0x211d   :  { %2302 = vmatpush3.bf16.msra.mxu0 %v2997_v53  ;;  %2309 = vmatprep.mubr.msk.bf16.mxu0 %vm2635_vm1, %v2634_v30 }
0x211e   :  { %2303 = vmatprep.subr.bf16.mxu0 %v2634_v30 }
0x2121   :  { %2304 = vmatpush3.bf16.msra.mxu0 %v3000_v54 }
0x2122   :  { %2305 = vmatprep.subr.bf16.mxu0 %v2634_v30 }
0x2125   :  { %2306 = vmatpush3.bf16.msra.mxu0 %v3006_v55 }
0x2126   :  { %2307 = vmatprep.subr.bf16.mxu0 %v2634_v30 }
0x2129   :  { %2308 = vmatpush3.bf16.msra.mxu0 %v3016_v59 }
0x21dc   :  { %v1628_v37 = vpop.f32.mrf.mxu0 }
0x21dd   :  { %v1634_v39 = vadd.f32 %v1628_v37, %v1580_v36 }
0x21de   :  { %v2287_v40 = vpop.f32.mrf.mxu0 }
0x21df   :  { %2491 = vtanh.f32 %v1634_v39  ;;  %v2078_v57 = vmul.f32 -1.442695, %v1634_v39 }
0x21e0   :  { %v1631_v41 = vpop.f32.mrf.mxu0 }
0x21e1   :  { %2493 = vpow2.f32 %v2078_v57 }
0x21e2   :  { %v2288_v58 = vpop.f32.mrf.mxu0 }
0x21ec   :  { %v2492_v42 = vpop.eup %2491 }
0x21ed   :  { %1644 = vrot.lane.b32.xlu0 %v2492_v42, %s2633_s4 }
0x21ee   :  { %v2494_v60 = vpop.eup %2493 }
0x21ef   :  { %v1638_v43 = vadd.f32 1.0, %v2494_v60 }
0x21f1   :  { %2495 = vrcp.f32 %v1638_v43 }
0x21fe   :  { %v2496_v44 = vpop.eup %2495 }
0x21ff   :  { %v1642_v46 = vmul.f32 %v2496_v44, %v1571_v21 }
0x225f   :  { %v1645_v45 = vpop.permute.xlu0 %1644 }
0x2260   :  { %v1647_v29 = vmul.f32 %v2496_v44, %v1645_v45 }
0x2262   :  { %1649 = vrot.lane.b32.xlu1 %v1647_v29, %s2633_s4 }
0x22d4   :  { %v1650_v47 = vpop.permute.xlu1 %1649 }
0x22d5   :  { %v1652_v48 = vadd.f32 %v1650_v47, %v1642_v46 }
0x22d7   :  { %2497 = vtanh.f32 %v1652_v48 }
0x22e4   :  { %v2498_v49 = vpop.eup %2497 }
0x22e5   :  { %1655 = vrot.lane.b32.xlu0 %v2498_v49, %s2633_s4  ;;  %v1827_v49 = vld [vmem:[#allocation3 + $0x28] sm:$0xf0] }
0x2357   :  { %v1656_v50 = vpop.permute.xlu0 %1655 }
0x2358   :  { %v1658_v31 = vmul.f32 %v2496_v44, %v1656_v50  ;;  %v1828_v50 = vld [vmem:[#allocation3] sm:$0xf] }
0x235a   :  { %1672 = vrot.lane.b32.xlu0 %v1658_v31, %s2636_s19  ;;  %1669 = vrot.lane.b32.xlu1 %v1658_v31, %s2630_s1  ;;  %v1830_v31 = vrot.slane %v1827_v49, 4 }
0x23cc   :  { %v1673_v51 = vpop.permute.xlu0 %1672  ;;  %v1670_v52 = vpop.permute.xlu1 %1669 }
0x23cd   :  { %v1675_v32 = vsel %vm467_vm8, %v1670_v52, %v1673_v51  ;;  %v1833_v51 = vrot.slane %v1828_v50, 4 }
0x23ce   :  { %v1676_v34 = vsel %vm2837_vm11, %v1675_v32, 0.0 }
0x23cf   :  { %v1677_v56 = vpack.c.bf16 %v1676_v34, %v1676_v34  ;;  %v1835_v52 = vsel %vm421_vm0, %v1830_v31, %v1833_v51 }
0x23d1   :  { %2298 = vmatmul.mubr.msk.bf16.vlgmr.msra.gmra.mxu1 %vm495_vm12, %v1677_v56 }
0x23d2   :  { %2314 = vmatpush3.bf16.msra.mxu1 %v2997_v53  ;;  %2321 = vmatprep.mubr.msk.bf16.mxu1 %vm2635_vm1, %v2634_v30  ;;  %v1667_v53 = vsel %vm421_vm0, %v1662_v0, %v1665_v2 }
0x23d3   :  { %2315 = vmatprep.subr.bf16.mxu1 %v2634_v30 }
0x23d6   :  { %2316 = vmatpush3.bf16.msra.mxu1 %v3000_v54 }
0x23d7   :  { %2317 = vmatprep.subr.bf16.mxu1 %v2634_v30 }
0x23da   :  { %2318 = vmatpush3.bf16.msra.mxu1 %v3006_v55 }
0x23db   :  { %2319 = vmatprep.subr.bf16.mxu1 %v2634_v30 }
0x23de   :  { %2320 = vmatpush3.bf16.msra.mxu1 %v3016_v59 }
0x2491   :  { %v1715_v3 = vpop.f32.mrf.mxu1 }
0x2492   :  { %v1721_v4 = vadd.f32 %v1715_v3, %v1667_v53 }
0x2493   :  { %v2299_v5 = vpop.f32.mrf.mxu1 }
0x2494   :  { %2499 = vtanh.f32 %v1721_v4  ;;  %v2080_v55 = vmul.f32 -1.442695, %v1721_v4 }
0x2495   :  { %v1718_v6 = vpop.f32.mrf.mxu1 }
0x2496   :  { %2501 = vpow2.f32 %v2080_v55 }
0x2497   :  { %v2300_v54 = vpop.f32.mrf.mxu1 }
0x24a1   :  { %v2500_v7 = vpop.eup %2499 }
0x24a2   :  { %1731 = vrot.lane.b32.xlu1 %v2500_v7, %s2633_s4 }
0x24a3   :  { %v2502_v30 = vpop.eup %2501 }
0x24a4   :  { %v1725_v8 = vadd.f32 1.0, %v2502_v30  ;;  %v1918_v30 = vrot.slane %v3022_v62, 4 }
0x24a6   :  { %2503 = vrcp.f32 %v1725_v8 }
0x24b3   :  { %v2504_v59 = vpop.eup %2503 }
0x24b4   :  { %v1729_v11 = vmul.f32 %v2504_v59, %v1652_v48 }
0x2514   :  { %v1732_v9 = vpop.permute.xlu1 %1731 }
0x2515   :  { %v1734_v10 = vmul.f32 %v2504_v59, %v1732_v9  ;;  %v2085_v9 = vld [vmem:[%s3163_s8] ss:$0 sm:$0xff] }
0x2517   :  { %1736 = vrot.lane.b32.xlu0 %v1734_v10, %s2633_s4 }
0x2589   :  { %v1737_v12 = vpop.permute.xlu0 %1736 }
0x258a   :  { %v1739_v13 = vadd.f32 %v1737_v12, %v1729_v11 }
0x258c   :  { %2505 = vtanh.f32 %v1739_v13 }
0x2599   :  { %v2506_v14 = vpop.eup %2505 }
0x259a   :  { %1742 = vrot.lane.b32.xlu1 %v2506_v14, %s2633_s4 }
0x260c   :  { %v1743_v15 = vpop.permute.xlu1 %1742 }
0x260d   :  { %v1745_v16 = vmul.f32 %v2504_v59, %v1743_v15  ;;  %v2086_v15 = vld [vmem:[#allocation6] ss:$0 sm:$0xff] }
0x260f   :  { %1753 = vrot.lane.b32.xlu1 %v1745_v16, %s2636_s19  ;;  %1750 = vrot.lane.b32.xlu0 %v1745_v16, %s2630_s1 }
0x2681   :  { %v1754_v17 = vpop.permute.xlu1 %1753  ;;  %v1751_v18 = vpop.permute.xlu0 %1750 }
0x2682   :  { %v1756_v19 = vsel %vm467_vm8, %v1751_v18, %v1754_v17 }
0x2683   :  { %v1757_v20 = vsel %vm2837_vm11, %v1756_v19, 0.0 }
0x2684   :  { %v1758_v21 = vpack.c.bf16 %v1757_v20, %v1757_v20 }
0x2686   :  { %2310 = vmatmul.mubr.msk.bf16.vlgmr.msra.gmra.mxu0 %vm495_vm12, %v1758_v21 }
0x2746   :  { %v1796_v25 = vpop.f32.mrf.mxu0 }
0x2747   :  { %v1802_v26 = vadd.f32 %v1796_v25, %v1748_v24 }
0x2748   :  { %v2311_v27 = vpop.f32.mrf.mxu0 }
0x2749   :  { %2507 = vtanh.f32 %v1802_v26  ;;  %v2082_v35 = vmul.f32 -1.442695, %v1802_v26 }
0x274a   :  { %v1799_v1 = vpop.f32.mrf.mxu0 }
0x274b   :  { %2509 = vpow2.f32 %v2082_v35 }
0x274c   :  { %v2312_v28 = vpop.f32.mrf.mxu0 }
0x2756   :  { %v2508_v33 = vpop.eup %2507 }
0x2757   :  { %1812 = vrot.lane.b32.xlu0 %v2508_v33, %s2633_s4 }
0x2758   :  { %v2510_v36 = vpop.eup %2509 }
0x2759   :  { %v1806_v37 = vadd.f32 1.0, %v2510_v36 }
0x275b   :  { %2511 = vrcp.f32 %v1806_v37 }
0x2768   :  { %v2512_v39 = vpop.eup %2511 }
0x2769   :  { %v1810_v58 = vmul.f32 %v2512_v39, %v1739_v13 }
0x27c9   :  { %v1813_v40 = vpop.permute.xlu0 %1812 }
0x27ca   :  { %v1815_v41 = vmul.f32 %v2512_v39, %v1813_v40 }
0x27cc   :  { %1817 = vrot.lane.b32.xlu1 %v1815_v41, %s2633_s4 }
0x283e   :  { %v1818_v42 = vpop.permute.xlu1 %1817 }
0x283f   :  { %v1820_v57 = vadd.f32 %v1818_v42, %v1810_v58 }
0x2841   :  { %2513 = vtanh.f32 %v1820_v57 }
0x284e   :  { %v2514_v60 = vpop.eup %2513 }
0x284f   :  { %1823 = vrot.lane.b32.xlu0 %v2514_v60, %s2633_s4 }
0x28c1   :  { %v1824_v43 = vpop.permute.xlu0 %1823 }
0x28c2   :  { %v1826_v44 = vmul.f32 %v2512_v39, %v1824_v43 }
0x28c4   :  { %1840 = vrot.lane.b32.xlu0 %v1826_v44, %s2636_s19  ;;  %1837 = vrot.lane.b32.xlu1 %v1826_v44, %s2630_s1 }
0x2936   :  { %v1841_v45 = vpop.permute.xlu0 %1840  ;;  %v1838_v29 = vpop.permute.xlu1 %1837 }
0x2937   :  { %v1843_v46 = vsel %vm467_vm8, %v1838_v29, %v1841_v45 }
0x2938   :  { %v1844_v47 = vsel %vm2837_vm11, %v1843_v46, 0.0 }
0x2939   :  { %v1845_v48 = vpack.c.bf16 %v1844_v47, %v1844_v47 }
0x293b   :  { %2322 = vmatmul.mubr.msk.bf16.vlgmr.msra.gmra.mxu1 %vm495_vm12, %v1845_v48 }
0x29fb   :  { %v1883_v32 = vpop.f32.mrf.mxu1 }
0x29fc   :  { %v1889_v34 = vadd.f32 %v1883_v32, %v1835_v52 }
0x29fd   :  { %v2323_v56 = vpop.f32.mrf.mxu1 }
0x29fe   :  { %2515 = vtanh.f32 %v1889_v34  ;;  %v2084_v38 = vmul.f32 -1.442695, %v1889_v34 }
0x29ff   :  { %v1886_v61 = vpop.f32.mrf.mxu1 }
0x2a00   :  { %2517 = vpow2.f32 %v2084_v38 }
0x2a01   :  { %v2324_v63 = vpop.f32.mrf.mxu1 }
0x2a0b   :  { %v2516_v0 = vpop.eup %2515 }
0x2a0c   :  { %1899 = vrot.lane.b32.xlu1 %v2516_v0, %s2633_s4 }
0x2a0d   :  { %v2518_v2 = vpop.eup %2517 }
0x2a0e   :  { %v1893_v53 = vadd.f32 1.0, %v2518_v2 }
0x2a10   :  { %2519 = vrcp.f32 %v1893_v53 }
0x2a1d   :  { %v2520_v3 = vpop.eup %2519 }
0x2a1e   :  { %v1897_v6 = vmul.f32 %v2520_v3, %v1820_v57 }
0x2a7e   :  { %v1900_v4 = vpop.permute.xlu1 %1899 }
0x2a7f   :  { %v1902_v5 = vmul.f32 %v2520_v3, %v1900_v4 }
0x2a81   :  { %1904 = vrot.lane.b32.xlu0 %v1902_v5, %s2633_s4 }
0x2af3   :  { %v1905_v54 = vpop.permute.xlu0 %1904 }
0x2af4   :  { %v1907_v7 = vadd.f32 %v1905_v54, %v1897_v6 }
0x2af6   :  { %2521 = vtanh.f32 %v1907_v7 }
0x2b03   :  { %v2522_v55 = vpop.eup %2521 }
0x2b04   :  { %1910 = vrot.lane.b32.xlu1 %v2522_v55, %s2633_s4 }
0x2b08   :  { %1919 = vrot.lane.b32.xlu1 %v1918_v30, %s2636_s19 }
0x2b76   :  { %v1911_v8 = vpop.permute.xlu1 %1910 }
0x2b77   :  { %v1913_v59 = vmul.f32 %v2520_v3, %v1911_v8 }
0x2b79   :  { %1915 = vrot.lane.b32.xlu0 %v1913_v59, %s2630_s1 }
0x2b7a   :  { %v1920_v10 = vpop.permute.xlu1 %1919 }
0x2beb   :  { %v1916_v11 = vpop.permute.xlu0 %1915 }
0x2bec   :  { %v1922_v12 = vsel %vm467_vm8, %v1916_v11, %v1920_v10 }
0x2bed   :  { %v1930_v13 = vmul.f32 %v2085_v9, %v1922_v12 }
0x2bef   :  { %v1932_v14 = vsel %vm1931_vm13, %v1930_v13, 0.0 }
0x2bf0   :  { %1933 = vadd.xlane.f32.xlu0 %v1932_v14 }
0x2c79   :  { %v1934_v62 = vpop.xlane.xlu0 %1933 }
0x2c7a   :  { %v1942_v16 = vadd.f32 %v2086_v15, %v1934_v62 }
0x2c7c   :  { %1944 = vst.msk [vmem:[%s3164_s10] sm:$0x3] %vm1943_vm14, %v1942_v16 }
0x2c7d   :  { %1949 = vsyncpa [#allocation8], 1 }
0x2c7e   :  { %1950 = vsyncpa [#allocation10], 1 }
0x2c7f   :  { %1951 = vsyncpa [#allocation13], 1 }

</bundles_post_ra>
